<compile_context>
chip_gen: v6e
topology: v6e:2x2x1
jax: 0.10.0
libtpu: 0.0.40
codegen_flags: <defaults>
</compile_context>

<pallas_src>
import functools

import jax
import jax.numpy as jnp
import numpy as np
from jax.experimental import pallas as pl
from jax.experimental.pallas import tpu as pltpu


def _round_up(a, b):
    return ((a + b - 1) // b) * b


# ----------------------------------------------------------------------------
# Pallas kernel: in-VMEM shifted-matmul convs + LSTM gate math
# Row axis = channels / gates, lane axis = flattened padded spatial positions.
# ----------------------------------------------------------------------------
def _convlstm_kernel(xs_ref, xhalo_ref, hs_ref, hhalo_ref, c_ref,
                     wx_ref, wh_ref, b_ref, out_ref, xbuf, hbuf, *,
                     hidden_channels, shifts_x, shifts_h):
    Ch = hidden_channels
    tm = out_ref.shape[-1]

    # Assemble halo'd working tiles (cheap VMEM->VMEM copies; both stores land
    # at 128-aligned lane offsets).
    xbuf[:, :tm] = xs_ref[...]
    xbuf[:, tm:] = xhalo_ref[...]
    hbuf[:, :tm] = hs_ref[...]
    hbuf[:, tm:] = hhalo_ref[...]

    # Conv-as-shifted-matmuls: bias-initialized f32 accumulator, one
    # accumulating MXU pass per tap per stream.
    acc = jnp.broadcast_to(b_ref[...], (4 * Ch, tm)).astype(jnp.float32)
    for t, s in enumerate(shifts_x):
        acc = acc + jnp.dot(wx_ref[t], xbuf[:, s:s + tm],
                            preferred_element_type=jnp.float32)
    for t, s in enumerate(shifts_h):
        acc = acc + jnp.dot(wh_ref[t], hbuf[:, s:s + tm],
                            preferred_element_type=jnp.float32)

    # Gate row order [i, f, o, c]: one contiguous sigmoid, one tanh.
    # (Ch should be a multiple of 8 so these row slices stay on sublane
    # boundaries; other values are still correct, just force relayouts.)
    sig = jax.nn.sigmoid(acc[:3 * Ch, :])
    gi = sig[0 * Ch:1 * Ch]
    gf = sig[1 * Ch:2 * Ch]
    go = sig[2 * Ch:3 * Ch]
    gg = jnp.tanh(acc[3 * Ch:4 * Ch, :])

    cc = gf * c_ref[...] + gi * gg
    out_ref[:Ch, :] = go * jnp.tanh(cc)      # ch
    out_ref[Ch:, :] = cc                     # cc


# ----------------------------------------------------------------------------
# Layout helpers (cheap block permutes / zero pads, no 9x inflation)
# ----------------------------------------------------------------------------
def _to_ext(a_nchw, length, spatial_pad, dtype):
    """(N, C, H, W) -> channel-major, zero-padded, flattened (C, length)."""
    ap = jnp.pad(a_nchw, ((0, 0), (0, 0), spatial_pad[0], spatial_pad[1]))
    C = ap.shape[1]
    flat = ap.transpose(1, 0, 2, 3).reshape(C, -1)     # outer-axis block permute
    return jnp.pad(flat, ((0, 0), (0, length - flat.shape[1]))).astype(dtype)


def _stack_gate_taps(ws):
    """[4 x (Ch, C, k, k)] gate weights -> (k*k, 4*Ch, C), taps row-major."""
    w = jnp.concatenate(ws, axis=0)                    # (4Ch, C, k, k)
    k = w.shape[-1]
    return w.transpose(2, 3, 0, 1).reshape(k * k, w.shape[0], w.shape[1])


# ----------------------------------------------------------------------------
# Wrapper
# ----------------------------------------------------------------------------
def conv_lstm_cell_forward(x, h, c, params, *, input_kernel_size, input_stride,
                           input_padding, tm=1024,
                           compute_dtype=jnp.bfloat16):
    """x:(N,Cin,H,W) h,c:(N,Ch,H,W) NCHW f32 -> (ch, cc) NCHW f32.

    compute_dtype controls the MXU-input precision only (bf16 default on
    v5e/v6e/v7x); accumulation, bias, cell state and gate math stay f32.
    """
    N, Cin, Hin, Win = x.shape
    Nh, Ch, H, W = h.shape
    assert c.shape == h.shape and Nh == N
    Hp, Wp = H + 2, W + 2

    # --- hidden stream: always 3x3 / stride 1 / pad 1 (fused in-kernel) ------
    shifts_h = tuple(di * Wp + dj for di in range(3) for dj in range(3))
    wh = _stack_gate_taps([params["Whi"], params["Whf"], params["Who"],
                           params["Whc"]]).astype(compute_dtype)

    # --- input stream ---------------------------------------------------------
    fused_x = (input_kernel_size == 3 and input_stride == 1
               and input_padding == 1 and (Hin, Win) == (H, W))
    if fused_x:
        shifts_x = shifts_h
        wx = _stack_gate_taps([params["Wxi"], params["Wxf"], params["Wxo"],
                               params["Wxc"]])
        x_src = x
        if Cin % 8:                       # keep the contraction dim 8-aligned
            cpad = _round_up(Cin, 8) - Cin
            x_src = jnp.pad(x_src, ((0, 0), (0, cpad), (0, 0), (0, 0)))
            wx = jnp.pad(wx, ((0, 0), (0, 0), (0, cpad)))
        wx = wx.astype(compute_dtype)
        x_spad, x_dtype = ((1, 1), (1, 1)), compute_dtype
    else:
        # Fallback: precompute x gate pre-activations with one grouped conv;
        # the kernel consumes them through a single identity "tap".
        wx_all = jnp.concatenate([params["Wxi"], params["Wxf"], params["Wxo"],
                                  params["Wxc"]], axis=0)
        xg = jax.lax.conv_general_dilated(
            x, wx_all, (input_stride, input_stride),
            [(input_padding, input_padding)] * 2,
            dimension_numbers=("NCHW", "OIHW", "NCHW"),
            precision=jax.lax.Precision.HIGHEST)
        assert xg.shape[2:] == (H, W), "x-conv output must match h spatial size"
        shifts_x = (0,)
        wx = jnp.eye(4 * Ch, dtype=jnp.float32)[None]       # (1, 4Ch, 4Ch)
        x_src, x_spad, x_dtype = xg, ((0, 2), (0, 2)), jnp.float32

    bias = jnp.concatenate([params["bxi"], params["bxf"], params["bxo"],
                            params["bxc"]])[:, None].astype(jnp.float32)

    # --- lane tiling over the extended (padded, flattened) spatial domain ----
    L = N * Hp * Wp
    halo = 2 * Wp + 2                         # largest tap shift
    halo_pad = _round_up(halo, 128)
    tm_eff = _round_up(max(int(tm), halo_pad), halo_pad)
    # Keep >= ~4 grid steps on small problems (pipelining + v7x 2-TC split).
    tm_eff = min(tm_eff, max(halo_pad, _round_up((L + 3) // 4, halo_pad)))
    n_tiles = (L + tm_eff - 1) // tm_eff
    l_main = n_tiles * tm_eff
    l_tot = l_main + tm_eff                   # one extra zero tile = halo source
    hb = tm_eff // halo_pad                   # halo block stride (exact)

    xs = _to_ext(x_src, l_tot, x_spad, x_dtype)
    hs = _to_ext(h, l_tot, ((1, 1), (1, 1)), compute_dtype)
    cs = _to_ext(c, l_main, ((0, 2), (0, 2)), jnp.float32)
    Cx = xs.shape[0]

    kernel = functools.partial(_convlstm_kernel, hidden_channels=Ch,
                               shifts_x=shifts_x, shifts_h=shifts_h)

    flops = 2 * (len(shifts_x) * Cx + 9 * Ch) * 4 * Ch * l_main
    bytes_acc = int((Cx * xs.dtype.itemsize + Ch * hs.dtype.itemsize)
                    * (l_main + n_tiles * halo_pad)
                    + Ch * l_main * 4 + 2 * Ch * l_main * 4
                    + wx.size * wx.dtype.itemsize
                    + wh.size * wh.dtype.itemsize + 4 * Ch * 4)

    out = pl.pallas_call(
        kernel,
        out_shape=jax.ShapeDtypeStruct((2 * Ch, l_main), jnp.float32),
        grid_spec=pltpu.PrefetchScalarGridSpec(
            num_scalar_prefetch=0,
            grid=(n_tiles,),
            in_specs=[
                pl.BlockSpec((Cx, tm_eff), lambda i: (0, i)),          # x main
                pl.BlockSpec((Cx, halo_pad), lambda i: (0, (i + 1) * hb)),
                pl.BlockSpec((Ch, tm_eff), lambda i: (0, i)),          # h main
                pl.BlockSpec((Ch, halo_pad), lambda i: (0, (i + 1) * hb)),
                pl.BlockSpec((Ch, tm_eff), lambda i: (0, i)),          # c_prev
                pl.BlockSpec(wx.shape, lambda i: (0, 0, 0)),           # x weights
                pl.BlockSpec(wh.shape, lambda i: (0, 0, 0)),           # h weights
                pl.BlockSpec((4 * Ch, 1), lambda i: (0, 0)),           # bias
            ],
            out_specs=pl.BlockSpec((2 * Ch, tm_eff), lambda i: (0, i)),
            scratch_shapes=[
                pltpu.VMEM((Cx, tm_eff + halo_pad), xs.dtype),
                pltpu.VMEM((Ch, tm_eff + halo_pad), hs.dtype),
            ],
        ),
        compiler_params=pltpu.CompilerParams(
            dimension_semantics=("parallel",)),
        cost_estimate=pl.CostEstimate(flops=int(flops),
                                      transcendentals=int(5 * Ch * l_main),
                                      bytes_accessed=bytes_acc),
    )(xs, xs, hs, hs, cs, wx, wh, bias)

    # Un-extend: drop padding rows/cols, back to NCHW (kept for module parity;
    # a rollout should keep the ext layout across steps -- see TODO above).
    out = out[:, :L].reshape(2 * Ch, N, Hp, Wp)[:, :, :H, :W]
    ch = out[:Ch].transpose(1, 0, 2, 3)
    cc = out[Ch:].transpose(1, 0, 2, 3)
    return ch, cc


# ----------------------------------------------------------------------------
# Pure-JAX reference (matches the PyTorch forward) for verification.
# ----------------------------------------------------------------------------
def reference_forward(x, h, c, params, *, input_kernel_size, input_stride,
                      input_padding):
    def conv(inp, w, b, stride, pad):
        out = jax.lax.conv_general_dilated(
            inp, w, (stride, stride), [(pad, pad), (pad, pad)],
            dimension_numbers=("NCHW", "OIHW", "NCHW"),
            precision=jax.lax.Precision.HIGHEST)
        if b is not None:
            out = out + b[None, :, None, None]
        return out

    s, p = input_stride, input_padding
    ci = jax.nn.sigmoid(conv(x, params["Wxi"], params["bxi"], s, p)
                        + conv(h, params["Whi"], None, 1, 1))
    cf = jax.nn.sigmoid(conv(x, params["Wxf"], params["bxf"], s, p)
                        + conv(h, params["Whf"], None, 1, 1))
    cc = cf * c + ci * jnp.tanh(conv(x, params["Wxc"], params["bxc"], s, p)
                                + conv(h, params["Whc"], None, 1, 1))
    co = jax.nn.sigmoid(conv(x, params["Wxo"], params["bxo"], s, p)
                        + conv(h, params["Who"], None, 1, 1))
    ch = co * jnp.tanh(cc)
    return ch, cc


# ----------------------------------------------------------------------------
# Deterministic parameter init (shapes from ConvLSTMCell.__init__).
# ----------------------------------------------------------------------------
def init_params(key, input_channels, hidden_channels, input_kernel_size):
    ks = jax.random.split(key, 8)
    Ci, Chid, k = input_channels, hidden_channels, input_kernel_size

    def w(key, cout, cin, kk):
        return 0.1 * jax.random.normal(key, (cout, cin, kk, kk), jnp.float32)

    return {
        "Wxi": w(ks[0], Chid, Ci, k), "Whi": w(ks[1], Chid, Chid, 3),
        "Wxf": w(ks[2], Chid, Ci, k), "Whf": w(ks[3], Chid, Chid, 3),
        "Wxc": w(ks[4], Chid, Ci, k), "Whc": w(ks[5], Chid, Chid, 3),
        "Wxo": w(ks[6], Chid, Ci, k), "Who": w(ks[7], Chid, Chid, 3),
        # nn.init.zeros_ on Wxi/Wxf/Wxc biases; Wxo.bias.fill_(1.0)
        "bxi": jnp.zeros((Chid,), jnp.float32),
        "bxf": jnp.zeros((Chid,), jnp.float32),
        "bxc": jnp.zeros((Chid,), jnp.float32),
        "bxo": jnp.ones((Chid,), jnp.float32),
    }


if __name__ == "__main__":
    N, Cin, H, W = 2, 4, 16, 16
    Chid = 32

    key = jax.random.PRNGKey(0)
    kx_, kh_, kc_, kp_ = jax.random.split(key, 4)
    x = jax.random.normal(kx_, (N, Cin, H, W), jnp.float32)
    h = jax.random.normal(kh_, (N, Chid, H, W), jnp.float32)
    c = jax.random.normal(kc_, (N, Chid, H, W), jnp.float32)

    # --- main config: 3x3 / stride 1 / pad 1 (PhyCRNet ConvLSTM layer) -------
    cfg = dict(input_kernel_size=3, input_stride=1, input_padding=1)
    params = init_params(kp_, Cin, Chid, 3)
    ch_ref, cc_ref = reference_forward(x, h, c, params, **cfg)

    # f32 MXU-input path: tight check against the conv reference.
    ch32, cc32 = conv_lstm_cell_forward(x, h, c, params,
                                        compute_dtype=jnp.float32, **cfg)
    jax.block_until_ready((ch32, cc32))
    np.testing.assert_allclose(np.asarray(ch32), np.asarray(ch_ref),
                               rtol=1e-3, atol=1e-3)
    np.testing.assert_allclose(np.asarray(cc32), np.asarray(cc_ref),
                               rtol=1e-3, atol=1e-3)

    # Default bf16 MXU-input path (f32 accumulate + f32 gate math).
    chbf, ccbf = conv_lstm_cell_forward(x, h, c, params, **cfg)
    jax.block_until_ready((chbf, ccbf))
    np.testing.assert_allclose(np.asarray(chbf), np.asarray(ch_ref),
                               rtol=1e-1, atol=1e-1)
    np.testing.assert_allclose(np.asarray(ccbf), np.asarray(cc_ref),
                               rtol=1e-1, atol=1e-1)

    # Fallback config (non-3x3 input conv): 5x5 / stride 1 / pad 2.
    cfg5 = dict(input_kernel_size=5, input_stride=1, input_padding=2)
    params5 = init_params(kp_, Cin, Chid, 5)
    ch5_ref, cc5_ref = reference_forward(x, h, c, params5, **cfg5)
    ch5, cc5 = conv_lstm_cell_forward(x, h, c, params5,
                                      compute_dtype=jnp.float32, **cfg5)
    jax.block_until_ready((ch5, cc5))
    np.testing.assert_allclose(np.asarray(ch5), np.asarray(ch5_ref),
                               rtol=1e-3, atol=1e-3)
    np.testing.assert_allclose(np.asarray(cc5), np.asarray(cc5_ref),
                               rtol=1e-3, atol=1e-3)

    print("KERNEL_OK")
</pallas_src>

<mosaic_0001>
module attributes {stable_mosaic.version = 11 : i64} {
  func.func @_convlstm_kernel(%arg0: i32, %arg1: memref<8x256xf32, #tpu.memory_space<vmem>>, %arg2: memref<8x128xf32, #tpu.memory_space<vmem>>, %arg3: memref<32x256xf32, #tpu.memory_space<vmem>>, %arg4: memref<32x128xf32, #tpu.memory_space<vmem>>, %arg5: memref<32x256xf32, #tpu.memory_space<vmem>>, %arg6: memref<9x128x8xf32, #tpu.memory_space<vmem>>, %arg7: memref<9x128x32xf32, #tpu.memory_space<vmem>>, %arg8: memref<128x1xf32, #tpu.memory_space<vmem>>, %arg9: memref<64x256xf32, #tpu.memory_space<vmem>>, %arg10: memref<8x384xf32, #tpu.memory_space<vmem>>, %arg11: memref<32x384xf32, #tpu.memory_space<vmem>>) attributes {dimension_semantics = [#tpu.dimension_semantics<parallel>], iteration_bounds = array<i64: 3>, scalar_prefetch = 0 : i64, scratch_operands = 2 : i64, tpu.core_type = #tpu.core_type<tc>, window_params = [{transform_indices = @transform_0, window_bounds = array<i64: 8, 256>}, {transform_indices = @transform_1, window_bounds = array<i64: 8, 128>}, {transform_indices = @transform_2, window_bounds = array<i64: 32, 256>}, {transform_indices = @transform_3, window_bounds = array<i64: 32, 128>}, {transform_indices = @transform_4, window_bounds = array<i64: 32, 256>}, {pipeline_mode = #tpu.pipeline_mode<synchronous>, transform_indices = @transform_5, window_bounds = array<i64: 9, 128, 8>}, {pipeline_mode = #tpu.pipeline_mode<synchronous>, transform_indices = @transform_6, window_bounds = array<i64: 9, 128, 32>}, {pipeline_mode = #tpu.pipeline_mode<synchronous>, transform_indices = @transform_7, window_bounds = array<i64: 128, 1>}, {transform_indices = @transform_8, window_bounds = array<i64: 64, 256>}]} {
    %c0 = arith.constant 0 : index
    %c0_0 = arith.constant 0 : index
    %0 = vector.load %arg1[%c0, %c0_0] : memref<8x256xf32, #tpu.memory_space<vmem>>, vector<8x256xf32>
    %c0_1 = arith.constant 0 : index
    %c0_2 = arith.constant 0 : index
    %1 = vector.load %arg10[%c0_1, %c0_2] : memref<8x384xf32, #tpu.memory_space<vmem>>, vector<8x256xf32>
    tpu.vector_store %arg10[%c0_1, %c0_2], %0 {strides = array<i32>} : memref<8x384xf32, #tpu.memory_space<vmem>>, vector<8x256xf32>,
    %c0_3 = arith.constant 0 : index
    %c0_4 = arith.constant 0 : index
    %2 = vector.load %arg2[%c0_3, %c0_4] : memref<8x128xf32, #tpu.memory_space<vmem>>, vector<8x128xf32>
    %c0_5 = arith.constant 0 : index
    %c256 = arith.constant 256 : index
    %3 = vector.load %arg10[%c0_5, %c256] : memref<8x384xf32, #tpu.memory_space<vmem>>, vector<8x128xf32>
    tpu.vector_store %arg10[%c0_5, %c256], %2 {strides = array<i32>} : memref<8x384xf32, #tpu.memory_space<vmem>>, vector<8x128xf32>,
    %c0_6 = arith.constant 0 : index
    %c0_7 = arith.constant 0 : index
    %4 = vector.load %arg3[%c0_6, %c0_7] : memref<32x256xf32, #tpu.memory_space<vmem>>, vector<32x256xf32>
    %c0_8 = arith.constant 0 : index
    %c0_9 = arith.constant 0 : index
    %5 = vector.load %arg11[%c0_8, %c0_9] : memref<32x384xf32, #tpu.memory_space<vmem>>, vector<32x256xf32>
    tpu.vector_store %arg11[%c0_8, %c0_9], %4 {strides = array<i32>} : memref<32x384xf32, #tpu.memory_space<vmem>>, vector<32x256xf32>,
    %c0_10 = arith.constant 0 : index
    %c0_11 = arith.constant 0 : index
    %6 = vector.load %arg4[%c0_10, %c0_11] : memref<32x128xf32, #tpu.memory_space<vmem>>, vector<32x128xf32>
    %c0_12 = arith.constant 0 : index
    %c256_13 = arith.constant 256 : index
    %7 = vector.load %arg11[%c0_12, %c256_13] : memref<32x384xf32, #tpu.memory_space<vmem>>, vector<32x128xf32>
    tpu.vector_store %arg11[%c0_12, %c256_13], %6 {strides = array<i32>} : memref<32x384xf32, #tpu.memory_space<vmem>>, vector<32x128xf32>,
    %c0_14 = arith.constant 0 : index
    %c0_15 = arith.constant 0 : index
    %8 = vector.load %arg8[%c0_14, %c0_15] : memref<128x1xf32, #tpu.memory_space<vmem>>, vector<128x1xf32>
    %9 = vector.shape_cast %8 : vector<128x1xf32> to vector<128x1xf32>
    %10 = vector.broadcast %9 : vector<128x1xf32> to vector<128x256xf32>
    %c0_16 = arith.constant 0 : index
    %c0_17 = arith.constant 0 : index
    %c0_18 = arith.constant 0 : index
    %11 = vector.load %arg6[%c0_16, %c0_17, %c0_18] : memref<9x128x8xf32, #tpu.memory_space<vmem>>, vector<1x128x8xf32>
    %12 = vector.shape_cast %11 : vector<1x128x8xf32> to vector<128x8xf32>
    %c0_19 = arith.constant 0 : index
    %c0_20 = arith.constant 0 : index
    %13 = vector.load %arg10[%c0_19, %c0_20] : memref<8x384xf32, #tpu.memory_space<vmem>>, vector<8x256xf32>
    %cst = arith.constant dense<0.000000e+00> : vector<128x256xf32>
    %14 = tpu.matmul %12, %13, %cst {dimension_numbers = #tpu.dot_dimension_numbers<[1], [0], [0], [1], [0, 0, 1, 1], [], []>} : vector<128x8xf32>, vector<8x256xf32>, vector<128x256xf32> -> vector<128x256xf32>
    %15 = arith.addf %10, %14 : vector<128x256xf32>
    %c1 = arith.constant 1 : index
    %c0_21 = arith.constant 0 : index
    %c0_22 = arith.constant 0 : index
    %16 = vector.load %arg6[%c1, %c0_21, %c0_22] : memref<9x128x8xf32, #tpu.memory_space<vmem>>, vector<1x128x8xf32>
    %17 = vector.shape_cast %16 : vector<1x128x8xf32> to vector<128x8xf32>
    %c0_23 = arith.constant 0 : index
    %c1_24 = arith.constant 1 : index
    %18 = vector.load %arg10[%c0_23, %c1_24] : memref<8x384xf32, #tpu.memory_space<vmem>>, vector<8x256xf32>
    %cst_25 = arith.constant dense<0.000000e+00> : vector<128x256xf32>
    %19 = tpu.matmul %17, %18, %cst_25 {dimension_numbers = #tpu.dot_dimension_numbers<[1], [0], [0], [1], [0, 0, 1, 1], [], []>} : vector<128x8xf32>, vector<8x256xf32>, vector<128x256xf32> -> vector<128x256xf32>
    %20 = arith.addf %15, %19 : vector<128x256xf32>
    %c2 = arith.constant 2 : index
    %c0_26 = arith.constant 0 : index
    %c0_27 = arith.constant 0 : index
    %21 = vector.load %arg6[%c2, %c0_26, %c0_27] : memref<9x128x8xf32, #tpu.memory_space<vmem>>, vector<1x128x8xf32>
    %22 = vector.shape_cast %21 : vector<1x128x8xf32> to vector<128x8xf32>
    %c0_28 = arith.constant 0 : index
    %c2_29 = arith.constant 2 : index
    %23 = vector.load %arg10[%c0_28, %c2_29] : memref<8x384xf32, #tpu.memory_space<vmem>>, vector<8x256xf32>
    %cst_30 = arith.constant dense<0.000000e+00> : vector<128x256xf32>
    %24 = tpu.matmul %22, %23, %cst_30 {dimension_numbers = #tpu.dot_dimension_numbers<[1], [0], [0], [1], [0, 0, 1, 1], [], []>} : vector<128x8xf32>, vector<8x256xf32>, vector<128x256xf32> -> vector<128x256xf32>
    %25 = arith.addf %20, %24 : vector<128x256xf32>
    %c3 = arith.constant 3 : index
    %c0_31 = arith.constant 0 : index
    %c0_32 = arith.constant 0 : index
    %26 = vector.load %arg6[%c3, %c0_31, %c0_32] : memref<9x128x8xf32, #tpu.memory_space<vmem>>, vector<1x128x8xf32>
    %27 = vector.shape_cast %26 : vector<1x128x8xf32> to vector<128x8xf32>
    %c0_33 = arith.constant 0 : index
    %c18 = arith.constant 18 : index
    %28 = vector.load %arg10[%c0_33, %c18] : memref<8x384xf32, #tpu.memory_space<vmem>>, vector<8x256xf32>
    %cst_34 = arith.constant dense<0.000000e+00> : vector<128x256xf32>
    %29 = tpu.matmul %27, %28, %cst_34 {dimension_numbers = #tpu.dot_dimension_numbers<[1], [0], [0], [1], [0, 0, 1, 1], [], []>} : vector<128x8xf32>, vector<8x256xf32>, vector<128x256xf32> -> vector<128x256xf32>
    %30 = arith.addf %25, %29 : vector<128x256xf32>
    %c4 = arith.constant 4 : index
    %c0_35 = arith.constant 0 : index
    %c0_36 = arith.constant 0 : index
    %31 = vector.load %arg6[%c4, %c0_35, %c0_36] : memref<9x128x8xf32, #tpu.memory_space<vmem>>, vector<1x128x8xf32>
    %32 = vector.shape_cast %31 : vector<1x128x8xf32> to vector<128x8xf32>
    %c0_37 = arith.constant 0 : index
    %c19 = arith.constant 19 : index
    %33 = vector.load %arg10[%c0_37, %c19] : memref<8x384xf32, #tpu.memory_space<vmem>>, vector<8x256xf32>
    %cst_38 = arith.constant dense<0.000000e+00> : vector<128x256xf32>
    %34 = tpu.matmul %32, %33, %cst_38 {dimension_numbers = #tpu.dot_dimension_numbers<[1], [0], [0], [1], [0, 0, 1, 1], [], []>} : vector<128x8xf32>, vector<8x256xf32>, vector<128x256xf32> -> vector<128x256xf32>
    %35 = arith.addf %30, %34 : vector<128x256xf32>
    %c5 = arith.constant 5 : index
    %c0_39 = arith.constant 0 : index
    %c0_40 = arith.constant 0 : index
    %36 = vector.load %arg6[%c5, %c0_39, %c0_40] : memref<9x128x8xf32, #tpu.memory_space<vmem>>, vector<1x128x8xf32>
    %37 = vector.shape_cast %36 : vector<1x128x8xf32> to vector<128x8xf32>
    %c0_41 = arith.constant 0 : index
    %c20 = arith.constant 20 : index
    %38 = vector.load %arg10[%c0_41, %c20] : memref<8x384xf32, #tpu.memory_space<vmem>>, vector<8x256xf32>
    %cst_42 = arith.constant dense<0.000000e+00> : vector<128x256xf32>
    %39 = tpu.matmul %37, %38, %cst_42 {dimension_numbers = #tpu.dot_dimension_numbers<[1], [0], [0], [1], [0, 0, 1, 1], [], []>} : vector<128x8xf32>, vector<8x256xf32>, vector<128x256xf32> -> vector<128x256xf32>
    %40 = arith.addf %35, %39 : vector<128x256xf32>
    %c6 = arith.constant 6 : index
    %c0_43 = arith.constant 0 : index
    %c0_44 = arith.constant 0 : index
    %41 = vector.load %arg6[%c6, %c0_43, %c0_44] : memref<9x128x8xf32, #tpu.memory_space<vmem>>, vector<1x128x8xf32>
    %42 = vector.shape_cast %41 : vector<1x128x8xf32> to vector<128x8xf32>
    %c0_45 = arith.constant 0 : index
    %c36 = arith.constant 36 : index
    %43 = vector.load %arg10[%c0_45, %c36] : memref<8x384xf32, #tpu.memory_space<vmem>>, vector<8x256xf32>
    %cst_46 = arith.constant dense<0.000000e+00> : vector<128x256xf32>
    %44 = tpu.matmul %42, %43, %cst_46 {dimension_numbers = #tpu.dot_dimension_numbers<[1], [0], [0], [1], [0, 0, 1, 1], [], []>} : vector<128x8xf32>, vector<8x256xf32>, vector<128x256xf32> -> vector<128x256xf32>
    %45 = arith.addf %40, %44 : vector<128x256xf32>
    %c7 = arith.constant 7 : index
    %c0_47 = arith.constant 0 : index
    %c0_48 = arith.constant 0 : index
    %46 = vector.load %arg6[%c7, %c0_47, %c0_48] : memref<9x128x8xf32, #tpu.memory_space<vmem>>, vector<1x128x8xf32>
    %47 = vector.shape_cast %46 : vector<1x128x8xf32> to vector<128x8xf32>
    %c0_49 = arith.constant 0 : index
    %c37 = arith.constant 37 : index
    %48 = vector.load %arg10[%c0_49, %c37] : memref<8x384xf32, #tpu.memory_space<vmem>>, vector<8x256xf32>
    %cst_50 = arith.constant dense<0.000000e+00> : vector<128x256xf32>
    %49 = tpu.matmul %47, %48, %cst_50 {dimension_numbers = #tpu.dot_dimension_numbers<[1], [0], [0], [1], [0, 0, 1, 1], [], []>} : vector<128x8xf32>, vector<8x256xf32>, vector<128x256xf32> -> vector<128x256xf32>
    %50 = arith.addf %45, %49 : vector<128x256xf32>
    %c8 = arith.constant 8 : index
    %c0_51 = arith.constant 0 : index
    %c0_52 = arith.constant 0 : index
    %51 = vector.load %arg6[%c8, %c0_51, %c0_52] : memref<9x128x8xf32, #tpu.memory_space<vmem>>, vector<1x128x8xf32>
    %52 = vector.shape_cast %51 : vector<1x128x8xf32> to vector<128x8xf32>
    %c0_53 = arith.constant 0 : index
    %c38 = arith.constant 38 : index
    %53 = vector.load %arg10[%c0_53, %c38] : memref<8x384xf32, #tpu.memory_space<vmem>>, vector<8x256xf32>
    %cst_54 = arith.constant dense<0.000000e+00> : vector<128x256xf32>
    %54 = tpu.matmul %52, %53, %cst_54 {dimension_numbers = #tpu.dot_dimension_numbers<[1], [0], [0], [1], [0, 0, 1, 1], [], []>} : vector<128x8xf32>, vector<8x256xf32>, vector<128x256xf32> -> vector<128x256xf32>
    %55 = arith.addf %50, %54 : vector<128x256xf32>
    %c0_55 = arith.constant 0 : index
    %c0_56 = arith.constant 0 : index
    %c0_57 = arith.constant 0 : index
    %56 = vector.load %arg7[%c0_55, %c0_56, %c0_57] : memref<9x128x32xf32, #tpu.memory_space<vmem>>, vector<1x128x32xf32>
    %57 = vector.shape_cast %56 : vector<1x128x32xf32> to vector<128x32xf32>
    %c0_58 = arith.constant 0 : index
    %c0_59 = arith.constant 0 : index
    %58 = vector.load %arg11[%c0_58, %c0_59] : memref<32x384xf32, #tpu.memory_space<vmem>>, vector<32x256xf32>
    %cst_60 = arith.constant dense<0.000000e+00> : vector<128x256xf32>
    %59 = tpu.matmul %57, %58, %cst_60 {dimension_numbers = #tpu.dot_dimension_numbers<[1], [0], [0], [1], [0, 0, 1, 1], [], []>} : vector<128x32xf32>, vector<32x256xf32>, vector<128x256xf32> -> vector<128x256xf32>
    %60 = arith.addf %55, %59 : vector<128x256xf32>
    %c1_61 = arith.constant 1 : index
    %c0_62 = arith.constant 0 : index
    %c0_63 = arith.constant 0 : index
    %61 = vector.load %arg7[%c1_61, %c0_62, %c0_63] : memref<9x128x32xf32, #tpu.memory_space<vmem>>, vector<1x128x32xf32>
    %62 = vector.shape_cast %61 : vector<1x128x32xf32> to vector<128x32xf32>
    %c0_64 = arith.constant 0 : index
    %c1_65 = arith.constant 1 : index
    %63 = vector.load %arg11[%c0_64, %c1_65] : memref<32x384xf32, #tpu.memory_space<vmem>>, vector<32x256xf32>
    %cst_66 = arith.constant dense<0.000000e+00> : vector<128x256xf32>
    %64 = tpu.matmul %62, %63, %cst_66 {dimension_numbers = #tpu.dot_dimension_numbers<[1], [0], [0], [1], [0, 0, 1, 1], [], []>} : vector<128x32xf32>, vector<32x256xf32>, vector<128x256xf32> -> vector<128x256xf32>
    %65 = arith.addf %60, %64 : vector<128x256xf32>
    %c2_67 = arith.constant 2 : index
    %c0_68 = arith.constant 0 : index
    %c0_69 = arith.constant 0 : index
    %66 = vector.load %arg7[%c2_67, %c0_68, %c0_69] : memref<9x128x32xf32, #tpu.memory_space<vmem>>, vector<1x128x32xf32>
    %67 = vector.shape_cast %66 : vector<1x128x32xf32> to vector<128x32xf32>
    %c0_70 = arith.constant 0 : index
    %c2_71 = arith.constant 2 : index
    %68 = vector.load %arg11[%c0_70, %c2_71] : memref<32x384xf32, #tpu.memory_space<vmem>>, vector<32x256xf32>
    %cst_72 = arith.constant dense<0.000000e+00> : vector<128x256xf32>
    %69 = tpu.matmul %67, %68, %cst_72 {dimension_numbers = #tpu.dot_dimension_numbers<[1], [0], [0], [1], [0, 0, 1, 1], [], []>} : vector<128x32xf32>, vector<32x256xf32>, vector<128x256xf32> -> vector<128x256xf32>
    %70 = arith.addf %65, %69 : vector<128x256xf32>
    %c3_73 = arith.constant 3 : index
    %c0_74 = arith.constant 0 : index
    %c0_75 = arith.constant 0 : index
    %71 = vector.load %arg7[%c3_73, %c0_74, %c0_75] : memref<9x128x32xf32, #tpu.memory_space<vmem>>, vector<1x128x32xf32>
    %72 = vector.shape_cast %71 : vector<1x128x32xf32> to vector<128x32xf32>
    %c0_76 = arith.constant 0 : index
    %c18_77 = arith.constant 18 : index
    %73 = vector.load %arg11[%c0_76, %c18_77] : memref<32x384xf32, #tpu.memory_space<vmem>>, vector<32x256xf32>
    %cst_78 = arith.constant dense<0.000000e+00> : vector<128x256xf32>
    %74 = tpu.matmul %72, %73, %cst_78 {dimension_numbers = #tpu.dot_dimension_numbers<[1], [0], [0], [1], [0, 0, 1, 1], [], []>} : vector<128x32xf32>, vector<32x256xf32>, vector<128x256xf32> -> vector<128x256xf32>
    %75 = arith.addf %70, %74 : vector<128x256xf32>
    %c4_79 = arith.constant 4 : index
    %c0_80 = arith.constant 0 : index
    %c0_81 = arith.constant 0 : index
    %76 = vector.load %arg7[%c4_79, %c0_80, %c0_81] : memref<9x128x32xf32, #tpu.memory_space<vmem>>, vector<1x128x32xf32>
    %77 = vector.shape_cast %76 : vector<1x128x32xf32> to vector<128x32xf32>
    %c0_82 = arith.constant 0 : index
    %c19_83 = arith.constant 19 : index
    %78 = vector.load %arg11[%c0_82, %c19_83] : memref<32x384xf32, #tpu.memory_space<vmem>>, vector<32x256xf32>
    %cst_84 = arith.constant dense<0.000000e+00> : vector<128x256xf32>
    %79 = tpu.matmul %77, %78, %cst_84 {dimension_numbers = #tpu.dot_dimension_numbers<[1], [0], [0], [1], [0, 0, 1, 1], [], []>} : vector<128x32xf32>, vector<32x256xf32>, vector<128x256xf32> -> vector<128x256xf32>
    %80 = arith.addf %75, %79 : vector<128x256xf32>
    %c5_85 = arith.constant 5 : index
    %c0_86 = arith.constant 0 : index
    %c0_87 = arith.constant 0 : index
    %81 = vector.load %arg7[%c5_85, %c0_86, %c0_87] : memref<9x128x32xf32, #tpu.memory_space<vmem>>, vector<1x128x32xf32>
    %82 = vector.shape_cast %81 : vector<1x128x32xf32> to vector<128x32xf32>
    %c0_88 = arith.constant 0 : index
    %c20_89 = arith.constant 20 : index
    %83 = vector.load %arg11[%c0_88, %c20_89] : memref<32x384xf32, #tpu.memory_space<vmem>>, vector<32x256xf32>
    %cst_90 = arith.constant dense<0.000000e+00> : vector<128x256xf32>
    %84 = tpu.matmul %82, %83, %cst_90 {dimension_numbers = #tpu.dot_dimension_numbers<[1], [0], [0], [1], [0, 0, 1, 1], [], []>} : vector<128x32xf32>, vector<32x256xf32>, vector<128x256xf32> -> vector<128x256xf32>
    %85 = arith.addf %80, %84 : vector<128x256xf32>
    %c6_91 = arith.constant 6 : index
    %c0_92 = arith.constant 0 : index
    %c0_93 = arith.constant 0 : index
    %86 = vector.load %arg7[%c6_91, %c0_92, %c0_93] : memref<9x128x32xf32, #tpu.memory_space<vmem>>, vector<1x128x32xf32>
    %87 = vector.shape_cast %86 : vector<1x128x32xf32> to vector<128x32xf32>
    %c0_94 = arith.constant 0 : index
    %c36_95 = arith.constant 36 : index
    %88 = vector.load %arg11[%c0_94, %c36_95] : memref<32x384xf32, #tpu.memory_space<vmem>>, vector<32x256xf32>
    %cst_96 = arith.constant dense<0.000000e+00> : vector<128x256xf32>
    %89 = tpu.matmul %87, %88, %cst_96 {dimension_numbers = #tpu.dot_dimension_numbers<[1], [0], [0], [1], [0, 0, 1, 1], [], []>} : vector<128x32xf32>, vector<32x256xf32>, vector<128x256xf32> -> vector<128x256xf32>
    %90 = arith.addf %85, %89 : vector<128x256xf32>
    %c7_97 = arith.constant 7 : index
    %c0_98 = arith.constant 0 : index
    %c0_99 = arith.constant 0 : index
    %91 = vector.load %arg7[%c7_97, %c0_98, %c0_99] : memref<9x128x32xf32, #tpu.memory_space<vmem>>, vector<1x128x32xf32>
    %92 = vector.shape_cast %91 : vector<1x128x32xf32> to vector<128x32xf32>
    %c0_100 = arith.constant 0 : index
    %c37_101 = arith.constant 37 : index
    %93 = vector.load %arg11[%c0_100, %c37_101] : memref<32x384xf32, #tpu.memory_space<vmem>>, vector<32x256xf32>
    %cst_102 = arith.constant dense<0.000000e+00> : vector<128x256xf32>
    %94 = tpu.matmul %92, %93, %cst_102 {dimension_numbers = #tpu.dot_dimension_numbers<[1], [0], [0], [1], [0, 0, 1, 1], [], []>} : vector<128x32xf32>, vector<32x256xf32>, vector<128x256xf32> -> vector<128x256xf32>
    %95 = arith.addf %90, %94 : vector<128x256xf32>
    %c8_103 = arith.constant 8 : index
    %c0_104 = arith.constant 0 : index
    %c0_105 = arith.constant 0 : index
    %96 = vector.load %arg7[%c8_103, %c0_104, %c0_105] : memref<9x128x32xf32, #tpu.memory_space<vmem>>, vector<1x128x32xf32>
    %97 = vector.shape_cast %96 : vector<1x128x32xf32> to vector<128x32xf32>
    %c0_106 = arith.constant 0 : index
    %c38_107 = arith.constant 38 : index
    %98 = vector.load %arg11[%c0_106, %c38_107] : memref<32x384xf32, #tpu.memory_space<vmem>>, vector<32x256xf32>
    %cst_108 = arith.constant dense<0.000000e+00> : vector<128x256xf32>
    %99 = tpu.matmul %97, %98, %cst_108 {dimension_numbers = #tpu.dot_dimension_numbers<[1], [0], [0], [1], [0, 0, 1, 1], [], []>} : vector<128x32xf32>, vector<32x256xf32>, vector<128x256xf32> -> vector<128x256xf32>
    %100 = arith.addf %95, %99 : vector<128x256xf32>
    %101 = vector.extract_strided_slice %100 {offsets = [0, 0], sizes = [96, 256], strides = [1, 1]} : vector<128x256xf32> to vector<96x256xf32>
    %102 = arith.negf %101 : vector<96x256xf32>
    %103 = math.exp %102 : vector<96x256xf32>
    %cst_109 = arith.constant 1.000000e+00 : f32
    %104 = vector.broadcast %cst_109 : f32 to vector<96x256xf32>
    %105 = arith.addf %104, %103 : vector<96x256xf32>
    %106 = arith.divf %104, %105 : vector<96x256xf32>
    %107 = vector.extract_strided_slice %106 {offsets = [0, 0], sizes = [32, 256], strides = [1, 1]} : vector<96x256xf32> to vector<32x256xf32>
    %108 = vector.extract_strided_slice %106 {offsets = [32, 0], sizes = [32, 256], strides = [1, 1]} : vector<96x256xf32> to vector<32x256xf32>
    %109 = vector.extract_strided_slice %106 {offsets = [64, 0], sizes = [32, 256], strides = [1, 1]} : vector<96x256xf32> to vector<32x256xf32>
    %110 = vector.extract_strided_slice %100 {offsets = [96, 0], sizes = [32, 256], strides = [1, 1]} : vector<128x256xf32> to vector<32x256xf32>
    %111 = math.tanh %110 : vector<32x256xf32>
    %c0_110 = arith.constant 0 : index
    %c0_111 = arith.constant 0 : index
    %112 = vector.load %arg5[%c0_110, %c0_111] : memref<32x256xf32, #tpu.memory_space<vmem>>, vector<32x256xf32>
    %113 = arith.mulf %108, %112 : vector<32x256xf32>
    %114 = arith.mulf %107, %111 : vector<32x256xf32>
    %115 = arith.addf %113, %114 : vector<32x256xf32>
    %116 = math.tanh %115 : vector<32x256xf32>
    %117 = arith.mulf %109, %116 : vector<32x256xf32>
    %c0_112 = arith.constant 0 : index
    %c0_113 = arith.constant 0 : index
    %118 = vector.load %arg9[%c0_112, %c0_113] : memref<64x256xf32, #tpu.memory_space<vmem>>, vector<32x256xf32>
    tpu.vector_store %arg9[%c0_112, %c0_113], %117 {strides = array<i32>} : memref<64x256xf32, #tpu.memory_space<vmem>>, vector<32x256xf32>,
    %c32 = arith.constant 32 : index
    %c0_114 = arith.constant 0 : index
    %119 = vector.load %arg9[%c32, %c0_114] : memref<64x256xf32, #tpu.memory_space<vmem>>, vector<32x256xf32>
    tpu.vector_store %arg9[%c32, %c0_114], %115 {strides = array<i32>} : memref<64x256xf32, #tpu.memory_space<vmem>>, vector<32x256xf32>,
    return
  }
  func.func @transform_0(%arg0: i32) -> (i32, i32) {
    %c0_i32 = arith.constant 0 : i32
    %c0_i32_0 = arith.constant 0 : i32
    return %c0_i32, %arg0 : i32, i32
  }
  func.func @transform_1(%arg0: i32) -> (i32, i32) {
    %c1_i32 = arith.constant 1 : i32
    %0 = arith.addi %arg0, %c1_i32 : i32
    %c2_i32 = arith.constant 2 : i32
    %1 = arith.muli %0, %c2_i32 : i32
    %c0_i32 = arith.constant 0 : i32
    %c0_i32_0 = arith.constant 0 : i32
    return %c0_i32, %1 : i32, i32
  }
  func.func @transform_2(%arg0: i32) -> (i32, i32) {
    %c0_i32 = arith.constant 0 : i32
    %c0_i32_0 = arith.constant 0 : i32
    return %c0_i32, %arg0 : i32, i32
  }
  func.func @transform_3(%arg0: i32) -> (i32, i32) {
    %c1_i32 = arith.constant 1 : i32
    %0 = arith.addi %arg0, %c1_i32 : i32
    %c2_i32 = arith.constant 2 : i32
    %1 = arith.muli %0, %c2_i32 : i32
    %c0_i32 = arith.constant 0 : i32
    %c0_i32_0 = arith.constant 0 : i32
    return %c0_i32, %1 : i32, i32
  }
  func.func @transform_4(%arg0: i32) -> (i32, i32) {
    %c0_i32 = arith.constant 0 : i32
    %c0_i32_0 = arith.constant 0 : i32
    return %c0_i32, %arg0 : i32, i32
  }
  func.func @transform_5(%arg0: i32) -> (i32, i32, i32) {
    %c0_i32 = arith.constant 0 : i32
    %c0_i32_0 = arith.constant 0 : i32
    %c0_i32_1 = arith.constant 0 : i32
    %c0_i32_2 = arith.constant 0 : i32
    return %c0_i32, %c0_i32_0, %c0_i32_1 : i32, i32, i32
  }
  func.func @transform_6(%arg0: i32) -> (i32, i32, i32) {
    %c0_i32 = arith.constant 0 : i32
    %c0_i32_0 = arith.constant 0 : i32
    %c0_i32_1 = arith.constant 0 : i32
    %c0_i32_2 = arith.constant 0 : i32
    return %c0_i32, %c0_i32_0, %c0_i32_1 : i32, i32, i32
  }
  func.func @transform_7(%arg0: i32) -> (i32, i32) {
    %c0_i32 = arith.constant 0 : i32
    %c0_i32_0 = arith.constant 0 : i32
    %c0_i32_1 = arith.constant 0 : i32
    return %c0_i32, %c0_i32_0 : i32, i32
  }
  func.func @transform_8(%arg0: i32) -> (i32, i32) {
    %c0_i32 = arith.constant 0 : i32
    %c0_i32_0 = arith.constant 0 : i32
    return %c0_i32, %arg0 : i32, i32
  }
}

</mosaic_0001>

<bundles_post_ra>
// kernel: tpu_custom_call.1
= control target key start
LH: loop header
LB: loop body
LE: loop exit
PB: predicated region body
PF: predicated region fallthrough
CT: control target
= control target key end

     0   :  { %s10708_s0 = inlined_call_operand.vmem [shape: f32[8,1024], index: 0, kind: input, shape index: {}]   ;;  %s10709_s1 = inlined_call_operand.vmem [shape: f32[8,1024], index: 1, kind: input, shape index: {}]   ;;  %s10710_s2 = inlined_call_operand.vmem [shape: f32[32,1024], index: 2, kind: input, shape index: {}]   ;;  %s10711_s3 = inlined_call_operand.vmem [shape: f32[32,1024], index: 3, kind: input, shape index: {}]   ;;  %s10712_s4 = inlined_call_operand.vmem [shape: f32[32,768], index: 4, kind: input, shape index: {}]   ;;  %s10713_s5 = inlined_call_operand.vmem [shape: f32[9,128,8], index: 5, kind: input, shape index: {}]   ;;  %s10714_s6 = inlined_call_operand.vmem [shape: f32[9,128,32], index: 6, kind: input, shape index: {}]   ;;  %s10715_s7 = inlined_call_operand.vmem [shape: f32[128,1], index: 7, kind: input, shape index: {}]   ;;  %s10716_s8 = inlined_call_operand.hbm [shape: f32[64,768], index: 8, kind: output, shape index: {}]  }
   0x1   :  { %10746 = sst [smem:[#allocation120_spill]] %s10710_s2 }
   0x2   :  { %10747 = sst [smem:[#allocation121_spill]] %s10711_s3 }
   0x3   :  { %13 = vsyncpa [#allocation8], 0 }
   0x4   :  { %15 = vsyncpa [#allocation8 + $0x1], 0  ;;  %s7058_s27 = smov 0   ;;  %s7060_s28 = smov 0  }
   0x5   :  { %s7062_s29 = smov 0   ;;  %s7064_s30 = smov 0  }
   0x6   :  { %s7066_s9 = smov 0   ;;  %s7068_s10 = smov 0  }
   0x7 LB: > { %s7089_s11 = sadd.s32 4294967295, %s6997_s10   ;;  %s6100_s12 = sadd.s32 4294967294, %s6997_s10   ;;  %s6997_s10 = sphi %s7068_s10, %s11022_s10   ;;  %s6993_s9 = sphi %s7066_s9, %s11021_s9   ;;  %s6989_s30 = sphi %s7064_s30, %s11020_s30   ;;  %s6985_s29 = sphi %s7062_s29, %s11019_s29   ;;  %s6981_s28 = sphi %s7060_s28, %s11018_s28   ;;  %s6977_s27 = sphi %s7058_s27, %s11017_s27  }
   0x8   : > { %s7093_s13 = sadd.s32 1, %s6997_s10   ;;  %s84_s14 = sadd.s32 1, %s6993_s9 }
   0x9   : > { %s81_s15 = ssub.s32 %s6997_s10, %s7093_s13  ;;  %p91_p0 = scmp.ne.s32.totalorder %s6993_s9, %s6989_s30 }
   0xa   : > { %p82_p1 = scmp.eq.s32.totalorder %s81_s15, 0  ;;  %p92_p2 = scmp.eq.s32.totalorder %s6997_s10, 0 }
   0xb   : > { %s6705_s16 = sshll.u32 %s6997_s10, 1  ;;  %s114_s17 = sadd.s32 1, %s6985_s29 }
   0xc   : > { %s7104_s18 = scalar_select %p82_p1, %s6993_s9, %s84_s14  }
   0xd   : > { %p7109_p3 = por %p92_p2, %p91_p0  ;;  %s6706_s20 = sadd.s32 2, %s6705_s16 }
   0xe   : > { %s6708_s21 = sadd.s32 2, %s6706_s20  ;;  %p121_p4 = scmp.ne.s32.totalorder %s6985_s29, %s6981_s28 }
   0xf   : > { %s111_s22 = ssub.s32 %s6706_s20, %s6708_s21  ;;  %p240_p5 = scmp.eq.s32.totalorder %s7089_s11, 2 }
  0x10   : > { %p112_p6 = scmp.eq.s32.totalorder %s111_s22, 0  ;;  %p7116_p7 = por %p121_p4, %p92_p2 }
  0x11   : > { %p7123_p8 = por %p240_p5, %p91_p0  ;;  %p245_p9 = scmp.ne.s32.totalorder %s6989_s30, %s6977_s27 }
  0x12   : > { %s7130_s25 = scalar_select %p112_p6, %s6985_s29, %s114_s17  }
  0x13   : > { %p246_p10 = scmp.eq.s32.totalorder %s6100_s12, 2  ;;  %p6106_p12 = scmp.ge.s32.totalorder %s6997_s10, 3 }
  0x15   : > { %p7132_p11 = por %p246_p10, %p245_p9  ;;  %271 = sbr.rel (%p6106_p12) target bundleno = 62 (0x3e), region = 28 }
  0x1a   : > { %294 = sbr.rel (!%p7109_p3) target bundleno = 40 (0x28), region = 40  ;;  %s296_s14 = sand.u32 (%p7109_p3), 1, %s6993_s9  }
  0x1b   : > { %s6709_s15 = sshll.u32 (%p7109_p3), %s6997_s10, 4  ;;  %s6107_s16 = sshll.u32 (%p7109_p3), %s296_s14, 6 }
  0x1c   : > { %s10752_s2 = sld [smem:[#allocation120_spill]] (%p7109_p3)  ;;  %s298_s12 = scalar_lea.vmem (%p7109_p3), [#allocation4], %s6107_s16 }
  0x22   : > { %s301_s17 = scalar_lea.vmem %s10752_s2, %s6709_s15 }
  0x23   : > { %v314_v0 = vld [vmem:[%s301_s17] sm:$0xff]  ;;  %v316_v1 = vld [vmem:[%s301_s17 + $0x8] sm:$0xff] }
  0x24   : > { %v318_v2 = vld [vmem:[%s301_s17 + $0x40] sm:$0xff]  ;;  %315 = vst [vmem:[%s298_s12] sm:$0xff] %v314_v0  ;;  %317 = vst [vmem:[%s298_s12 + $0x8] sm:$0xff] %v316_v1  ;;  %v320_v3 = vld [vmem:[%s301_s17 + $0x48] sm:$0xff] }
  0x25   : > { %319 = vst [vmem:[%s298_s12 + $0x10] sm:$0xff] %v318_v2  ;;  %v322_v4 = vld [vmem:[%s301_s17 + $0x80] sm:$0xff]  ;;  %v324_v5 = vld [vmem:[%s301_s17 + $0x88] sm:$0xff]  ;;  %321 = vst [vmem:[%s298_s12 + $0x18] sm:$0xff] %v320_v3 }
  0x26   : > { %323 = vst [vmem:[%s298_s12 + $0x20] sm:$0xff] %v322_v4  ;;  %325 = vst [vmem:[%s298_s12 + $0x28] sm:$0xff] %v324_v5  ;;  %v326_v6 = vld [vmem:[%s301_s17 + $0xc0] sm:$0xff]  ;;  %v328_v7 = vld [vmem:[%s301_s17 + $0xc8] sm:$0xff] }
  0x27   : > { %327 = vst [vmem:[%s298_s12 + $0x30] sm:$0xff] %v326_v6  ;;  %329 = vst [vmem:[%s298_s12 + $0x38] sm:$0xff] %v328_v7 }
  0x28 PF: > { %335 = sbr.rel (!%p7116_p7) target bundleno = 54 (0x36), region = 63  ;;  %s337_s22 = sand.u32 (%p7116_p7), 1, %s6985_s29  }
  0x29   : > { %s6111_s14 = sshll.u32 (%p7116_p7), %s6997_s10, 4  ;;  %s6110_s15 = sshll.u32 (%p7116_p7), %s337_s22, 5 }
  0x2a   : > { %s10753_s3 = sld [smem:[#allocation121_spill]] (%p7116_p7)  ;;  %s339_s2 = scalar_lea.vmem (%p7116_p7), [#allocation5], %s6110_s15 }
  0x30   : > { %s6006_s21 = scalar_lea.vmem %s10753_s3, %s6111_s14 }
  0x31   : > { %v6112_v8 = vld [vmem:[%s6006_s21 + $0x10] sm:$0xff] }
  0x32   : > { %v6113_v9 = vld [vmem:[%s6006_s21 + $0x50] sm:$0xff]  ;;  %379 = vst [vmem:[%s339_s2] sm:$0xff] %v6112_v8 }
  0x33   : > { %v6114_v10 = vld [vmem:[%s6006_s21 + $0x90] sm:$0xff]  ;;  %381 = vst [vmem:[%s339_s2 + $0x8] sm:$0xff] %v6113_v9 }
  0x34   : > { %383 = vst [vmem:[%s339_s2 + $0x10] sm:$0xff] %v6114_v10  ;;  %v6115_v11 = vld [vmem:[%s6006_s21 + $0xd0] sm:$0xff] }
  0x35   : > { %385 = vst [vmem:[%s339_s2 + $0x18] sm:$0xff] %v6115_v11 }
  0x36 PF: > { %391 = sbr.rel (!%p7109_p3) target bundleno = 62 (0x3e), region = 101  ;;  %s393_s23 = sand.u32 (%p7109_p3), 1, %s6993_s9  }
  0x37   : > { %s6710_s17 = sshll.u32 (%p7109_p3), %s6997_s10, 4  ;;  %s6116_s12 = sshll.u32 (%p7109_p3), %s393_s23, 6 }
  0x38   : > { %s398_s16 = scalar_lea.vmem (%p7109_p3), %s10712_s4, %s6710_s17  ;;  %s395_s15 = scalar_lea.vmem (%p7109_p3), [#allocation6], %s6116_s12 }
  0x39   : > { %v411_v12 = vld [vmem:[%s398_s16] sm:$0xff] (%p7109_p3)  ;;  %v413_v13 = vld [vmem:[%s398_s16 + $0x8] sm:$0xff] (%p7109_p3)  ;;  %v415_v14 = vld [vmem:[%s398_s16 + $0x30] sm:$0xff] (%p7109_p3) }
  0x3a   : > { %412 = vst [vmem:[%s395_s15] sm:$0xff] (%p7109_p3), %v411_v12  ;;  %414 = vst [vmem:[%s395_s15 + $0x8] sm:$0xff] (%p7109_p3), %v413_v13  ;;  %v417_v15 = vld [vmem:[%s398_s16 + $0x38] sm:$0xff] (%p7109_p3)  ;;  %v419_v16 = vld [vmem:[%s398_s16 + $0x60] sm:$0xff] (%p7109_p3) }
  0x3b   : > { %416 = vst [vmem:[%s395_s15 + $0x10] sm:$0xff] %v415_v14  ;;  %v421_v17 = vld [vmem:[%s398_s16 + $0x68] sm:$0xff]  ;;  %418 = vst [vmem:[%s395_s15 + $0x18] sm:$0xff] %v417_v15  ;;  %v423_v18 = vld [vmem:[%s398_s16 + $0x90] sm:$0xff] }
  0x3c   : > { %420 = vst [vmem:[%s395_s15 + $0x20] sm:$0xff] %v419_v16  ;;  %422 = vst [vmem:[%s395_s15 + $0x28] sm:$0xff] %v421_v17  ;;  %v425_v19 = vld [vmem:[%s398_s16 + $0x98] sm:$0xff] }
  0x3d   : > { %424 = vst [vmem:[%s395_s15 + $0x30] sm:$0xff] %v423_v18  ;;  %426 = vst [vmem:[%s395_s15 + $0x38] sm:$0xff] %v425_v19 }
  0x3e PF: > { %p6119_p13 = scmp.ge.s32.totalorder %s6997_s10, 1  ;;  %p431_p0 = scmp.lt.s32.totalorder %s6997_s10, 4 }
  0x40   : > { %p432_p1 = pnand %p6119_p13, %p431_p0 }
  0x42   : > { %435 = sbr.rel (%p432_p1) target bundleno = 1019 (0x3fb), region = 124 }
  0x47   : > { %s6124_s2 = sshll.u32 %s7089_s11, 1  ;;  %v10723_v20 = vmov 0.0   ;;  %s7000_s15 = smov 127   ;;  %v649_v23 = vld [vmem:[%s10713_s5] sm:$0xff]  ;;  %vm667_vm0 = vcmask 64512   ;;  %v650_v25 = vld [vmem:[%s10713_s5 + $0x8] sm:$0xff] }
  0x48   : > { %p505_p2 = scmp.lt.s32.totalorder %s6124_s2, 7  ;;  %s6712_s19 = sadd.s32 2, %s6124_s2  ;;  %780 = vmatprep.mubr.f32.mxu0 %v10723_v20  ;;  %1055 = vmatprep.mubr.f32.mxu1 %v10723_v20  ;;  %v651_v26 = vld [vmem:[%s10713_s5 + $0x10] sm:$0xff]  ;;  %v652_v27 = vld [vmem:[%s10713_s5 + $0x18] sm:$0xff]  ;;  %v653_v28 = vld [vmem:[%s10713_s5 + $0x20] sm:$0xff]  ;;  %v7008_v52 = vmov 0  }
  0x49   : > { %p512_p3 = scmp.lt.s32.totalorder %s6712_s19, 7  ;;  %s10721_s14 = smov 109   ;;  %v654_v29 = vld [vmem:[%s10713_s5 + $0x28] sm:$0xff]  ;;  %v655_v30 = vld [vmem:[%s10713_s5 + $0x30] sm:$0xff]  ;;  %v656_v31 = vld [vmem:[%s10713_s5 + $0x38] sm:$0xff]  ;;  %6785 = vset.pattern.permute.xlu1 %v7008_v52  ;;  %6784 = vset.pattern.permute.xlu0 %v7008_v52  ;;  %vm938_vm1 = vcmask 1039360  }
  0x4a   : > { %s11024_s2 = smov (!%p505_p2, %s6124_s2), 7  ;;  %s10719_s3 = smov 108   ;;  %v657_v32 = vld [vmem:[%s10713_s5 + $0x40] sm:$0xff]  ;;  %v658_v33 = vld [vmem:[%s10713_s5 + $0x48] sm:$0xff]  ;;  %v659_v34 = vld [vmem:[%s10713_s5 + $0x50] sm:$0xff]  ;;  %vm1207_vm2 = vcmask 1031168  }
  0x4b   : > { %s11026_s19 = smov (!%p512_p3, %s6712_s19), 7  ;;  %s6125_s20 = sshll.u32 %s11024_s2, 3  ;;  %v660_v35 = vld [vmem:[%s10713_s5 + $0x58] sm:$0xff]  ;;  %v661_v38 = vld [vmem:[%s10713_s5 + $0x60] sm:$0xff]  ;;  %v662_v41 = vld [vmem:[%s10713_s5 + $0x68] sm:$0xff]  ;;  %vm1476_vm3 = vcmask 900096  }
  0x4c   : > { %s508_s17 = scalar_lea.vmem %s10708_s0, %s6125_s20  ;;  %s6127_s12 = sshll.u32 %s11026_s19, 3  ;;  %v663_v43 = vld [vmem:[%s10713_s5 + $0x70] sm:$0xff]  ;;  %v664_v45 = vld [vmem:[%s10713_s5 + $0x78] sm:$0xff]  ;;  %v6144_v58 = vld [vmem:[%s10713_s5 + $0x80] sm:$0xff]  ;;  %vm1745_vm4 = vcmask 891904   ;;  %vm2014_vm5 = vcmask 883712  }
  0x4d   : > { %v7166_v21 = vld [vmem:[%s508_s17 + $0x8] sm:$0xff]  ;;  %v7168_v22 = vld [vmem:[%s508_s17] sm:$0xff]  ;;  %s515_s16 = scalar_lea.vmem %s10709_s1, %s6127_s12  ;;  %s7001_s19 = smov 126   ;;  %v6146_v5 = vld [vmem:[%s10713_s5 + $0x90] sm:$0xff]  ;;  %vm2283_vm6 = vcmask 752640   ;;  %vm2552_vm7 = vcmask 744448  }
  0x4e   : > { %934 = vrot.lane.b32.xlu0 %v7166_v21, %s7000_s15  ;;  %932 = vrot.lane.b32.xlu1 %v7168_v22, %s7000_s15  ;;  %v7180_v24 = vld [vmem:[%s515_s16] sm:$0xff]  ;;  %s7002_s17 = smov 110   ;;  %s10717_s22 = smov 92   ;;  %v6145_v0 = vld [vmem:[%s10713_s5 + $0x88] sm:$0xff]  ;;  %vm2821_vm8 = vcmask 736256   ;;  %vm3091_vm9 = vcmask 261120  }
  0x4f   : > { %746 = vmatprep.subr.mxu0 %v7166_v21  ;;  %s7006_s23 = smov 91   ;;  %s445_s12 = sand.u32 1, %s6981_s28   ;;  %v6176_v1 = vld [vmem:[%s10713_s5 + $0x100] sm:$0xff]  ;;  %v6177_v6 = vld [vmem:[%s10713_s5 + $0x108] sm:$0xff]  ;;  %v6147_v10 = vld [vmem:[%s10713_s5 + $0x98] sm:$0xff] }
  0x50   : > { %747 = vmatpush1.msra.mxu0 %v7168_v22  ;;  %s7263_s16 = sand.u32 1, %s6989_s30   ;;  %s6121_s20 = sshll.u32 %s445_s12, 5  ;;  %v6178_v11 = vld [vmem:[%s10713_s5 + $0x110] sm:$0xff]  ;;  %v6148_v14 = vld [vmem:[%s10713_s5 + $0xa0] sm:$0xff]  ;;  %v6179_v15 = vld [vmem:[%s10713_s5 + $0x118] sm:$0xff] }
  0x51   : > { %6128 = vmatmul.mubr.msk.f32.vlgmr.msra.gmra.mxu0 %vm667_vm0, %v649_v23  ;;  %s6120_s21 = sshll.u32 %s7263_s16, 6  ;;  %s7287_s2 = scalar_lea.vmem [#allocation5], %s6121_s20  ;;  %v6184_v52 = vld [vmem:[%s10713_s5 + $0x140] sm:$0xff] }
  0x52   : > { %936 = vrot.lane.b32.xlu0 %v7180_v24, %s7000_s15  ;;  %1203 = vrot.lane.b32.xlu1 %v7166_v21, %s7001_s19  ;;  %v7290_v36 = vld [vmem:[%s7287_s2 + $0x18] sm:$0xff]  ;;  %v7324_v42 = vld [vmem:[%s7287_s2 + $0x10] sm:$0xff]  ;;  %s6713_s12 = sshll.u32 %s7089_s11, 8  ;;  %s5958_s11 = scalar_lea.sflag [#allocation8], %s7263_s16 }
  0x53   : > { %786 = vmatprep.mubr.f32.mxu0 %v10723_v20  ;;  %v7357_v47 = vld [vmem:[%s7287_s2 + $0x8] sm:$0xff]  ;;  %v7379_v50 = vld [vmem:[%s7287_s2] sm:$0xff]  ;;  %s10756_s2 = smov 92  }
  0x55   : > { %6129 = vmatmul.mubr.msk.f32.gmra.mxu0 %vm667_vm0, %v650_v25 }
  0x56   : > { %1205 = vrot.lane.b32.xlu0 %v7180_v24, %s7001_s19  ;;  %1201 = vrot.lane.b32.xlu1 %v7168_v22, %s7001_s19 }
  0x57   : > { %792 = vmatprep.mubr.f32.mxu0 %v10723_v20 }
  0x59   : > { %6130 = vmatmul.mubr.msk.f32.gmra.mxu0 %vm667_vm0, %v651_v26  ;;  %v6150_v26 = vld [vmem:[%s10713_s5 + $0xb0] sm:$0xff] }
  0x5a   : > { %1472 = vrot.lane.b32.xlu0 %v7166_v21, %s7002_s17  ;;  %1474 = vrot.lane.b32.xlu1 %v7180_v24, %s7002_s17 }
  0x5b   : > { %798 = vmatprep.mubr.f32.mxu0 %v10723_v20 }
  0x5d   : > { %6131 = vmatmul.mubr.msk.f32.gmra.mxu0 %vm667_vm0, %v652_v27  ;;  %v6181_v27 = vld [vmem:[%s10713_s5 + $0x128] sm:$0xff] }
  0x5e   : > { %1470 = vrot.lane.b32.xlu0 %v7168_v22, %s7002_s17  ;;  %1741 = vrot.lane.b32.xlu1 %v7166_v21, %s10721_s14 }
  0x5f   : > { %804 = vmatprep.mubr.f32.mxu0 %v10723_v20 }
  0x61   : > { %6132 = vmatmul.mubr.msk.f32.gmra.mxu0 %vm667_vm0, %v653_v28 }
  0x62   : > { %1743 = vrot.lane.b32.xlu0 %v7180_v24, %s10721_s14  ;;  %1739 = vrot.lane.b32.xlu1 %v7168_v22, %s10721_s14  ;;  %s7294_s14 = scalar_lea.vmem [#allocation4], %s6120_s21 }
  0x63   : > { %810 = vmatprep.mubr.f32.mxu0 %v10723_v20  ;;  %v7297_v37 = vld [vmem:[%s7294_s14 + $0x38] sm:$0xff]  ;;  %v7309_v39 = vld [vmem:[%s7294_s14 + $0x30] sm:$0xff]  ;;  %v7312_v40 = vld [vmem:[%s7294_s14 + $0x28] sm:$0xff] }
  0x64   : > { %v7336_v44 = vld [vmem:[%s7294_s14 + $0x20] sm:$0xff]  ;;  %v7348_v46 = vld [vmem:[%s7294_s14 + $0x18] sm:$0xff]  ;;  %v7365_v48 = vld [vmem:[%s7294_s14 + $0x10] sm:$0xff] }
  0x65   : > { %6133 = vmatmul.mubr.msk.f32.gmra.mxu0 %vm667_vm0, %v654_v29  ;;  %v7372_v49 = vld [vmem:[%s7294_s14 + $0x8] sm:$0xff]  ;;  %v7386_v51 = vld [vmem:[%s7294_s14] sm:$0xff] }
  0x66   : > { %2010 = vrot.lane.b32.xlu0 %v7166_v21, %s10719_s3  ;;  %2012 = vrot.lane.b32.xlu1 %v7180_v24, %s10719_s3 }
  0x67   : > { %816 = vmatprep.mubr.f32.mxu0 %v10723_v20 }
  0x69   : > { %6134 = vmatmul.mubr.msk.f32.gmra.mxu0 %vm667_vm0, %v655_v30  ;;  %v6151_v30 = vld [vmem:[%s10713_s5 + $0xb8] sm:$0xff] }
  0x6a   : > { %2008 = vrot.lane.b32.xlu0 %v7168_v22, %s10719_s3  ;;  %2279 = vrot.lane.b32.xlu1 %v7166_v21, %s10717_s22  ;;  %s7007_s3 = smov 90  }
  0x6b   : > { %822 = vmatprep.mubr.f32.mxu0 %v10723_v20 }
  0x6d   : > { %6135 = vmatmul.mubr.msk.f32.gmra.mxu0 %vm667_vm0, %v656_v31  ;;  %v6182_v31 = vld [vmem:[%s10713_s5 + $0x130] sm:$0xff] }
  0x6e   : > { %2281 = vrot.lane.b32.xlu0 %v7180_v24, %s10717_s22  ;;  %2277 = vrot.lane.b32.xlu1 %v7168_v22, %s10717_s22  ;;  %s6123_s22 = sshll.u32 %s7263_s16, 7 }
  0x6f   : > { %828 = vmatprep.mubr.f32.mxu0 %v10723_v20 }
  0x71   : > { %6136 = vmatmul.mubr.msk.f32.gmra.mxu0 %vm667_vm0, %v657_v32 }
  0x72   : > { %2548 = vrot.lane.b32.xlu0 %v7166_v21, %s7006_s23  ;;  %2550 = vrot.lane.b32.xlu1 %v7180_v24, %s7006_s23 }
  0x73   : > { %834 = vmatprep.mubr.f32.mxu0 %v10723_v20 }
  0x75   : > { %6137 = vmatmul.mubr.msk.f32.gmra.mxu0 %vm667_vm0, %v658_v33 }
  0x76   : > { %2546 = vrot.lane.b32.xlu0 %v7168_v22, %s7006_s23  ;;  %2817 = vrot.lane.b32.xlu1 %v7166_v21, %s7007_s3  ;;  %v6149_v21 = vld [vmem:[%s10713_s5 + $0xa8] sm:$0xff] }
  0x77   : > { %840 = vmatprep.mubr.f32.mxu0 %v10723_v20 }
  0x79   : > { %6138 = vmatmul.mubr.msk.f32.gmra.mxu0 %vm667_vm0, %v659_v34 }
  0x7a   : > { %2819 = vrot.lane.b32.xlu0 %v7180_v24, %s7007_s3  ;;  %2815 = vrot.lane.b32.xlu1 %v7168_v22, %s7007_s3  ;;  %v6180_v22 = vld [vmem:[%s10713_s5 + $0x120] sm:$0xff] }
  0x7b   : > { %846 = vmatprep.mubr.f32.mxu0 %v10723_v20 }
  0x7d   : > { %6139 = vmatmul.mubr.msk.f32.gmra.mxu0 %vm667_vm0, %v660_v35  ;;  %v6152_v35 = vld [vmem:[%s10713_s5 + $0xc0] sm:$0xff] }
  0x7e   : > { %3396 = vrot.lane.b32.xlu1 %v7290_v36, %s7000_s15  ;;  %3394 = vrot.lane.b32.xlu0 %v7297_v37, %s7000_s15 }
  0x7f   : > { %852 = vmatprep.mubr.f32.mxu0 %v10723_v20 }
  0x81   : > { %6140 = vmatmul.mubr.msk.f32.gmra.mxu0 %vm667_vm0, %v661_v38  ;;  %v6183_v38 = vld [vmem:[%s10713_s5 + $0x138] sm:$0xff] }
  0x82   : > { %3392 = vrot.lane.b32.xlu0 %v7309_v39, %s7000_s15  ;;  %3388 = vrot.lane.b32.xlu1 %v7312_v40, %s7000_s15 }
  0x83   : > { %858 = vmatprep.mubr.f32.mxu0 %v10723_v20 }
  0x85   : > { %6141 = vmatmul.mubr.msk.f32.gmra.mxu0 %vm667_vm0, %v662_v41 }
  0x86   : > { %3390 = vrot.lane.b32.xlu0 %v7324_v42, %s7000_s15  ;;  %3692 = vrot.lane.b32.xlu1 %v7297_v37, %s7001_s19 }
  0x87   : > { %864 = vmatprep.mubr.f32.mxu0 %v10723_v20 }
  0x89   : > { %6142 = vmatmul.mubr.msk.f32.gmra.mxu0 %vm667_vm0, %v663_v43 }
  0x8a   : > { %3694 = vrot.lane.b32.xlu0 %v7290_v36, %s7001_s19  ;;  %3386 = vrot.lane.b32.xlu1 %v7336_v44, %s7000_s15 }
  0x8b   : > { %870 = vmatprep.mubr.f32.mxu0 %v10723_v20 }
  0x8d   : > { %6143 = vmatmul.mubr.msk.f32.gmra.mxu0 %vm667_vm0, %v664_v45  ;;  %v6153_v45 = vld [vmem:[%s10713_s5 + $0xc8] sm:$0xff] }
  0x8e   : > { %3690 = vrot.lane.b32.xlu0 %v7309_v39, %s7001_s19  ;;  %3382 = vrot.lane.b32.xlu1 %v7348_v46, %s7000_s15 }
  0x8f   : > { %1324 = vmatprep.mubr.f32.mxu0 %v10723_v20 }
  0x92   : > { %3384 = vrot.lane.b32.xlu0 %v7357_v47, %s7000_s15  ;;  %3686 = vrot.lane.b32.xlu1 %v7312_v40, %s7001_s19 }
  0x96   : > { %3688 = vrot.lane.b32.xlu0 %v7324_v42, %s7001_s19  ;;  %3380 = vrot.lane.b32.xlu1 %v7365_v48, %s7000_s15 }
  0x9a   : > { %3684 = vrot.lane.b32.xlu0 %v7336_v44, %s7001_s19  ;;  %3376 = vrot.lane.b32.xlu1 %v7372_v49, %s7000_s15 }
  0x9e   : > { %3378 = vrot.lane.b32.xlu0 %v7379_v50, %s7000_s15  ;;  %3680 = vrot.lane.b32.xlu1 %v7348_v46, %s7001_s19 }
  0xa2   : > { %3682 = vrot.lane.b32.xlu0 %v7357_v47, %s7001_s19  ;;  %3374 = vrot.lane.b32.xlu1 %v7386_v51, %s7000_s15  ;;  %s10754_s15 = smov 109  }
  0xa6   : > { %3678 = vrot.lane.b32.xlu0 %v7365_v48, %s7001_s19  ;;  %3674 = vrot.lane.b32.xlu1 %v7372_v49, %s7001_s19 }
  0xaa   : > { %3676 = vrot.lane.b32.xlu0 %v7379_v50, %s7001_s19  ;;  %3672 = vrot.lane.b32.xlu1 %v7386_v51, %s7001_s19 }
  0xae   : > { %3990 = vrot.lane.b32.xlu0 %v7297_v37, %s7002_s17  ;;  %3992 = vrot.lane.b32.xlu1 %v7290_v36, %s7002_s17 }
  0xb2   : > { %3988 = vrot.lane.b32.xlu0 %v7309_v39, %s7002_s17  ;;  %3984 = vrot.lane.b32.xlu1 %v7312_v40, %s7002_s17 }
  0xb6   : > { %3986 = vrot.lane.b32.xlu0 %v7324_v42, %s7002_s17  ;;  %4288 = vrot.lane.b32.xlu1 %v7297_v37, %s10754_s15 }
  0xba   : > { %4290 = vrot.lane.b32.xlu0 %v7290_v36, %s10754_s15  ;;  %3982 = vrot.lane.b32.xlu1 %v7336_v44, %s7002_s17 }
  0xbe   : > { %4286 = vrot.lane.b32.xlu0 %v7309_v39, %s10754_s15  ;;  %3978 = vrot.lane.b32.xlu1 %v7348_v46, %s7002_s17 }
  0xc0   : > { %v935_v53 = vpop.permute.xlu0 %934  ;;  %v933_v54 = vpop.permute.xlu1 %932 }
  0xc1   : > { %v939_v59 = vsel %vm938_vm1, %v933_v54, %v935_v53 }
  0xc2   : > { %3980 = vrot.lane.b32.xlu0 %v7357_v47, %s7002_s17  ;;  %4282 = vrot.lane.b32.xlu1 %v7312_v40, %s10754_s15 }
  0xc4   : > { %v937_v55 = vpop.permute.xlu0 %936  ;;  %v1204_v56 = vpop.permute.xlu1 %1203 }
  0xc5   : > { %v940_v57 = vsel %vm938_vm1, %v935_v53, %v937_v55  ;;  %v6154_v55 = vld [vmem:[%s10713_s5 + $0xd0] sm:$0xff] }
  0xc6   : > { %1021 = vmatprep.subr.mxu1 %v940_v57  ;;  %4284 = vrot.lane.b32.xlu0 %v7324_v42, %s10754_s15 }
  0xc7   : > { %3976 = vrot.lane.b32.xlu1 %v7365_v48, %s7002_s17  ;;  %1022 = vmatpush1.msra.mxu1 %v939_v59  ;;  %v6155_v59 = vld [vmem:[%s10713_s5 + $0xd8] sm:$0xff] }
  0xc8   : > { %v1206_v60 = vpop.permute.xlu0 %1205  ;;  %6160 = vmatmul.mubr.msk.f32.vlgmr.msra.gmra.mxu1 %vm667_vm0, %v6144_v58  ;;  %v1202_v61 = vpop.permute.xlu1 %1201 }
  0xc9   : > { %v1208_v62 = vsel %vm1207_vm2, %v1202_v61, %v1204_v56  ;;  %v1209_v63 = vsel %vm1207_vm2, %v1204_v56, %v1206_v60  ;;  %1061 = vmatprep.mubr.f32.mxu1 %v10723_v20  ;;  %v6185_v56 = vld [vmem:[%s10713_s5 + $0x148] sm:$0xff]  ;;  %v6186_v60 = vld [vmem:[%s10713_s5 + $0x150] sm:$0xff] }
  0xca   : > { %1290 = vmatprep.subr.mxu0 %v1209_v63  ;;  %4280 = vrot.lane.b32.xlu0 %v7336_v44, %s10754_s15  ;;  %v6156_v63 = vld [vmem:[%s10713_s5 + $0xe0] sm:$0xff] }
  0xcb   : > { %3972 = vrot.lane.b32.xlu1 %v7372_v49, %s7002_s17  ;;  %1291 = vmatpush1.msra.mxu0 %v1208_v62 }
  0xcc   : > { %v1473_v2 = vpop.permute.xlu0 %1472  ;;  %6161 = vmatmul.mubr.msk.f32.gmra.mxu1 %vm667_vm0, %v6145_v0  ;;  %v1475_v3 = vpop.permute.xlu1 %1474  ;;  %6192 = vmatmul.mubr.msk.f32.vlgmr.msra.gmra.mxu0 %vm667_vm0, %v6176_v1  ;;  %v6187_v0 = vld [vmem:[%s10713_s5 + $0x158] sm:$0xff] }
  0xcd   : > { %v1478_v4 = vsel %vm1476_vm3, %v1473_v2, %v1475_v3  ;;  %1067 = vmatprep.mubr.f32.mxu1 %v10723_v20  ;;  %1330 = vmatprep.mubr.f32.mxu0 %v10723_v20  ;;  %v6157_v3 = vld [vmem:[%s10713_s5 + $0xe8] sm:$0xff] }
  0xce   : > { %1559 = vmatprep.subr.mxu1 %v1478_v4  ;;  %3974 = vrot.lane.b32.xlu0 %v7379_v50, %s7002_s17  ;;  %v6188_v4 = vld [vmem:[%s10713_s5 + $0x160] sm:$0xff] }
  0xcf   : > { %4276 = vrot.lane.b32.xlu1 %v7348_v46, %s10754_s15 }
  0xd0   : > { %v1471_v7 = vpop.permute.xlu0 %1470  ;;  %6162 = vmatmul.mubr.msk.f32.gmra.mxu1 %vm667_vm0, %v6146_v5  ;;  %6193 = vmatmul.mubr.msk.f32.gmra.mxu0 %vm667_vm0, %v6177_v6  ;;  %v1742_v8 = vpop.permute.xlu1 %1741 }
  0xd1   : > { %v1477_v9 = vsel %vm1476_vm3, %v1471_v7, %v1473_v2  ;;  %1073 = vmatprep.mubr.f32.mxu1 %v10723_v20  ;;  %1336 = vmatprep.mubr.f32.mxu0 %v10723_v20  ;;  %v6158_v7 = vld [vmem:[%s10713_s5 + $0xf0] sm:$0xff] }
  0xd2   : > { %1560 = vmatpush1.msra.mxu1 %v1477_v9  ;;  %4278 = vrot.lane.b32.xlu0 %v7357_v47, %s10754_s15 }
  0xd3   : > { %3970 = vrot.lane.b32.xlu1 %v7386_v51, %s7002_s17 }
  0xd4   : > { %6163 = vmatmul.mubr.msk.f32.gmra.mxu1 %vm667_vm0, %v6147_v10  ;;  %6194 = vmatmul.mubr.msk.f32.gmra.mxu0 %vm667_vm0, %v6178_v11  ;;  %v1744_v12 = vpop.permute.xlu0 %1743  ;;  %v1740_v13 = vpop.permute.xlu1 %1739  ;;  %v6159_v11 = vld [vmem:[%s10713_s5 + $0xf8] sm:$0xff] }
  0xd5   : > { %1079 = vmatprep.mubr.f32.mxu1 %v10723_v20  ;;  %1342 = vmatprep.mubr.f32.mxu0 %v10723_v20  ;;  %v1746_v16 = vsel %vm1745_vm4, %v1740_v13, %v1742_v8  ;;  %v1747_v17 = vsel %vm1745_vm4, %v1742_v8, %v1744_v12  ;;  %v6189_v8 = vld [vmem:[%s10713_s5 + $0x168] sm:$0xff]  ;;  %v6190_v12 = vld [vmem:[%s10713_s5 + $0x170] sm:$0xff] }
  0xd6   : > { %4274 = vrot.lane.b32.xlu0 %v7365_v48, %s10754_s15  ;;  %1828 = vmatprep.subr.mxu0 %v1747_v17 }
  0xd7   : > { %4270 = vrot.lane.b32.xlu1 %v7372_v49, %s10754_s15  ;;  %1829 = vmatpush1.msra.mxu0 %v1746_v16  ;;  %v6208_v16 = vld [vmem:[%s10713_s5 + $0x180] sm:$0xff] }
  0xd8   : > { %6164 = vmatmul.mubr.msk.f32.gmra.mxu1 %vm667_vm0, %v6148_v14  ;;  %6195 = vmatmul.mubr.msk.f32.gmra.mxu0 %vm667_vm0, %v6179_v15  ;;  %v7495_v18 = vpop.permute.xlu0 %2010  ;;  %v2013_v19 = vpop.permute.xlu1 %2012  ;;  %v6191_v15 = vld [vmem:[%s10713_s5 + $0x178] sm:$0xff] }
  0xd9   : > { %1085 = vmatprep.mubr.f32.mxu1 %v10723_v20  ;;  %1348 = vmatprep.mubr.f32.mxu0 %v10723_v20  ;;  %v2016_v23 = vsel %vm2014_vm5, %v7495_v18, %v2013_v19 }
  0xda   : > { %4272 = vrot.lane.b32.xlu0 %v7379_v50, %s10754_s15  ;;  %2097 = vmatprep.subr.mxu1 %v2016_v23  ;;  %v6240_v23 = vld [vmem:[%s10713_s5 + $0x200] sm:$0xff] }
  0xdb   : > { %4268 = vrot.lane.b32.xlu1 %v7386_v51, %s10754_s15  ;;  %s10755_s15 = smov 108  }
  0xdc   : > { %6165 = vmatmul.mubr.msk.f32.gmra.mxu1 %vm667_vm0, %v6149_v21  ;;  %6196 = vmatmul.mubr.msk.f32.gmra.mxu0 %vm667_vm0, %v6180_v22  ;;  %v7513_v24 = vpop.permute.xlu0 %2008  ;;  %v7515_v25 = vpop.permute.xlu1 %2279 }
  0xdd   : > { %1091 = vmatprep.mubr.f32.mxu1 %v10723_v20  ;;  %1354 = vmatprep.mubr.f32.mxu0 %v10723_v20  ;;  %v2015_v17 = vsel %vm2014_vm5, %v7513_v24, %v7495_v18  ;;  %v6209_v18 = vld [vmem:[%s10713_s5 + $0x188] sm:$0xff] }
  0xde   : > { %4586 = vrot.lane.b32.xlu0 %v7297_v37, %s10755_s15 }
  0xdf   : > { %4588 = vrot.lane.b32.xlu1 %v7290_v36, %s10755_s15 }
  0xe0   : > { %6166 = vmatmul.mubr.msk.f32.gmra.mxu1 %vm667_vm0, %v6150_v26  ;;  %6197 = vmatmul.mubr.msk.f32.gmra.mxu0 %vm667_vm0, %v6181_v27  ;;  %v2282_v28 = vpop.permute.xlu0 %2281  ;;  %v7531_v29 = vpop.permute.xlu1 %2277 }
  0xe1   : > { %1097 = vmatprep.mubr.f32.mxu1 %v10723_v20  ;;  %1360 = vmatprep.mubr.f32.mxu0 %v10723_v20  ;;  %v2285_v32 = vsel %vm2283_vm6, %v7515_v25, %v2282_v28  ;;  %v2284_v24 = vsel %vm2283_vm6, %v7531_v29, %v7515_v25  ;;  %v6210_v25 = vld [vmem:[%s10713_s5 + $0x190] sm:$0xff]  ;;  %v6241_v29 = vld [vmem:[%s10713_s5 + $0x208] sm:$0xff] }
  0xe2   : > { %4584 = vrot.lane.b32.xlu0 %v7309_v39, %s10755_s15  ;;  %2366 = vmatprep.subr.mxu0 %v2285_v32  ;;  %v6211_v32 = vld [vmem:[%s10713_s5 + $0x198] sm:$0xff] }
  0xe3   : > { %4580 = vrot.lane.b32.xlu1 %v7312_v40, %s10755_s15 }
  0xe4   : > { %6167 = vmatmul.mubr.msk.f32.gmra.mxu1 %vm667_vm0, %v6151_v30  ;;  %6198 = vmatmul.mubr.msk.f32.gmra.mxu0 %vm667_vm0, %v6182_v31  ;;  %v7549_v33 = vpop.permute.xlu0 %2548  ;;  %v7551_v34 = vpop.permute.xlu1 %2550 }
  0xe5   : > { %1103 = vmatprep.mubr.f32.mxu1 %v10723_v20  ;;  %1366 = vmatprep.mubr.f32.mxu0 %v10723_v20  ;;  %v2554_v22 = vsel %vm2552_vm7, %v7549_v33, %v7551_v34  ;;  %v6242_v34 = vld [vmem:[%s10713_s5 + $0x210] sm:$0xff] }
  0xe6   : > { %4582 = vrot.lane.b32.xlu0 %v7324_v42, %s10755_s15 }
  0xe7   : > { %4884 = vrot.lane.b32.xlu1 %v7297_v37, %s10756_s2 }
  0xe8   : > { %6168 = vmatmul.mubr.msk.f32.gmra.mxu1 %vm667_vm0, %v6152_v35  ;;  %6199 = vmatmul.mubr.msk.f32.gmra.mxu0 %vm667_vm0, %v6183_v38  ;;  %v7567_v41 = vpop.permute.xlu0 %2546  ;;  %v7569_v43 = vpop.permute.xlu1 %2817 }
  0xe9   : > { %1109 = vmatprep.mubr.f32.mxu1 %v10723_v20  ;;  %1372 = vmatprep.mubr.f32.mxu0 %v10723_v20 }
  0xea   : > { %4886 = vrot.lane.b32.xlu0 %v7290_v36, %s10756_s2 }
  0xeb   : > { %4578 = vrot.lane.b32.xlu1 %v7336_v44, %s10755_s15 }
  0xec   : > { %6169 = vmatmul.mubr.msk.f32.gmra.mxu1 %vm667_vm0, %v6153_v45  ;;  %6200 = vmatmul.mubr.msk.f32.gmra.mxu0 %vm667_vm0, %v6184_v52  ;;  %v7585_v53 = vpop.permute.xlu0 %2819  ;;  %v7587_v54 = vpop.permute.xlu1 %2815 }
  0xed   : > { %1115 = vmatprep.mubr.f32.mxu1 %v10723_v20  ;;  %1378 = vmatprep.mubr.f32.mxu0 %v10723_v20  ;;  %v2823_v28 = vsel %vm2821_vm8, %v7569_v43, %v7585_v53  ;;  %v6212_v53 = vld [vmem:[%s10713_s5 + $0x1a0] sm:$0xff] }
  0xee   : > { %4882 = vrot.lane.b32.xlu0 %v7309_v39, %s10756_s2 }
  0xef   : > { %4574 = vrot.lane.b32.xlu1 %v7348_v46, %s10755_s15 }
  0xf0   : > { %6170 = vmatmul.mubr.msk.f32.gmra.mxu1 %vm667_vm0, %v6154_v55  ;;  %6201 = vmatmul.mubr.msk.f32.gmra.mxu0 %vm667_vm0, %v6185_v56  ;;  %v7603_v57 = vpop.permute.xlu1 %3396  ;;  %v7605_v58 = vpop.permute.xlu0 %3394  ;;  %v6243_v55 = vld [vmem:[%s10713_s5 + $0x218] sm:$0xff] }
  0xf1   : > { %1121 = vmatprep.mubr.f32.mxu1 %v10723_v20  ;;  %1384 = vmatprep.mubr.f32.mxu0 %v10723_v20 }
  0xf2   : > { %4576 = vrot.lane.b32.xlu0 %v7357_v47, %s10755_s15 }
  0xf3   : > { %4878 = vrot.lane.b32.xlu1 %v7312_v40, %s10756_s2 }
  0xf4   : > { %6171 = vmatmul.mubr.msk.f32.gmra.mxu1 %vm667_vm0, %v6155_v59  ;;  %6202 = vmatmul.mubr.msk.f32.gmra.mxu0 %vm667_vm0, %v6186_v60  ;;  %v7621_v61 = vpop.permute.xlu0 %3392  ;;  %v7623_v62 = vpop.permute.xlu1 %3388 }
  0xf5   : > { %1127 = vmatprep.mubr.f32.mxu1 %v10723_v20  ;;  %1390 = vmatprep.mubr.f32.mxu0 %v10723_v20 }
  0xf6   : > { %4880 = vrot.lane.b32.xlu0 %v7324_v42, %s10756_s2 }
  0xf7   : > { %4572 = vrot.lane.b32.xlu1 %v7365_v48, %s10755_s15 }
  0xf8   : > { %6172 = vmatmul.mubr.msk.f32.gmra.mxu1 %vm667_vm0, %v6156_v63  ;;  %6203 = vmatmul.mubr.msk.f32.gmra.mxu0 %vm667_vm0, %v6187_v0  ;;  %v7639_v1 = vpop.permute.xlu0 %3390  ;;  %v7641_v2 = vpop.permute.xlu1 %3692  ;;  %v6213_v0 = vld [vmem:[%s10713_s5 + $0x1a8] sm:$0xff] }
  0xf9   : > { %1133 = vmatprep.mubr.f32.mxu1 %v10723_v20  ;;  %1396 = vmatprep.mubr.f32.mxu0 %v10723_v20 }
  0xfa   : > { %4876 = vrot.lane.b32.xlu0 %v7336_v44, %s10756_s2 }
  0xfb   : > { %4568 = vrot.lane.b32.xlu1 %v7372_v49, %s10755_s15 }
  0xfc   : > { %6173 = vmatmul.mubr.msk.f32.gmra.mxu1 %vm667_vm0, %v6157_v3  ;;  %6204 = vmatmul.mubr.msk.f32.gmra.mxu0 %vm667_vm0, %v6188_v4  ;;  %v7657_v5 = vpop.permute.xlu0 %3694  ;;  %v7659_v6 = vpop.permute.xlu1 %3386  ;;  %v6244_v3 = vld [vmem:[%s10713_s5 + $0x220] sm:$0xff] }
  0xfd   : > { %1139 = vmatprep.mubr.f32.mxu1 %v10723_v20  ;;  %1402 = vmatprep.mubr.f32.mxu0 %v10723_v20 }
  0xfe   : > { %4570 = vrot.lane.b32.xlu0 %v7379_v50, %s10755_s15 }
  0xff   : > { %4872 = vrot.lane.b32.xlu1 %v7348_v46, %s10756_s2 }
 0x100   : > { %6174 = vmatmul.mubr.msk.f32.gmra.mxu1 %vm667_vm0, %v6158_v7  ;;  %6205 = vmatmul.mubr.msk.f32.gmra.mxu0 %vm667_vm0, %v6189_v8  ;;  %v7675_v9 = vpop.permute.xlu0 %3690  ;;  %v7677_v10 = vpop.permute.xlu1 %3382 }
 0x101   : > { %1145 = vmatprep.mubr.f32.mxu1 %v10723_v20  ;;  %1408 = vmatprep.mubr.f32.mxu0 %v10723_v20 }
 0x102   : > { %4874 = vrot.lane.b32.xlu0 %v7357_v47, %s10756_s2 }
 0x103   : > { %4566 = vrot.lane.b32.xlu1 %v7386_v51, %s10755_s15  ;;  %s10617_s15 = scalar_lea.vmem [#allocation6], %s6120_s21  ;;  %s10626_s21 = scalar_lea.vmem [#allocation7], %s6123_s22 }
 0x104   : > { %6175 = vmatmul.mubr.msk.f32.gmra.mxu1 %vm667_vm0, %v6159_v11  ;;  %6206 = vmatmul.mubr.msk.f32.gmra.mxu0 %vm667_vm0, %v6190_v12  ;;  %v7693_v13 = vpop.permute.xlu0 %3384  ;;  %v7695_v14 = vpop.permute.xlu1 %3686  ;;  %v6245_v11 = vld [vmem:[%s10713_s5 + $0x228] sm:$0xff]  ;;  %s5971_s17 = sshll.u32 %s10626_s21, 4  ;;  %s10658_s17 = int_to_ptr.vmem [resolvable:$true] %s5971_s17 }
 0x105   : > { %1414 = vmatprep.mubr.f32.mxu0 %v10723_v20  ;;  %1593 = vmatprep.mubr.f32.mxu1 %v10723_v20 }
 0x106   : > { %4870 = vrot.lane.b32.xlu0 %v7365_v48, %s10756_s2 }
 0x107   : > { %4866 = vrot.lane.b32.xlu1 %v7372_v49, %s10756_s2 }
 0x108   : > { %6207 = vmatmul.mubr.msk.f32.gmra.mxu0 %vm667_vm0, %v6191_v15  ;;  %6224 = vmatmul.mubr.msk.f32.vlgmr.msra.gmra.mxu1 %vm667_vm0, %v6208_v16  ;;  %v7714_v19 = vpop.permute.xlu0 %3688  ;;  %v7716_v21 = vpop.permute.xlu1 %3380 }
 0x109   : > { %1599 = vmatprep.mubr.f32.mxu1 %v10723_v20  ;;  %1862 = vmatprep.mubr.f32.mxu0 %v10723_v20 }
 0x10a   : > { %4868 = vrot.lane.b32.xlu0 %v7379_v50, %s10756_s2  ;;  %2098 = vmatpush1.msra.mxu1 %v2015_v17  ;;  %v6246_v17 = vld [vmem:[%s10713_s5 + $0x230] sm:$0xff] }
 0x10b   : > { %4864 = vrot.lane.b32.xlu1 %v7386_v51, %s10756_s2  ;;  %2635 = vmatprep.subr.mxu1 %v2554_v22  ;;  %s10656_s2 = scalar_lea.hbm %s10716_s8, %s6713_s12 }
 0x10c   : > { %6225 = vmatmul.mubr.msk.f32.gmra.mxu1 %vm667_vm0, %v6209_v18  ;;  %6256 = vmatmul.mubr.msk.f32.vlgmr.msra.gmra.mxu0 %vm667_vm0, %v6240_v23  ;;  %v7738_v26 = vpop.permute.xlu0 %3684  ;;  %v7740_v27 = vpop.permute.xlu1 %3376 }
 0x10d   : > { %1605 = vmatprep.mubr.f32.mxu1 %v10723_v20  ;;  %1868 = vmatprep.mubr.f32.mxu0 %v10723_v20 }
 0x10e   : > { %5182 = vrot.lane.b32.xlu0 %v7297_v37, %s7006_s23  ;;  %2367 = vmatpush1.msra.mxu0 %v2284_v24  ;;  %v6216_v24 = vld [vmem:[%s10713_s5 + $0x1c0] sm:$0xff] }
 0x10f   : > { %5184 = vrot.lane.b32.xlu1 %v7290_v36, %s7006_s23  ;;  %2904 = vmatprep.subr.mxu0 %v2823_v28 }
 0x110   : > { %6226 = vmatmul.mubr.msk.f32.gmra.mxu1 %vm667_vm0, %v6210_v25  ;;  %6257 = vmatmul.mubr.msk.f32.gmra.mxu0 %vm667_vm0, %v6241_v29  ;;  %v7759_v30 = vpop.permute.xlu0 %3378  ;;  %v7761_v31 = vpop.permute.xlu1 %3680 }
 0x111   : > { %1611 = vmatprep.mubr.f32.mxu1 %v10723_v20  ;;  %1874 = vmatprep.mubr.f32.mxu0 %v10723_v20  ;;  %v7771_v35 = vpop.f32.mrf.mxu0 }
 0x112   : > { %5180 = vrot.lane.b32.xlu0 %v7309_v39, %s7006_s23 }
 0x113   : > { %5176 = vrot.lane.b32.xlu1 %v7312_v40, %s7006_s23  ;;  %v7777_v38 = vpop.f32.mrf.mxu0 }
 0x114   : > { %6227 = vmatmul.mubr.msk.f32.gmra.mxu1 %vm667_vm0, %v6211_v32  ;;  %6258 = vmatmul.mubr.msk.f32.gmra.mxu0 %vm667_vm0, %v6242_v34  ;;  %v7781_v45 = vpop.permute.xlu0 %3682  ;;  %v7783_v52 = vpop.permute.xlu1 %3374  ;;  %v6248_v32 = vld [vmem:[%s10713_s5 + $0x240] sm:$0xff] }
 0x115   : > { %1617 = vmatprep.mubr.f32.mxu1 %v10723_v20  ;;  %1880 = vmatprep.mubr.f32.mxu0 %v10723_v20  ;;  %v7793_v56 = vpop.f32.mrf.mxu0 }
 0x116   : > { %5178 = vrot.lane.b32.xlu0 %v7324_v42, %s7006_s23 }
 0x117   : > { %5480 = vrot.lane.b32.xlu1 %v7297_v37, %s7007_s3  ;;  %v7799_v59 = vpop.f32.mrf.mxu0 }
 0x118   : > { %6228 = vmatmul.mubr.msk.f32.gmra.mxu1 %vm667_vm0, %v6212_v53  ;;  %6259 = vmatmul.mubr.msk.f32.gmra.mxu0 %vm667_vm0, %v6243_v55  ;;  %v7803_v60 = vpop.permute.xlu0 %3678  ;;  %v7805_v63 = vpop.permute.xlu1 %3674 }
 0x119   : > { %1623 = vmatprep.mubr.f32.mxu1 %v10723_v20  ;;  %1886 = vmatprep.mubr.f32.mxu0 %v10723_v20  ;;  %v7819_v4 = vpop.f32.mrf.mxu0 }
 0x11a   : > { %5482 = vrot.lane.b32.xlu0 %v7290_v36, %s7007_s3  ;;  %v6214_v36 = vld [vmem:[%s10713_s5 + $0x1b0] sm:$0xff] }
 0x11b   : > { %5174 = vrot.lane.b32.xlu1 %v7336_v44, %s7006_s23  ;;  %v7839_v12 = vpop.f32.mrf.mxu0 }
 0x11c   : > { %6229 = vmatmul.mubr.msk.f32.gmra.mxu1 %vm667_vm0, %v6213_v0  ;;  %6260 = vmatmul.mubr.msk.f32.gmra.mxu0 %vm667_vm0, %v6244_v3  ;;  %v7823_v7 = vpop.permute.xlu0 %3676  ;;  %v7825_v8 = vpop.permute.xlu1 %3672  ;;  %v6249_v0 = vld [vmem:[%s10713_s5 + $0x248] sm:$0xff] }
 0x11d   : > { %1629 = vmatprep.mubr.f32.mxu1 %v10723_v20  ;;  %1892 = vmatprep.mubr.f32.mxu0 %v10723_v20  ;;  %v7859_v22 = vpop.f32.mrf.mxu0 }
 0x11e   : > { %5478 = vrot.lane.b32.xlu0 %v7309_v39, %s7007_s3  ;;  %v6215_v39 = vld [vmem:[%s10713_s5 + $0x1b8] sm:$0xff] }
 0x11f   : > { %5170 = vrot.lane.b32.xlu1 %v7348_v46, %s7006_s23  ;;  %v7879_v28 = vpop.f32.mrf.mxu0 }
 0x120   : > { %6230 = vmatmul.mubr.msk.f32.gmra.mxu1 %vm667_vm0, %v6214_v36  ;;  %6261 = vmatmul.mubr.msk.f32.gmra.mxu0 %vm667_vm0, %v6245_v11  ;;  %v7843_v15 = vpop.permute.xlu0 %3990  ;;  %v7845_v16 = vpop.permute.xlu1 %3992 }
 0x121   : > { %1635 = vmatprep.mubr.f32.mxu1 %v10723_v20  ;;  %1898 = vmatprep.mubr.f32.mxu0 %v10723_v20  ;;  %v7899_v34 = vpop.f32.mrf.mxu0 }
 0x122   : > { %5172 = vrot.lane.b32.xlu0 %v7357_v47, %s7006_s23 }
 0x123   : > { %5474 = vrot.lane.b32.xlu1 %v7312_v40, %s7007_s3  ;;  %v6247_v40 = vld [vmem:[%s10713_s5 + $0x238] sm:$0xff]  ;;  %v7919_v3 = vpop.f32.mrf.mxu0 }
 0x124   : > { %6231 = vmatmul.mubr.msk.f32.gmra.mxu1 %vm667_vm0, %v6215_v39  ;;  %6262 = vmatmul.mubr.msk.f32.gmra.mxu0 %vm667_vm0, %v6246_v17  ;;  %v7863_v18 = vpop.permute.xlu0 %3988  ;;  %v7865_v23 = vpop.permute.xlu1 %3984  ;;  %v6219_v39 = vld [vmem:[%s10713_s5 + $0x1d8] sm:$0xff] }
 0x125   : > { %1641 = vmatprep.mubr.f32.mxu1 %v10723_v20  ;;  %1904 = vmatprep.mubr.f32.mxu0 %v10723_v20  ;;  %v7939_v17 = vpop.f32.mrf.mxu0 }
 0x126   : > { %5476 = vrot.lane.b32.xlu0 %v7324_v42, %s7007_s3  ;;  %v6217_v42 = vld [vmem:[%s10713_s5 + $0x1c8] sm:$0xff] }
 0x127   : > { %5168 = vrot.lane.b32.xlu1 %v7365_v48, %s7006_s23 }
 0x128   : > { %6232 = vmatmul.mubr.msk.f32.gmra.mxu1 %vm667_vm0, %v6216_v24  ;;  %6263 = vmatmul.mubr.msk.f32.gmra.mxu0 %vm667_vm0, %v6247_v40  ;;  %v7883_v25 = vpop.permute.xlu0 %3986  ;;  %v7885_v29 = vpop.permute.xlu1 %4288 }
 0x129   : > { %10757 = vst [vmem:[#allocation10_spill] sm:$0xff] %v7885_v29  ;;  %1647 = vmatprep.mubr.f32.mxu1 %v10723_v20  ;;  %1910 = vmatprep.mubr.f32.mxu0 %v10723_v20 }
 0x12a   : > { %5472 = vrot.lane.b32.xlu0 %v7336_v44, %s7007_s3  ;;  %v6218_v44 = vld [vmem:[%s10713_s5 + $0x1d0] sm:$0xff] }
 0x12b   : > { %5164 = vrot.lane.b32.xlu1 %v7372_v49, %s7006_s23 }
 0x12c   : > { %6233 = vmatmul.mubr.msk.f32.gmra.mxu1 %vm667_vm0, %v6217_v42  ;;  %6264 = vmatmul.mubr.msk.f32.gmra.mxu0 %vm667_vm0, %v6248_v32  ;;  %v7903_v53 = vpop.permute.xlu0 %4290  ;;  %v7905_v55 = vpop.permute.xlu1 %3982  ;;  %v6251_v42 = vld [vmem:[%s10713_s5 + $0x258] sm:$0xff] }
 0x12d   : > { %10758 = vst [vmem:[#allocation11_spill] sm:$0xff] %v7903_v53  ;;  %1653 = vmatprep.mubr.f32.mxu1 %v10723_v20  ;;  %1916 = vmatprep.mubr.f32.mxu0 %v10723_v20  ;;  %v7959_v32 = vpop.f32.mrf.mxu0 }
 0x12e   : > { %5166 = vrot.lane.b32.xlu0 %v7379_v50, %s7006_s23 }
 0x12f   : > { %5468 = vrot.lane.b32.xlu1 %v7348_v46, %s7007_s3  ;;  %v6250_v46 = vld [vmem:[%s10713_s5 + $0x250] sm:$0xff] }
 0x130   : > { %6234 = vmatmul.mubr.msk.f32.gmra.mxu1 %vm667_vm0, %v6218_v44  ;;  %6265 = vmatmul.mubr.msk.f32.gmra.mxu0 %vm667_vm0, %v6249_v0  ;;  %v7923_v36 = vpop.permute.xlu0 %4286  ;;  %v7925_v11 = vpop.permute.xlu1 %3978  ;;  %v6221_v0 = vld [vmem:[%s10713_s5 + $0x1e8] sm:$0xff] }
 0x131   : > { %10759 = vst [vmem:[#allocation12_spill] sm:$0xff] %v7923_v36  ;;  %1659 = vmatprep.mubr.f32.mxu1 %v10723_v20  ;;  %1922 = vmatprep.mubr.f32.mxu0 %v10723_v20 }
 0x132   : > { %5470 = vrot.lane.b32.xlu0 %v7357_v47, %s7007_s3  ;;  %v6220_v47 = vld [vmem:[%s10713_s5 + $0x1e0] sm:$0xff] }
 0x133   : > { %5162 = vrot.lane.b32.xlu1 %v7386_v51, %s7006_s23 }
 0x134   : > { %6235 = vmatmul.mubr.msk.f32.gmra.mxu1 %vm667_vm0, %v6219_v39  ;;  %6266 = vmatmul.mubr.msk.f32.gmra.mxu0 %vm667_vm0, %v6250_v46  ;;  %v7943_v24 = vpop.permute.xlu0 %3980  ;;  %v7945_v40 = vpop.permute.xlu1 %4282  ;;  %v553_v39 = vld [vmem:[%s10715_s7] sm:$0xff] }
 0x135   : > { %10760 = vst [vmem:[#allocation13_spill] sm:$0xff] %v7945_v40  ;;  %1665 = vmatprep.mubr.f32.mxu1 %v10723_v20  ;;  %1928 = vmatprep.mubr.f32.mxu0 %v10723_v20  ;;  %v7982_v46 = vpop.f32.mrf.mxu0 }
 0x136   : > { %5466 = vrot.lane.b32.xlu0 %v7365_v48, %s7007_s3  ;;  %v6252_v48 = vld [vmem:[%s10713_s5 + $0x260] sm:$0xff]  ;;  %10762 = vst [vmem:[#allocation15_spill] sm:$0xff] %v7982_v46 }
 0x137   : > { %5462 = vrot.lane.b32.xlu1 %v7372_v49, %s7007_s3 }
 0x138   : > { %6236 = vmatmul.mubr.msk.f32.gmra.mxu1 %vm667_vm0, %v6220_v47  ;;  %6267 = vmatmul.mubr.msk.f32.gmra.mxu0 %vm667_vm0, %v6251_v42  ;;  %v7963_v44 = vpop.permute.xlu0 %4284  ;;  %v554_v47 = vld [vmem:[%s10715_s7 + $0x8] sm:$0xff] }
 0x139   : > { %10761 = vst [vmem:[#allocation14_spill] sm:$0xff] %v7963_v44  ;;  %1671 = vmatprep.mubr.f32.mxu1 %v10723_v20  ;;  %1934 = vmatprep.mubr.f32.mxu0 %v10723_v20  ;;  %v7973_v49 = vpop.permute.xlu1 %3976  ;;  %v10767_v44 = vmov 0.0  }
 0x13a   : > { %5464 = vrot.lane.b32.xlu0 %v7379_v50, %s7007_s3  ;;  %v6222_v50 = vld [vmem:[%s10713_s5 + $0x1f0] sm:$0xff] }
 0x13b   : > { %5460 = vrot.lane.b32.xlu1 %v7386_v51, %s7007_s3  ;;  %v6253_v51 = vld [vmem:[%s10713_s5 + $0x268] sm:$0xff]  ;;  %s7009_s3 = smov [#allocation7]  }
 0x13c   : > { %6237 = vmatmul.mubr.msk.f32.gmra.mxu1 %vm667_vm0, %v6221_v0  ;;  %6268 = vmatmul.mubr.msk.f32.gmra.mxu0 %vm667_vm0, %v6252_v48  ;;  %v7989_v42 = vpop.permute.xlu0 %4280  ;;  %v556_v48 = vld [vmem:[%s10715_s7 + $0x18] sm:$0xff]  ;;  %s6925_s23 = sshll.u32 %s7009_s3, 4  ;;  %s6926_s23 = int_to_ptr.vmem [resolvable:$false] %s6925_s23 }
 0x13d   : > { %10763 = vst [vmem:[#allocation16_spill] sm:$0xff] %v7989_v42  ;;  %1677 = vmatprep.mubr.f32.mxu1 %v10723_v20  ;;  %1940 = vmatprep.mubr.f32.mxu0 %v10723_v20  ;;  %v7999_v0 = vpop.permute.xlu1 %3972  ;;  %v8004_v42 = vpop.f32.mrf.mxu0  ;;  %v555_v20 = vld [vmem:[%s10715_s7 + $0x10] sm:$0xff]  ;;  %s6927_s28 = scalar_lea.vmem %s6926_s23, 4096  ;;  %p6928_p7 = scmp.lt.s32.totalorder %s10658_s17, %s6926_s23 }
 0x13e   : > { %10764 = vst [vmem:[#allocation17_spill] sm:$0xff] %v7999_v0  ;;  %571 = vperm.xlu0 %6784, %v553_v39   ;;  %10765 = vst [vmem:[#allocation18_spill] sm:$0xff] %v8004_v42  ;;  %v6223_v39 = vld [vmem:[%s10713_s5 + $0x1f8] sm:$0xff]  ;;  %v557_v0 = vld [vmem:[%s10715_s7 + $0x20] sm:$0xff] }
 0x13f   : > { %576 = vperm.xlu1 %6785, %v554_v47   ;;  %v6254_v47 = vld [vmem:[%s10713_s5 + $0x270] sm:$0xff]  ;;  %v8026_v36 = vpop.f32.mrf.mxu0 }
 0x140   : > { %6238 = vmatmul.mubr.msk.f32.gmra.mxu1 %vm667_vm0, %v6222_v50  ;;  %6269 = vmatmul.mubr.msk.f32.gmra.mxu0 %vm667_vm0, %v6253_v51  ;;  %v8011_v40 = vpop.permute.xlu0 %3974  ;;  %v558_v51 = vld [vmem:[%s10715_s7 + $0x28] sm:$0xff] }
 0x141   : > { %10766 = vst [vmem:[#allocation19_spill] sm:$0xff] %v8011_v40  ;;  %1683 = vmatprep.mubr.f32.mxu1 %v10767_v44  ;;  %1946 = vmatprep.mubr.f32.mxu0 %v10767_v44  ;;  %v8021_v50 = vpop.permute.xlu1 %4276 }
 0x142   : > { %10768 = vst [vmem:[#allocation20_spill] sm:$0xff] %v8021_v50  ;;  %586 = vperm.xlu0 %6784, %v556_v48   ;;  %v6272_v48 = vld [vmem:[%s10713_s5 + $0x280] sm:$0xff]  ;;  %v560_v50 = vld [vmem:[%s10715_s7 + $0x38] sm:$0xff] }
 0x143   : > { %581 = vperm.xlu1 %6785, %v555_v20   ;;  %v6255_v20 = vld [vmem:[%s10713_s5 + $0x278] sm:$0xff] }
 0x144   : > { %6239 = vmatmul.mubr.msk.f32.gmra.mxu1 %vm667_vm0, %v6223_v39  ;;  %6270 = vmatmul.mubr.msk.f32.gmra.mxu0 %vm667_vm0, %v6254_v47  ;;  %v8033_v40 = vpop.permute.xlu0 %4278  ;;  %v2553_v47 = vsel %vm2552_vm7, %v7567_v41, %v7549_v33  ;;  %v6273_v33 = vld [vmem:[%s10713_s5 + $0x288] sm:$0xff]  ;;  %v6304_v41 = vld [vmem:[%s10713_s5 + $0x300] sm:$0xff] }
 0x145   : > { %10769 = vst [vmem:[#allocation21_spill] sm:$0xff] %v8033_v40  ;;  %1952 = vmatprep.mubr.f32.mxu0 %v10767_v44  ;;  %2131 = vmatprep.mubr.f32.mxu1 %v10767_v44  ;;  %v8043_v39 = vpop.permute.xlu1 %3970  ;;  %v8051_v40 = vpop.f32.mrf.mxu0 }
 0x146   : > { %10770 = vst [vmem:[#allocation22_spill] sm:$0xff] %v8043_v39  ;;  %596 = vperm.xlu0 %6784, %v558_v51   ;;  %v559_v39 = vld [vmem:[%s10715_s7 + $0x30] sm:$0xff] }
 0x147   : > { %591 = vperm.xlu1 %6785, %v557_v0  }
 0x148   : > { %6271 = vmatmul.mubr.msk.f32.gmra.mxu0 %vm667_vm0, %v6255_v20  ;;  %6288 = vmatmul.mubr.msk.f32.vlgmr.msra.gmra.mxu1 %vm667_vm0, %v6272_v48  ;;  %v8058_v51 = vpop.permute.xlu0 %4274  ;;  %v2822_v20 = vsel %vm2821_vm8, %v7587_v54, %v7569_v43  ;;  %v562_v48 = vld [vmem:[%s10715_s7 + $0x48] sm:$0xff]  ;;  %v3405_v43 = vsel %vm938_vm1, %v7605_v58, %v7603_v57  ;;  %v564_v57 = vld [vmem:[%s10715_s7 + $0x58] sm:$0xff] }
 0x149   : > { %10771 = vst [vmem:[#allocation23_spill] sm:$0xff] %v8058_v51  ;;  %2137 = vmatprep.mubr.f32.mxu1 %v10767_v44  ;;  %2400 = vmatprep.mubr.f32.mxu0 %v10767_v44  ;;  %v8068_v0 = vpop.permute.xlu1 %4270  ;;  %v8076_v51 = vpop.f32.mrf.mxu0  ;;  %v6305_v54 = vld [vmem:[%s10713_s5 + $0x308] sm:$0xff] }
 0x14a   : > { %10772 = vst [vmem:[#allocation24_spill] sm:$0xff] %v8068_v0  ;;  %606 = vperm.xlu0 %6784, %v560_v50   ;;  %2636 = vmatpush1.msra.mxu1 %v2553_v47  ;;  %10773 = vst [vmem:[#allocation25_spill] sm:$0xff] %v8076_v51  ;;  %v561_v50 = vld [vmem:[%s10715_s7 + $0x40] sm:$0xff]  ;;  %v3402_v51 = vsel %vm938_vm1, %v7659_v6, %v7623_v62  ;;  %v6370_v6 = vld [vmem:[%s10713_s5 + $0x410] sm:$0xff] }
 0x14b   : > { %601 = vperm.xlu1 %6785, %v559_v39   ;;  %3164 = vmatprep.subr.mxu1 %v7297_v37  ;;  %v6274_v37 = vld [vmem:[%s10713_s5 + $0x290] sm:$0xff] }
 0x14c   : > { %6289 = vmatmul.mubr.msk.f32.gmra.mxu1 %vm667_vm0, %v6273_v33  ;;  %6320 = vmatmul.mubr.msk.f32.vlgmr.msra.gmra.mxu0 %vm667_vm0, %v6304_v41  ;;  %v8084_v47 = vpop.permute.xlu0 %4272  ;;  %v8102_v33 = vpop.f32.mrf.mxu0  ;;  %v563_v41 = vld [vmem:[%s10715_s7 + $0x50] sm:$0xff] }
 0x14d   : > { %10774 = vst [vmem:[#allocation26_spill] sm:$0xff] %v8084_v47  ;;  %2143 = vmatprep.mubr.f32.mxu1 %v10767_v44  ;;  %2406 = vmatprep.mubr.f32.mxu0 %v10767_v44  ;;  %v8097_v39 = vpop.permute.xlu1 %4268  ;;  %10776 = vst [vmem:[#allocation28_spill] sm:$0xff] %v8102_v33 }
 0x14e   : > { %10775 = vst [vmem:[#allocation27_spill] sm:$0xff] %v8097_v39  ;;  %616 = vperm.xlu0 %6784, %v562_v48   ;;  %2905 = vmatpush1.msra.mxu0 %v2822_v20  ;;  %v6275_v20 = vld [vmem:[%s10713_s5 + $0x298] sm:$0xff]  ;;  %v6306_v48 = vld [vmem:[%s10713_s5 + $0x310] sm:$0xff] }
 0x14f   : > { %611 = vperm.xlu1 %6785, %v561_v50   ;;  %3486 = vmatprep.subr.mxu0 %v3405_v43  ;;  %v566_v43 = vld [vmem:[%s10715_s7 + $0x68] sm:$0xff] }
 0x150   : > { %6290 = vmatmul.mubr.msk.f32.gmra.mxu1 %vm667_vm0, %v6274_v37  ;;  %6321 = vmatmul.mubr.msk.f32.gmra.mxu0 %vm667_vm0, %v6305_v54  ;;  %v8109_v0 = vpop.permute.xlu0 %4586  ;;  %v8124_v37 = vpop.f32.mrf.mxu0  ;;  %v565_v54 = vld [vmem:[%s10715_s7 + $0x60] sm:$0xff] }
 0x151   : > { %10777 = vst [vmem:[#allocation29_spill] sm:$0xff] %v8109_v0  ;;  %2149 = vmatprep.mubr.f32.mxu1 %v10767_v44  ;;  %2412 = vmatprep.mubr.f32.mxu0 %v10767_v44  ;;  %v8119_v50 = vpop.permute.xlu1 %4588  ;;  %10779 = vst [vmem:[#allocation31_spill] sm:$0xff] %v8124_v37 }
 0x152   : > { %10778 = vst [vmem:[#allocation30_spill] sm:$0xff] %v8119_v50  ;;  %626 = vperm.xlu0 %6784, %v564_v57   ;;  %v6276_v57 = vld [vmem:[%s10713_s5 + $0x2a0] sm:$0xff]  ;;  %v8146_v47 = vpop.f32.mrf.mxu0 }
 0x153   : > { %621 = vperm.xlu1 %6785, %v563_v41   ;;  %v6307_v41 = vld [vmem:[%s10713_s5 + $0x318] sm:$0xff]  ;;  %10782 = vst [vmem:[#allocation34_spill] sm:$0xff] %v8146_v47 }
 0x154   : > { %6291 = vmatmul.mubr.msk.f32.gmra.mxu1 %vm667_vm0, %v6275_v20  ;;  %6322 = vmatmul.mubr.msk.f32.gmra.mxu0 %vm667_vm0, %v6306_v48  ;;  %v8131_v39 = vpop.permute.xlu0 %4584  ;;  %v568_v48 = vld [vmem:[%s10715_s7 + $0x78] sm:$0xff] }
 0x155   : > { %10780 = vst [vmem:[#allocation32_spill] sm:$0xff] %v8131_v39  ;;  %2155 = vmatprep.mubr.f32.mxu1 %v10767_v44  ;;  %2418 = vmatprep.mubr.f32.mxu0 %v10767_v44  ;;  %v8141_v20 = vpop.permute.xlu1 %4580  ;;  %v567_v39 = vld [vmem:[%s10715_s7 + $0x70] sm:$0xff]  ;;  %v6917_v47 = vld [vmem:[%s7294_s14 + $0x18] sm:$0xff] }
 0x156   : > { %10781 = vst [vmem:[#allocation33_spill] sm:$0xff] %v8141_v20  ;;  %636 = vperm.xlu0 %6784, %v566_v43   ;;  %v6277_v43 = vld [vmem:[%s10713_s5 + $0x2a8] sm:$0xff] }
 0x157   : > { %631 = vperm.xlu1 %6785, %v565_v54   ;;  %v6308_v54 = vld [vmem:[%s10713_s5 + $0x320] sm:$0xff] }
 0x158   : > { %6292 = vmatmul.mubr.msk.f32.gmra.mxu1 %vm667_vm0, %v6276_v57  ;;  %6323 = vmatmul.mubr.msk.f32.gmra.mxu0 %vm667_vm0, %v6307_v41  ;;  %v8153_v0 = vpop.permute.xlu0 %4582  ;;  %v8165_v41 = vpop.f32.mrf.mxu0 }
 0x159   : > { %10783 = vst [vmem:[#allocation35_spill] sm:$0xff] %v8153_v0  ;;  %2161 = vmatprep.mubr.f32.mxu1 %v10767_v44  ;;  %2424 = vmatprep.mubr.f32.mxu0 %v10767_v44  ;;  %v8163_v57 = vpop.permute.xlu1 %4884  ;;  %10785 = vst [vmem:[#allocation37_spill] sm:$0xff] %v8165_v41  ;;  %v6278_v0 = vld [vmem:[%s10713_s5 + $0x2b0] sm:$0xff] }
 0x15a   : > { %10784 = vst [vmem:[#allocation36_spill] sm:$0xff] %v8163_v57  ;;  %646 = vperm.xlu0 %6784, %v568_v48   ;;  %v8181_v57 = vpop.f32.mrf.mxu0 }
 0x15b   : > { %641 = vperm.xlu1 %6785, %v567_v39   ;;  %v6309_v39 = vld [vmem:[%s10713_s5 + $0x328] sm:$0xff]  ;;  %10788 = vst [vmem:[#allocation40_spill] sm:$0xff] %v8181_v57 }
 0x15c   : > { %6293 = vmatmul.mubr.msk.f32.gmra.mxu1 %vm667_vm0, %v6277_v43  ;;  %6324 = vmatmul.mubr.msk.f32.gmra.mxu0 %vm667_vm0, %v6308_v54  ;;  %v8169_v20 = vpop.permute.xlu0 %4886  ;;  %v6279_v54 = vld [vmem:[%s10713_s5 + $0x2b8] sm:$0xff]  ;;  %v8197_v50 = vpop.f32.mrf.mxu0 }
 0x15d   : > { %10786 = vst [vmem:[#allocation38_spill] sm:$0xff] %v8169_v20  ;;  %2167 = vmatprep.mubr.f32.mxu1 %v10767_v44  ;;  %2430 = vmatprep.mubr.f32.mxu0 %v10767_v44  ;;  %v8179_v48 = vpop.permute.xlu1 %4578  ;;  %v6310_v20 = vld [vmem:[%s10713_s5 + $0x330] sm:$0xff]  ;;  %10791 = vst [vmem:[#allocation43_spill] sm:$0xff] %v8197_v50 }
 0x15e   : > { %10787 = vst [vmem:[#allocation39_spill] sm:$0xff] %v8179_v48  ;;  %v8213_v57 = vpop.f32.mrf.mxu0 }
 0x15f   : > { %10794 = vst [vmem:[#allocation46_spill] sm:$0xff] %v8213_v57 }
 0x160   : > { %6294 = vmatmul.mubr.msk.f32.gmra.mxu1 %vm667_vm0, %v6278_v0  ;;  %6325 = vmatmul.mubr.msk.f32.gmra.mxu0 %vm667_vm0, %v6309_v39  ;;  %v8185_v43 = vpop.permute.xlu0 %4882  ;;  %v6280_v39 = vld [vmem:[%s10713_s5 + $0x2c0] sm:$0xff]  ;;  %v8229_v41 = vpop.f32.mrf.mxu0 }
 0x161   : > { %10789 = vst [vmem:[#allocation41_spill] sm:$0xff] %v8185_v43  ;;  %2173 = vmatprep.mubr.f32.mxu1 %v10767_v44  ;;  %2436 = vmatprep.mubr.f32.mxu0 %v10767_v44  ;;  %v8195_v48 = vpop.permute.xlu1 %4574  ;;  %v6311_v43 = vld [vmem:[%s10713_s5 + $0x338] sm:$0xff]  ;;  %10797 = vst [vmem:[#allocation49_spill] sm:$0xff] %v8229_v41 }
 0x162   : > { %10790 = vst [vmem:[#allocation42_spill] sm:$0xff] %v8195_v48  ;;  %v8245_v41 = vpop.f32.mrf.mxu0 }
 0x163   : > { %10800 = vst [vmem:[#allocation52_spill] sm:$0xff] %v8245_v41 }
 0x164   : > { %6295 = vmatmul.mubr.msk.f32.gmra.mxu1 %vm667_vm0, %v6279_v54  ;;  %6326 = vmatmul.mubr.msk.f32.gmra.mxu0 %vm667_vm0, %v6310_v20  ;;  %v8201_v0 = vpop.permute.xlu0 %4576  ;;  %v6281_v54 = vld [vmem:[%s10713_s5 + $0x2c8] sm:$0xff]  ;;  %v8261_v41 = vpop.f32.mrf.mxu0 }
 0x165   : > { %10792 = vst [vmem:[#allocation44_spill] sm:$0xff] %v8201_v0  ;;  %2179 = vmatprep.mubr.f32.mxu1 %v10767_v44  ;;  %2442 = vmatprep.mubr.f32.mxu0 %v10767_v44  ;;  %v8211_v48 = vpop.permute.xlu1 %4878  ;;  %10803 = vst [vmem:[#allocation55_spill] sm:$0xff] %v8261_v41 }
 0x166   : > { %10793 = vst [vmem:[#allocation45_spill] sm:$0xff] %v8211_v48  ;;  %v6312_v48 = vld [vmem:[%s10713_s5 + $0x340] sm:$0xff]  ;;  %v8277_v41 = vpop.f32.mrf.mxu0 }
 0x167   : > { %10806 = vst [vmem:[#allocation58_spill] sm:$0xff] %v8277_v41 }
 0x168   : > { %6296 = vmatmul.mubr.msk.f32.gmra.mxu1 %vm667_vm0, %v6280_v39  ;;  %6327 = vmatmul.mubr.msk.f32.gmra.mxu0 %vm667_vm0, %v6311_v43  ;;  %v8217_v20 = vpop.permute.xlu0 %4880  ;;  %v6282_v39 = vld [vmem:[%s10713_s5 + $0x2d0] sm:$0xff]  ;;  %v8293_v41 = vpop.f32.mrf.mxu0 }
 0x169   : > { %10795 = vst [vmem:[#allocation47_spill] sm:$0xff] %v8217_v20  ;;  %2185 = vmatprep.mubr.f32.mxu1 %v10767_v44  ;;  %2448 = vmatprep.mubr.f32.mxu0 %v10767_v44  ;;  %v8227_v0 = vpop.permute.xlu1 %4572  ;;  %v6313_v20 = vld [vmem:[%s10713_s5 + $0x348] sm:$0xff]  ;;  %10809 = vst [vmem:[#allocation61_spill] sm:$0xff] %v8293_v41 }
 0x16a   : > { %10796 = vst [vmem:[#allocation48_spill] sm:$0xff] %v8227_v0  ;;  %v8309_v41 = vpop.f32.mrf.mxu0 }
 0x16b   : > { %10812 = vst [vmem:[#allocation64_spill] sm:$0xff] %v8309_v41 }
 0x16c   : > { %6297 = vmatmul.mubr.msk.f32.gmra.mxu1 %vm667_vm0, %v6281_v54  ;;  %6328 = vmatmul.mubr.msk.f32.gmra.mxu0 %vm667_vm0, %v6312_v48  ;;  %v8233_v43 = vpop.permute.xlu0 %4876  ;;  %v6283_v54 = vld [vmem:[%s10713_s5 + $0x2d8] sm:$0xff]  ;;  %v8325_v41 = vpop.f32.mrf.mxu0 }
 0x16d   : > { %10798 = vst [vmem:[#allocation50_spill] sm:$0xff] %v8233_v43  ;;  %2191 = vmatprep.mubr.f32.mxu1 %v10767_v44  ;;  %2454 = vmatprep.mubr.f32.mxu0 %v10767_v44  ;;  %v8243_v0 = vpop.permute.xlu1 %4568  ;;  %v6314_v43 = vld [vmem:[%s10713_s5 + $0x350] sm:$0xff]  ;;  %10815 = vst [vmem:[#allocation67_spill] sm:$0xff] %v8325_v41  ;;  %v6337_v41 = vld [vmem:[%s10713_s5 + $0x388] sm:$0xff] }
 0x16e   : > { %10799 = vst [vmem:[#allocation51_spill] sm:$0xff] %v8243_v0 }
 0x170   : > { %6298 = vmatmul.mubr.msk.f32.gmra.mxu1 %vm667_vm0, %v6282_v39  ;;  %6329 = vmatmul.mubr.msk.f32.gmra.mxu0 %vm667_vm0, %v6313_v20  ;;  %v8249_v48 = vpop.permute.xlu0 %4570  ;;  %v6284_v39 = vld [vmem:[%s10713_s5 + $0x2e0] sm:$0xff] }
 0x171   : > { %10801 = vst [vmem:[#allocation53_spill] sm:$0xff] %v8249_v48  ;;  %2197 = vmatprep.mubr.f32.mxu1 %v10767_v44  ;;  %2460 = vmatprep.mubr.f32.mxu0 %v10767_v44  ;;  %v8259_v0 = vpop.permute.xlu1 %4872 }
 0x172   : > { %10802 = vst [vmem:[#allocation54_spill] sm:$0xff] %v8259_v0  ;;  %v6315_v0 = vld [vmem:[%s10713_s5 + $0x358] sm:$0xff] }
 0x174   : > { %6299 = vmatmul.mubr.msk.f32.gmra.mxu1 %vm667_vm0, %v6283_v54  ;;  %6330 = vmatmul.mubr.msk.f32.gmra.mxu0 %vm667_vm0, %v6314_v43  ;;  %v8265_v20 = vpop.permute.xlu0 %4874  ;;  %v6285_v54 = vld [vmem:[%s10713_s5 + $0x2e8] sm:$0xff] }
 0x175   : > { %10804 = vst [vmem:[#allocation56_spill] sm:$0xff] %v8265_v20  ;;  %2203 = vmatprep.mubr.f32.mxu1 %v10767_v44  ;;  %2466 = vmatprep.mubr.f32.mxu0 %v10767_v44  ;;  %v8275_v48 = vpop.permute.xlu1 %4566  ;;  %v6316_v20 = vld [vmem:[%s10713_s5 + $0x360] sm:$0xff] }
 0x176   : > { %10805 = vst [vmem:[#allocation57_spill] sm:$0xff] %v8275_v48 }
 0x178   : > { %6300 = vmatmul.mubr.msk.f32.gmra.mxu1 %vm667_vm0, %v6284_v39  ;;  %6331 = vmatmul.mubr.msk.f32.gmra.mxu0 %vm667_vm0, %v6315_v0  ;;  %v8281_v43 = vpop.permute.xlu0 %4870  ;;  %v6286_v39 = vld [vmem:[%s10713_s5 + $0x2f0] sm:$0xff] }
 0x179   : > { %10807 = vst [vmem:[#allocation59_spill] sm:$0xff] %v8281_v43  ;;  %2209 = vmatprep.mubr.f32.mxu1 %v10767_v44  ;;  %2472 = vmatprep.mubr.f32.mxu0 %v10767_v44  ;;  %v8291_v48 = vpop.permute.xlu1 %4866 }
 0x17a   : > { %10808 = vst [vmem:[#allocation60_spill] sm:$0xff] %v8291_v48  ;;  %v6317_v48 = vld [vmem:[%s10713_s5 + $0x368] sm:$0xff] }
 0x17c   : > { %6301 = vmatmul.mubr.msk.f32.gmra.mxu1 %vm667_vm0, %v6285_v54  ;;  %6332 = vmatmul.mubr.msk.f32.gmra.mxu0 %vm667_vm0, %v6316_v20  ;;  %v8297_v0 = vpop.permute.xlu0 %4868  ;;  %v6287_v54 = vld [vmem:[%s10713_s5 + $0x2f8] sm:$0xff] }
 0x17d   : > { %10810 = vst [vmem:[#allocation62_spill] sm:$0xff] %v8297_v0  ;;  %2215 = vmatprep.mubr.f32.mxu1 %v10767_v44  ;;  %2478 = vmatprep.mubr.f32.mxu0 %v10767_v44  ;;  %v8307_v43 = vpop.permute.xlu1 %4864 }
 0x17e   : > { %10811 = vst [vmem:[#allocation63_spill] sm:$0xff] %v8307_v43  ;;  %v6318_v43 = vld [vmem:[%s10713_s5 + $0x370] sm:$0xff] }
 0x180   : > { %6302 = vmatmul.mubr.msk.f32.gmra.mxu1 %vm667_vm0, %v6286_v39  ;;  %6333 = vmatmul.mubr.msk.f32.gmra.mxu0 %vm667_vm0, %v6317_v48  ;;  %v8313_v20 = vpop.permute.xlu0 %5182  ;;  %v6319_v39 = vld [vmem:[%s10713_s5 + $0x378] sm:$0xff] }
 0x181   : > { %10813 = vst [vmem:[#allocation65_spill] sm:$0xff] %v8313_v20  ;;  %2221 = vmatprep.mubr.f32.mxu1 %v10767_v44  ;;  %2484 = vmatprep.mubr.f32.mxu0 %v10767_v44  ;;  %v8323_v0 = vpop.permute.xlu1 %5184  ;;  %v6336_v20 = vld [vmem:[%s10713_s5 + $0x380] sm:$0xff] }
 0x182   : > { %10814 = vst [vmem:[#allocation66_spill] sm:$0xff] %v8323_v0 }
 0x184   : > { %6303 = vmatmul.mubr.msk.f32.gmra.mxu1 %vm667_vm0, %v6287_v54  ;;  %6334 = vmatmul.mubr.msk.f32.gmra.mxu0 %vm667_vm0, %v6318_v43  ;;  %v8329_v48 = vpop.permute.xlu0 %5180  ;;  %v8341_v54 = vpop.f32.mrf.mxu0 }
 0x185   : > { %10816 = vst [vmem:[#allocation68_spill] sm:$0xff] %v8329_v48  ;;  %2490 = vmatprep.mubr.f32.mxu0 %v10767_v44  ;;  %2669 = vmatprep.mubr.f32.mxu1 %v10767_v44  ;;  %v8339_v0 = vpop.permute.xlu1 %5176  ;;  %10818 = vst [vmem:[#allocation70_spill] sm:$0xff] %v8341_v54 }
 0x186   : > { %10817 = vst [vmem:[#allocation69_spill] sm:$0xff] %v8339_v0  ;;  %v6368_v0 = vld [vmem:[%s10713_s5 + $0x400] sm:$0xff] }
 0x188   : > { %v8343_v43 = vpop.f32.mrf.mxu1  ;;  %6335 = vmatmul.mubr.msk.f32.gmra.mxu0 %vm667_vm0, %v6319_v39  ;;  %6352 = vmatmul.mubr.msk.f32.vlgmr.msra.gmra.mxu1 %vm667_vm0, %v6336_v20  ;;  %v8347_v48 = vpop.permute.xlu0 %5178  ;;  %v6914_v39 = vld [vmem:[%s7294_s14 + $0x30] sm:$0xff]  ;;  %v3404_v20 = vsel %vm938_vm1, %v7621_v61, %v7605_v58  ;;  %v6369_v61 = vld [vmem:[%s10713_s5 + $0x408] sm:$0xff] }
 0x189   : > { %10819 = vst [vmem:[#allocation71_spill] sm:$0xff] %v8347_v48  ;;  %2675 = vmatprep.mubr.f32.mxu1 %v10767_v44  ;;  %2938 = vmatprep.mubr.f32.mxu0 %v10767_v44  ;;  %v8357_v54 = vpop.permute.xlu1 %5480  ;;  %v6915_v48 = vld [vmem:[%s7294_s14 + $0x28] sm:$0xff]  ;;  %v6338_v58 = vld [vmem:[%s10713_s5 + $0x390] sm:$0xff] }
 0x18a   : > { %10820 = vst [vmem:[#allocation72_spill] sm:$0xff] %v8357_v54  ;;  %v8359_v57 = vpop.f32.mrf.mxu1  ;;  %3165 = vmatpush1.msra.mxu1 %v6914_v39  ;;  %v3403_v39 = vsel %vm938_vm1, %v7623_v62, %v7639_v1  ;;  %v6916_v1 = vld [vmem:[%s7294_s14 + $0x20] sm:$0xff]  ;;  %v6339_v62 = vld [vmem:[%s10713_s5 + $0x398] sm:$0xff] }
 0x18b   : > { %3166 = vmatprep.subr.mxu1 %v6915_v48 }
 0x18c   : > { %v8366_v50 = vpop.f32.mrf.mxu1  ;;  %v8368_v33 = vpop.f32.mrf.mxu0  ;;  %6353 = vmatmul.mubr.msk.f32.gmra.mxu1 %vm667_vm0, %v6337_v41  ;;  %6384 = vmatmul.mubr.msk.f32.vlgmr.msra.gmra.mxu0 %vm667_vm0, %v6368_v0 }
 0x18d   : > { %2681 = vmatprep.mubr.f32.mxu1 %v10767_v44  ;;  %2944 = vmatprep.mubr.f32.mxu0 %v10767_v44  ;;  %v8383_v48 = vpop.permute.xlu0 %5482  ;;  %v8385_v41 = vpop.permute.xlu1 %5174 }
 0x18e   : > { %10821 = vst [vmem:[#allocation73_spill] sm:$0xff] %v8383_v48  ;;  %10822 = vst [vmem:[#allocation74_spill] sm:$0xff] %v8385_v41  ;;  %v8387_v0 = vpop.f32.mrf.mxu1  ;;  %v8389_v54 = vpop.f32.mrf.mxu0  ;;  %3167 = vmatpush1.msra.mxu1 %v6916_v1  ;;  %3487 = vmatpush1.msra.mxu0 %v3404_v20  ;;  %v3401_v20 = vsel %vm938_vm1, %v7677_v10, %v7693_v13  ;;  %v6918_v13 = vld [vmem:[%s7294_s14 + $0x10] sm:$0xff]  ;;  %v3400_v1 = vsel %vm938_vm1, %v7716_v21, %v7677_v10  ;;  %v6919_v41 = vld [vmem:[%s7294_s14 + $0x8] sm:$0xff] }
 0x18f   : > { %3168 = vmatprep.subr.mxu1 %v6917_v47  ;;  %3488 = vmatprep.subr.mxu0 %v3403_v39  ;;  %v3703_v10 = vsel %vm1207_vm2, %v7641_v2, %v7657_v5  ;;  %v6340_v21 = vld [vmem:[%s10713_s5 + $0x3a0] sm:$0xff] }
 0x190   : > { %v8396_v37 = vpop.f32.mrf.mxu1  ;;  %v8398_v48 = vpop.f32.mrf.mxu0  ;;  %6354 = vmatmul.mubr.msk.f32.gmra.mxu1 %vm667_vm0, %v6338_v58  ;;  %6385 = vmatmul.mubr.msk.f32.gmra.mxu0 %vm667_vm0, %v6369_v61  ;;  %v6920_v5 = vld [vmem:[%s7294_s14] sm:$0xff]  ;;  %s6921_s14 = scalar_lea.vmem %s10658_s17, 2048 }
 0x191   : > { %2687 = vmatprep.mubr.f32.mxu1 %v10767_v44  ;;  %2950 = vmatprep.mubr.f32.mxu0 %v10767_v44  ;;  %v8413_v47 = vpop.permute.xlu0 %5478  ;;  %v8415_v39 = vpop.permute.xlu1 %5170  ;;  %p6922_p4 = scmp.ne.s32.totalorder %s10658_s17, %s6921_s14  ;;  %p6929_p9 = scmp.lt.s32.totalorder %s6927_s28, %s6921_s14 }
 0x192   : > { %10823 = vst [vmem:[#allocation75_spill] sm:$0xff] %v8413_v47  ;;  %10824 = vst [vmem:[#allocation76_spill] sm:$0xff] %v8415_v39  ;;  %v8417_v58 = vpop.f32.mrf.mxu1  ;;  %v8419_v61 = vpop.f32.mrf.mxu0  ;;  %3169 = vmatpush1.msra.mxu1 %v6918_v13  ;;  %3489 = vmatpush1.msra.mxu0 %v3402_v51  ;;  %v3399_v51 = vsel %vm938_vm1, %v7740_v27, %v7759_v30  ;;  %v3398_v13 = vsel %vm938_vm1, %v7783_v52, %v7740_v27  ;;  %v6341_v27 = vld [vmem:[%s10713_s5 + $0x3a8] sm:$0xff]  ;;  %v6372_v52 = vld [vmem:[%s10713_s5 + $0x420] sm:$0xff] }
 0x193   : > { %3170 = vmatprep.subr.mxu1 %v6919_v41  ;;  %3490 = vmatprep.subr.mxu0 %v3401_v20  ;;  %v6371_v41 = vld [vmem:[%s10713_s5 + $0x418] sm:$0xff]  ;;  %p6923_p5 = pnand %p6922_p4, %p7123_p8  ;;  %p6930_p10 = por %p6929_p9, %p6928_p7 }
 0x194   : > { %v8426_v29 = vpop.f32.mrf.mxu1  ;;  %v8428_v47 = vpop.f32.mrf.mxu0  ;;  %6355 = vmatmul.mubr.msk.f32.gmra.mxu1 %vm667_vm0, %v6339_v62  ;;  %6386 = vmatmul.mubr.msk.f32.gmra.mxu0 %vm667_vm0, %v6370_v6 }
 0x195   : > { %2693 = vmatprep.mubr.f32.mxu1 %v10767_v44  ;;  %2956 = vmatprep.mubr.f32.mxu0 %v10767_v44  ;;  %v8446_v20 = vpop.permute.xlu0 %5172  ;;  %v8448_v62 = vpop.permute.xlu1 %5474  ;;  %p6924_p6 = pneg %p6923_p5 }
 0x196   : > { %10825 = vst [vmem:[#allocation77_spill] sm:$0xff] %v8446_v20  ;;  %10826 = vst [vmem:[#allocation78_spill] sm:$0xff] %v8448_v62  ;;  %v8450_v30 = vpop.f32.mrf.mxu1  ;;  %v8452_v6 = vpop.f32.mrf.mxu0  ;;  %3171 = vmatpush1.msra.mxu1 %v6920_v5  ;;  %3491 = vmatpush1.msra.mxu0 %v3400_v1  ;;  %v4001_v62 = vsel %vm1476_vm3, %v7843_v15, %v7845_v16  ;;  %v6342_v5 = vld [vmem:[%s10713_s5 + $0x3b0] sm:$0xff] }
 0x197   : > { %3492 = vmatprep.subr.mxu0 %v3399_v51  ;;  %3784 = vmatprep.subr.mxu1 %v3703_v10  ;;  %p6931_p12 = pnand %p6930_p10, %p6924_p6 }
 0x198   : > { %v8458_v39 = vpop.f32.mrf.mxu1  ;;  %v8460_v53 = vpop.f32.mrf.mxu0  ;;  %6356 = vmatmul.mubr.msk.f32.gmra.mxu1 %vm667_vm0, %v6340_v21  ;;  %6387 = vmatmul.mubr.msk.f32.gmra.mxu0 %vm667_vm0, %v6371_v41 }
 0x199   : > { %2699 = vmatprep.mubr.f32.mxu1 %v10767_v44  ;;  %2962 = vmatprep.mubr.f32.mxu0 %v10767_v44  ;;  %v8475_v1 = vpop.permute.xlu0 %5476  ;;  %v8477_v51 = vpop.permute.xlu1 %5168 }
 0x19a   : > { %10827 = vst [vmem:[#allocation79_spill] sm:$0xff] %v8475_v1  ;;  %10828 = vst [vmem:[#allocation80_spill] sm:$0xff] %v8477_v51  ;;  %v8479_v10 = vpop.f32.mrf.mxu1  ;;  %v8481_v21 = vpop.f32.mrf.mxu0  ;;  %3493 = vmatpush1.msra.mxu0 %v3398_v13 }
 0x19b   : > { %4082 = vmatprep.subr.mxu0 %v4001_v62  ;;  %v6373_v62 = vld [vmem:[%s10713_s5 + $0x428] sm:$0xff] }
 0x19c   : > { %v8483_v16 = vpop.f32.mrf.mxu1  ;;  %v8485_v41 = vpop.f32.mrf.mxu0  ;;  %6357 = vmatmul.mubr.msk.f32.gmra.mxu1 %vm667_vm0, %v6341_v27  ;;  %6388 = vmatmul.mubr.msk.f32.gmra.mxu0 %vm667_vm0, %v6372_v52 }
 0x19d   : > { %10829 = vst [vmem:[#allocation81_spill] sm:$0xff] %v8485_v41  ;;  %2705 = vmatprep.mubr.f32.mxu1 %v10767_v44  ;;  %2968 = vmatprep.mubr.f32.mxu0 %v10767_v44  ;;  %v8497_v13 = vpop.permute.xlu0 %5472  ;;  %v8499_v1 = vpop.permute.xlu1 %5164 }
 0x19e   : > { %10830 = vst [vmem:[#allocation82_spill] sm:$0xff] %v8497_v13  ;;  %10831 = vst [vmem:[#allocation83_spill] sm:$0xff] %v8499_v1  ;;  %v8501_v51 = vpop.f32.mrf.mxu1  ;;  %v8503_v27 = vpop.f32.mrf.mxu0  ;;  %v6343_v13 = vld [vmem:[%s10713_s5 + $0x3b8] sm:$0xff]  ;;  %v6374_v1 = vld [vmem:[%s10713_s5 + $0x430] sm:$0xff] }
 0x19f   : > { %10832 = vst [vmem:[#allocation84_spill] sm:$0xff] %v8503_v27 }
 0x1a0   : > { %v8505_v52 = vpop.f32.mrf.mxu1  ;;  %v8507_v20 = vpop.f32.mrf.mxu0  ;;  %6358 = vmatmul.mubr.msk.f32.gmra.mxu1 %vm667_vm0, %v6342_v5  ;;  %6389 = vmatmul.mubr.msk.f32.gmra.mxu0 %vm667_vm0, %v6373_v62 }
 0x1a1   : > { %10833 = vst [vmem:[#allocation85_spill] sm:$0xff] %v8505_v52  ;;  %2711 = vmatprep.mubr.f32.mxu1 %v10767_v44  ;;  %2974 = vmatprep.mubr.f32.mxu0 %v10767_v44  ;;  %v8519_v27 = vpop.permute.xlu0 %5166  ;;  %v8521_v52 = vpop.permute.xlu1 %5468 }
 0x1a2   : > { %10834 = vst [vmem:[#allocation86_spill] sm:$0xff] %v8519_v27  ;;  %10835 = vst [vmem:[#allocation87_spill] sm:$0xff] %v8521_v52  ;;  %v8523_v41 = vpop.f32.mrf.mxu1  ;;  %v8525_v5 = vpop.f32.mrf.mxu0  ;;  %v6344_v52 = vld [vmem:[%s10713_s5 + $0x3c0] sm:$0xff]  ;;  %v6375_v27 = vld [vmem:[%s10713_s5 + $0x438] sm:$0xff] }
 0x1a3   : > { %10836 = vst [vmem:[#allocation88_spill] sm:$0xff] %v8523_v41 }
 0x1a4   : > { %v8527_v62 = vpop.f32.mrf.mxu1  ;;  %v8529_v42 = vpop.f32.mrf.mxu0  ;;  %6359 = vmatmul.mubr.msk.f32.gmra.mxu1 %vm667_vm0, %v6343_v13  ;;  %6390 = vmatmul.mubr.msk.f32.gmra.mxu0 %vm667_vm0, %v6374_v1 }
 0x1a5   : > { %10837 = vst [vmem:[#allocation89_spill] sm:$0xff] %v8527_v62  ;;  %10838 = vst [vmem:[#allocation90_spill] sm:$0xff] %v8529_v42  ;;  %2717 = vmatprep.mubr.f32.mxu1 %v10767_v44  ;;  %2980 = vmatprep.mubr.f32.mxu0 %v10767_v44  ;;  %v8545_v42 = vpop.permute.xlu0 %5470  ;;  %v8547_v13 = vpop.permute.xlu1 %5162 }
 0x1a6   : > { %v8541_v41 = vpop.f32.mrf.mxu1  ;;  %v8543_v62 = vpop.f32.mrf.mxu0  ;;  %10841 = vst [vmem:[#allocation93_spill] sm:$0xff] %v8545_v42  ;;  %10842 = vst [vmem:[#allocation94_spill] sm:$0xff] %v8547_v13  ;;  %v6376_v42 = vld [vmem:[%s10713_s5 + $0x440] sm:$0xff] }
 0x1a7   : > { %10839 = vst [vmem:[#allocation91_spill] sm:$0xff] %v8541_v41  ;;  %10840 = vst [vmem:[#allocation92_spill] sm:$0xff] %v8543_v62  ;;  %v6345_v62 = vld [vmem:[%s10713_s5 + $0x3c8] sm:$0xff] }
 0x1a8   : > { %v8549_v1 = vpop.f32.mrf.mxu1  ;;  %v8551_v46 = vpop.f32.mrf.mxu0  ;;  %6360 = vmatmul.mubr.msk.f32.gmra.mxu1 %vm667_vm0, %v6344_v52  ;;  %6391 = vmatmul.mubr.msk.f32.gmra.mxu0 %vm667_vm0, %v6375_v27  ;;  %v6346_v27 = vld [vmem:[%s10713_s5 + $0x3d0] sm:$0xff] }
 0x1a9   : > { %10843 = vst [vmem:[#allocation95_spill] sm:$0xff] %v8549_v1  ;;  %10844 = vst [vmem:[#allocation96_spill] sm:$0xff] %v8551_v46  ;;  %2723 = vmatprep.mubr.f32.mxu1 %v10767_v44  ;;  %2986 = vmatprep.mubr.f32.mxu0 %v10767_v44 }
 0x1aa   : > { %v8563_v13 = vpop.f32.mrf.mxu1  ;;  %v8565_v1 = vpop.f32.mrf.mxu0 }
 0x1ab   : > { %10845 = vst [vmem:[#allocation97_spill] sm:$0xff] %v8563_v13  ;;  %10846 = vst [vmem:[#allocation98_spill] sm:$0xff] %v8565_v1  ;;  %v6377_v13 = vld [vmem:[%s10713_s5 + $0x448] sm:$0xff]  ;;  %v8581_v1 = vpop.permute.xlu0 %5466 }
 0x1ac   : > { %v8567_v46 = vpop.f32.mrf.mxu1  ;;  %v8569_v52 = vpop.f32.mrf.mxu0  ;;  %6361 = vmatmul.mubr.msk.f32.gmra.mxu1 %vm667_vm0, %v6345_v62  ;;  %6392 = vmatmul.mubr.msk.f32.gmra.mxu0 %vm667_vm0, %v6376_v42  ;;  %10849 = vst [vmem:[#allocation101_spill] sm:$0xff] %v8581_v1  ;;  %v6378_v1 = vld [vmem:[%s10713_s5 + $0x450] sm:$0xff] }
 0x1ad   : > { %10847 = vst [vmem:[#allocation99_spill] sm:$0xff] %v8567_v46  ;;  %10848 = vst [vmem:[#allocation100_spill] sm:$0xff] %v8569_v52  ;;  %2729 = vmatprep.mubr.f32.mxu1 %v10767_v44  ;;  %2992 = vmatprep.mubr.f32.mxu0 %v10767_v44  ;;  %v8583_v46 = vpop.permute.xlu1 %5462 }
 0x1ae   : > { %10850 = vst [vmem:[#allocation102_spill] sm:$0xff] %v8583_v46  ;;  %v8585_v52 = vpop.f32.mrf.mxu1  ;;  %v8587_v62 = vpop.f32.mrf.mxu0  ;;  %v6347_v46 = vld [vmem:[%s10713_s5 + $0x3d8] sm:$0xff] }
 0x1af   : > { %10851 = vst [vmem:[#allocation103_spill] sm:$0xff] %v8585_v52  ;;  %10852 = vst [vmem:[#allocation104_spill] sm:$0xff] %v8587_v62 }
 0x1b0   : > { %v8589_v42 = vpop.f32.mrf.mxu1  ;;  %v8591_v41 = vpop.f32.mrf.mxu0  ;;  %6362 = vmatmul.mubr.msk.f32.gmra.mxu1 %vm667_vm0, %v6346_v27  ;;  %6393 = vmatmul.mubr.msk.f32.gmra.mxu0 %vm667_vm0, %v6377_v13 }
 0x1b1   : > { %10853 = vst [vmem:[#allocation105_spill] sm:$0xff] %v8589_v42  ;;  %10854 = vst [vmem:[#allocation106_spill] sm:$0xff] %v8591_v41  ;;  %2735 = vmatprep.mubr.f32.mxu1 %v10767_v44  ;;  %2998 = vmatprep.mubr.f32.mxu0 %v10767_v44  ;;  %v8607_v41 = vpop.permute.xlu0 %5464  ;;  %v8609_v27 = vpop.permute.xlu1 %5460 }
 0x1b2   : > { %v8603_v62 = vpop.f32.mrf.mxu1  ;;  %v8605_v42 = vpop.f32.mrf.mxu0  ;;  %10857 = vst [vmem:[#allocation109_spill] sm:$0xff] %v8607_v41  ;;  %10858 = vst [vmem:[#allocation110_spill] sm:$0xff] %v8609_v27  ;;  %v6379_v27 = vld [vmem:[%s10713_s5 + $0x458] sm:$0xff] }
 0x1b3   : > { %10855 = vst [vmem:[#allocation107_spill] sm:$0xff] %v8603_v62  ;;  %10856 = vst [vmem:[#allocation108_spill] sm:$0xff] %v8605_v42  ;;  %v6348_v42 = vld [vmem:[%s10713_s5 + $0x3e0] sm:$0xff] }
 0x1b4   : > { %v8611_v13 = vpop.f32.mrf.mxu1  ;;  %v8613_v52 = vpop.f32.mrf.mxu0  ;;  %6363 = vmatmul.mubr.msk.f32.gmra.mxu1 %vm667_vm0, %v6347_v46  ;;  %6394 = vmatmul.mubr.msk.f32.gmra.mxu0 %vm667_vm0, %v6378_v1  ;;  %v8638_v1 = vsel %vm1207_vm2, %v7675_v9, %v7641_v2  ;;  %v8656_v2 = vsel %vm1207_vm2, %v7803_v60, %v7761_v31  ;;  %v8661_v9 = vsel %vm1207_vm2, %v7825_v8, %v7805_v63 }
 0x1b5   : > { %10859 = vst [vmem:[#allocation111_spill] sm:$0xff] %v8611_v13  ;;  %10860 = vst [vmem:[#allocation112_spill] sm:$0xff] %v8613_v52  ;;  %2741 = vmatprep.mubr.f32.mxu1 %v10767_v44  ;;  %3004 = vmatprep.mubr.f32.mxu0 %v10767_v44  ;;  %v8643_v13 = vsel %vm1207_vm2, %v7738_v26, %v7695_v14  ;;  %v8675_v60 = vsel %vm1476_vm3, %v7905_v55, %v7865_v23 }
 0x1b6   : > { %v8625_v41 = vpop.f32.mrf.mxu1  ;;  %v8627_v62 = vpop.f32.mrf.mxu0  ;;  %10865 = vst [vmem:[#allocation117_spill] sm:$0xff] %v8643_v13  ;;  %10866 = vst [vmem:[#allocation118_spill] sm:$0xff] %v8661_v9  ;;  %v8670_v13 = vsel %vm1476_vm3, %v7863_v18, %v7843_v15 }
 0x1b7   : > { %10861 = vst [vmem:[#allocation113_spill] sm:$0xff] %v8625_v41  ;;  %10862 = vst [vmem:[#allocation114_spill] sm:$0xff] %v8627_v62 }
 0x1b8   : > { %v8629_v52 = vpop.f32.mrf.mxu1  ;;  %v8631_v46 = vpop.f32.mrf.mxu0  ;;  %6364 = vmatmul.mubr.msk.f32.gmra.mxu1 %vm667_vm0, %v6348_v42  ;;  %6395 = vmatmul.mubr.msk.f32.gmra.mxu0 %vm667_vm0, %v6379_v27  ;;  %v6349_v42 = vld [vmem:[%s10713_s5 + $0x3e8] sm:$0xff]  ;;  %v6380_v27 = vld [vmem:[%s10713_s5 + $0x460] sm:$0xff] }
 0x1b9   : > { %10863 = vst [vmem:[#allocation115_spill] sm:$0xff] %v8629_v52  ;;  %10864 = vst [vmem:[#allocation116_spill] sm:$0xff] %v8631_v46  ;;  %v572_v41 = vpop.permute.xlu0 %571  ;;  %2747 = vmatprep.mubr.f32.mxu1 %v10767_v44  ;;  %3010 = vmatprep.mubr.f32.mxu0 %v10767_v44 }
 0x1ba   : > { %v877_v26 = vadd.f32 %v7771_v35, %v572_v41  ;;  %v878_v46 = vadd.f32 %v7777_v38, %v572_v41  ;;  %v577_v62 = vpop.permute.xlu1 %576  ;;  %v8665_v52 = vpop.f32.mrf.mxu1  ;;  %v8684_v38 = vsel %vm1476_vm3, %v7973_v49, %v7925_v11  ;;  %v6350_v49 = vld [vmem:[%s10713_s5 + $0x3f0] sm:$0xff] }
 0x1bb   : > { %v879_v8 = vadd.f32 %v7793_v56, %v577_v62  ;;  %v880_v9 = vadd.f32 %v7799_v59, %v577_v62  ;;  %v8679_v35 = vpop.f32.mrf.mxu0  ;;  %10867 = vst [vmem:[#allocation119_spill] sm:$0xff] %v8684_v38 }
 0x1bc   : > { %v1152_v41 = vadd.f32 %v8343_v43, %v877_v26  ;;  %v1153_v15 = vadd.f32 %v8359_v57, %v878_v46  ;;  %v8688_v18 = vpop.f32.mrf.mxu1  ;;  %6365 = vmatmul.mubr.msk.f32.gmra.mxu1 %vm667_vm0, %v6349_v42  ;;  %6396 = vmatmul.mubr.msk.f32.gmra.mxu0 %vm667_vm0, %v6380_v27  ;;  %v6381_v57 = vld [vmem:[%s10713_s5 + $0x468] sm:$0xff] }
 0x1bd   : > { %v1154_v56 = vadd.f32 %v8366_v50, %v879_v8  ;;  %v1155_v59 = vadd.f32 %v8387_v0, %v880_v9  ;;  %v8694_v55 = vpop.f32.mrf.mxu0  ;;  %v587_v62 = vpop.permute.xlu0 %586  ;;  %2753 = vmatprep.mubr.f32.mxu1 %v10767_v44  ;;  %3016 = vmatprep.mubr.f32.mxu0 %v10767_v44  ;;  %v8707_v50 = vsel %vm1207_vm2, %v7695_v14, %v7714_v19 }
 0x1be   : > { %v883_v43 = vadd.f32 %v7859_v22, %v587_v62  ;;  %v884_v0 = vadd.f32 %v7879_v28, %v587_v62  ;;  %v582_v46 = vpop.permute.xlu1 %581  ;;  %v8711_v42 = vpop.f32.mrf.mxu1  ;;  %v8714_v27 = vadd.f32 %v8368_v33, %v1152_v41  ;;  %v8717_v9 = vadd.f32 %v8389_v54, %v1153_v15 }
 0x1bf   : > { %v881_v26 = vadd.f32 %v7819_v4, %v582_v46  ;;  %v882_v8 = vadd.f32 %v7839_v12, %v582_v46  ;;  %v8721_v38 = vpop.f32.mrf.mxu0  ;;  %v8724_v14 = vadd.f32 %v8398_v48, %v1154_v56  ;;  %v8727_v19 = vadd.f32 %v8419_v61, %v1155_v59  ;;  %v6351_v61 = vld [vmem:[%s10713_s5 + $0x3f8] sm:$0xff]  ;;  %v10868_v46 = vld [vmem:[#allocation15_spill] sm:$0xff] }
 0x1c0   : > { %v1158_v22 = vadd.f32 %v8426_v29, %v883_v43  ;;  %v1159_v28 = vadd.f32 %v8450_v30, %v884_v0  ;;  %v8731_v33 = vpop.f32.mrf.mxu1  ;;  %6366 = vmatmul.mubr.msk.f32.gmra.mxu1 %vm667_vm0, %v6350_v49  ;;  %6397 = vmatmul.mubr.msk.f32.gmra.mxu0 %vm667_vm0, %v6381_v57  ;;  %v8738_v4 = vsel %vm1207_vm2, %v7761_v31, %v7781_v45  ;;  %v6382_v31 = vld [vmem:[%s10713_s5 + $0x470] sm:$0xff] }
 0x1c1   : > { %v1156_v12 = vadd.f32 %v8396_v37, %v881_v26  ;;  %v1157_v54 = vadd.f32 %v8417_v58, %v882_v8  ;;  %v8742_v48 = vpop.f32.mrf.mxu0  ;;  %v597_v29 = vpop.permute.xlu0 %596  ;;  %2759 = vmatprep.mubr.f32.mxu1 %v10767_v44  ;;  %3022 = vmatprep.mubr.f32.mxu0 %v10767_v44  ;;  %v8755_v45 = vsel %vm1207_vm2, %v7805_v63, %v7823_v7  ;;  %v10869_v8 = vld [vmem:[#allocation18_spill] sm:$0xff] }
 0x1c2   : > { %v887_v37 = vadd.f32 %v7939_v17, %v597_v29  ;;  %v888_v58 = vadd.f32 %v7959_v32, %v597_v29  ;;  %v592_v30 = vpop.permute.xlu1 %591  ;;  %v8759_v41 = vpop.f32.mrf.mxu1  ;;  %v8762_v15 = vadd.f32 %v8460_v53, %v1158_v22  ;;  %v8765_v56 = vadd.f32 %v8481_v21, %v1159_v28  ;;  %v10873_v29 = vld [vmem:[#allocation91_spill] sm:$0xff] }
 0x1c3   : > { %v885_v59 = vadd.f32 %v7899_v34, %v592_v30  ;;  %v886_v62 = vadd.f32 %v7919_v3, %v592_v30  ;;  %v8769_v49 = vpop.f32.mrf.mxu0  ;;  %v8772_v63 = vadd.f32 %v8428_v47, %v1156_v12  ;;  %v8775_v7 = vadd.f32 %v8452_v6, %v1157_v54  ;;  %v10872_v12 = vld [vmem:[#allocation89_spill] sm:$0xff] }
 0x1c4   : > { %v1162_v17 = vadd.f32 %v8483_v16, %v887_v37  ;;  %v1163_v53 = vadd.f32 %v8501_v51, %v888_v58  ;;  %v8779_v32 = vpop.f32.mrf.mxu1  ;;  %6367 = vmatmul.mubr.msk.f32.gmra.mxu1 %vm667_vm0, %v6351_v61  ;;  %6398 = vmatmul.mubr.msk.f32.gmra.mxu0 %vm667_vm0, %v6382_v31  ;;  %v8786_v34 = vsel %vm1476_vm3, %v7865_v23, %v7883_v25  ;;  %v6383_v51 = vld [vmem:[%s10713_s5 + $0x478] sm:$0xff]  ;;  %v3067_v23 = vld [vmem:[%s10714_s6] sm:$0xff] }
 0x1c5   : > { %v1160_v3 = vadd.f32 %v8458_v39, %v885_v59  ;;  %v1161_v47 = vadd.f32 %v8479_v10, %v886_v62  ;;  %v8790_v6 = vpop.f32.mrf.mxu0  ;;  %v607_v21 = vpop.permute.xlu0 %606  ;;  %3028 = vmatprep.mubr.f32.mxu0 %v10767_v44  ;;  %3204 = vmatprep.mubr.f32.mxu1 %v10767_v44  ;;  %v8803_v25 = vsel %vm1476_vm3, %v7925_v11, %v7943_v24  ;;  %v10870_v11 = vld [vmem:[#allocation81_spill] sm:$0xff]  ;;  %v10875_v31 = vld [vmem:[#allocation10_spill] sm:$0xff]  ;;  %v10877_v59 = vld [vmem:[#allocation88_spill] sm:$0xff] }
 0x1c6   : > { %v891_v39 = vadd.f32 %v8026_v36, %v607_v21  ;;  %v892_v10 = vadd.f32 %v8051_v40, %v607_v21  ;;  %v602_v16 = vpop.permute.xlu1 %601  ;;  %v8807_v57 = vpop.f32.mrf.mxu1  ;;  %v8810_v43 = vadd.f32 %v8507_v20, %v1162_v17  ;;  %v8813_v0 = vadd.f32 %v8525_v5, %v1163_v53  ;;  %v10871_v36 = vld [vmem:[#allocation84_spill] sm:$0xff]  ;;  %v10874_v5 = vld [vmem:[#allocation11_spill] sm:$0xff]  ;;  %v10876_v58 = vld [vmem:[#allocation85_spill] sm:$0xff] }
 0x1c7   : > { %v889_v26 = vadd.f32 %v10868_v46, %v602_v16  ;;  %v890_v22 = vadd.f32 %v10869_v8, %v602_v16  ;;  %v8817_v28 = vpop.f32.mrf.mxu0  ;;  %v8820_v24 = vadd.f32 %v10870_v11, %v1160_v3  ;;  %v8823_v40 = vadd.f32 %v10871_v36, %v1161_v47  ;;  %v3068_v47 = vld [vmem:[%s10714_s6 + $0x8] sm:$0xff]  ;;  %v6416_v21 = vld [vmem:[%s10714_s6 + $0x80] sm:$0xff]  ;;  %v10883_v11 = vld [vmem:[#allocation25_spill] sm:$0xff] }
 0x1c8   : > { %v1166_v54 = vadd.f32 %v10872_v12, %v891_v39  ;;  %v1167_v20 = vadd.f32 %v10873_v29, %v892_v10  ;;  %v1595_v61 = vpop.f32.mrf.mxu1  ;;  %6399 = vmatmul.mubr.msk.f32.gmra.mxu0 %vm667_vm0, %v6383_v51  ;;  %6400 = vmatmul.mubr.msk.f32.vlgmr.msra.gmra.mxu1 %vm3091_vm9, %v3067_v23  ;;  %v8832_v37 = vsel %vm1745_vm4, %v10875_v31, %v10874_v5  ;;  %v10878_v51 = vld [vmem:[#allocation31_spill] sm:$0xff]  ;;  %v10879_v39 = vld [vmem:[#allocation34_spill] sm:$0xff]  ;;  %v10884_v12 = vld [vmem:[#allocation28_spill] sm:$0xff] }
 0x1c9   : > { %v1164_v30 = vadd.f32 %v10876_v58, %v889_v26  ;;  %v1165_v62 = vadd.f32 %v10877_v59, %v890_v22  ;;  %v8836_v17 = vpop.f32.mrf.mxu0  ;;  %v1690_v53 = vadd.f32 %v1595_v61, %v8714_v27  ;;  %v617_v3 = vpop.permute.xlu0 %616  ;;  %3210 = vmatprep.mubr.f32.mxu1 %v10767_v44  ;;  %3526 = vmatprep.mubr.f32.mxu0 %v10767_v44  ;;  %v10880_v27 = vld [vmem:[#allocation96_spill] sm:$0xff]  ;;  %v10881_v8 = vld [vmem:[#allocation98_spill] sm:$0xff] }
 0x1ca   : > { %v895_v23 = vadd.f32 %v10878_v51, %v617_v3  ;;  %v896_v10 = vadd.f32 %v10879_v39, %v617_v3  ;;  %v612_v16 = vpop.permute.xlu1 %611  ;;  %v1597_v46 = vpop.f32.mrf.mxu1  ;;  %3785 = vmatpush1.msra.mxu1 %v8638_v1  ;;  %v8851_v26 = vadd.f32 %v10880_v27, %v1166_v54  ;;  %v8854_v22 = vadd.f32 %v10881_v8, %v1167_v20  ;;  %v10885_v58 = vld [vmem:[#allocation90_spill] sm:$0xff]  ;;  %v10886_v1 = vld [vmem:[#allocation99_spill] sm:$0xff]  ;;  %v10888_v20 = vld [vmem:[#allocation92_spill] sm:$0xff] }
 0x1cb   : > { %v893_v36 = vadd.f32 %v10883_v11, %v612_v16  ;;  %v894_v29 = vadd.f32 %v10884_v12, %v612_v16  ;;  %v8858_v61 = vpop.f32.mrf.mxu0  ;;  %v1691_v5 = vadd.f32 %v1597_v46, %v8717_v9  ;;  %3786 = vmatprep.subr.mxu1 %v8707_v50  ;;  %v8863_v59 = vadd.f32 %v10885_v58, %v1164_v30  ;;  %v10887_v54 = vld [vmem:[#allocation103_spill] sm:$0xff]  ;;  %v10890_v9 = vld [vmem:[#allocation97_spill] sm:$0xff] }
 0x1cc   : > { %10882 = vst [vmem:[#allocation15_spill] sm:$0xff] %v8854_v22  ;;  %v1170_v3 = vadd.f32 %v10886_v1, %v895_v23  ;;  %v1171_v51 = vadd.f32 %v10887_v54, %v896_v10  ;;  %v1601_v39 = vpop.f32.mrf.mxu1  ;;  %6401 = vmatmul.mubr.msk.f32.gmra.mxu1 %vm3091_vm9, %v3068_v47  ;;  %6432 = vmatmul.mubr.msk.f32.vlgmr.msra.gmra.mxu0 %vm3091_vm9, %v6416_v21  ;;  %v10889_v27 = vld [vmem:[#allocation95_spill] sm:$0xff]  ;;  %v3069_v47 = vld [vmem:[%s10714_s6 + $0x10] sm:$0xff]  ;;  %v10894_v58 = vld [vmem:[#allocation117_spill] sm:$0xff] }
 0x1cd   : > { %v8870_v16 = vadd.f32 %v10888_v20, %v1165_v62  ;;  %v1168_v8 = vadd.f32 %v10889_v27, %v893_v36  ;;  %v1169_v46 = vadd.f32 %v10890_v9, %v894_v29  ;;  %v1692_v50 = vadd.f32 %v1601_v39, %v8724_v14  ;;  %v1864_v30 = vpop.f32.mrf.mxu0  ;;  %v627_v11 = vpop.permute.xlu0 %626  ;;  %3216 = vmatprep.mubr.f32.mxu1 %v10767_v44  ;;  %v6417_v62 = vld [vmem:[%s10714_s6 + $0x88] sm:$0xff]  ;;  %v10893_v36 = vld [vmem:[#allocation46_spill] sm:$0xff]  ;;  %v10896_v39 = vld [vmem:[#allocation37_spill] sm:$0xff] }
 0x1ce   : > { %3532 = vmatprep.mubr.f32.mxu0 %v10767_v44  ;;  %v8883_v21 = vadd.f32 %v1864_v30, %v1690_v53  ;;  %v10892_v23 = vld [vmem:[#allocation43_spill] sm:$0xff]  ;;  %v900_v14 = vadd.f32 %v10893_v36, %v627_v11  ;;  %v622_v12 = vpop.permute.xlu1 %621  ;;  %v1603_v29 = vpop.f32.mrf.mxu1  ;;  %3787 = vmatpush1.msra.mxu1 %v10894_v58  ;;  %v10895_v1 = vld [vmem:[#allocation106_spill] sm:$0xff]  ;;  %v10897_v27 = vld [vmem:[#allocation40_spill] sm:$0xff] }
 0x1cf   : > { %v899_v10 = vadd.f32 %v10892_v23, %v627_v11  ;;  %v8889_v54 = vadd.f32 %v10895_v1, %v1170_v3  ;;  %v897_v20 = vadd.f32 %v10896_v39, %v622_v12  ;;  %v898_v9 = vadd.f32 %v10897_v27, %v622_v12  ;;  %v1866_v22 = vpop.f32.mrf.mxu0  ;;  %v10898_v53 = vld [vmem:[#allocation100_spill] sm:$0xff]  ;;  %3788 = vmatprep.subr.mxu1 %v8738_v4  ;;  %v10899_v11 = vld [vmem:[#allocation111_spill] sm:$0xff]  ;;  %v10900_v36 = vld [vmem:[#allocation113_spill] sm:$0xff] }
 0x1d0   : > { %10891 = vst [vmem:[#allocation18_spill] sm:$0xff] %v8883_v21  ;;  %v1693_v31 = vadd.f32 %v1603_v29, %v8727_v19  ;;  %v8895_v30 = vadd.f32 %v10898_v53, %v1168_v8  ;;  %v8902_v58 = vadd.f32 %v10900_v36, %v900_v14  ;;  %v8904_v3 = vadd.f32 %v1866_v22, %v1691_v5  ;;  %v1607_v1 = vpop.f32.mrf.mxu1  ;;  %v10902_v19 = vld [vmem:[#allocation105_spill] sm:$0xff]  ;;  %v10903_v29 = vld [vmem:[#allocation107_spill] sm:$0xff]  ;;  %v6418_v5 = vld [vmem:[%s10714_s6 + $0x90] sm:$0xff] }
 0x1d1   : > { %v8899_v23 = vadd.f32 %v10899_v11, %v899_v10  ;;  %6402 = vmatmul.mubr.msk.f32.gmra.mxu1 %vm3091_vm9, %v3069_v47  ;;  %6433 = vmatmul.mubr.msk.f32.gmra.mxu0 %vm3091_vm9, %v6417_v62  ;;  %v1172_v12 = vadd.f32 %v10902_v19, %v897_v20  ;;  %v1173_v8 = vadd.f32 %v10903_v29, %v898_v9  ;;  %v1870_v4 = vpop.f32.mrf.mxu0  ;;  %v637_v27 = vpop.permute.xlu0 %636  ;;  %v3070_v22 = vld [vmem:[%s10714_s6 + $0x18] sm:$0xff]  ;;  %v10904_v62 = vld [vmem:[#allocation55_spill] sm:$0xff]  ;;  %v10905_v14 = vld [vmem:[#allocation58_spill] sm:$0xff] }
 0x1d2   : > { %10901 = vst [vmem:[#allocation81_spill] sm:$0xff] %v8904_v3  ;;  %v1694_v39 = vadd.f32 %v1607_v1, %v8772_v63  ;;  %3222 = vmatprep.mubr.f32.mxu1 %v10767_v44  ;;  %3538 = vmatprep.mubr.f32.mxu0 %v10767_v44  ;;  %v8919_v47 = vadd.f32 %v1870_v4, %v1692_v50  ;;  %v632_v20 = vpop.permute.xlu1 %631  ;;  %v1609_v9 = vpop.f32.mrf.mxu1  ;;  %v10906_v53 = vld [vmem:[#allocation104_spill] sm:$0xff]  ;;  %v10907_v36 = vld [vmem:[#allocation49_spill] sm:$0xff] }
 0x1d3   : > { %v903_v10 = vadd.f32 %v10904_v62, %v637_v27  ;;  %v904_v63 = vadd.f32 %v10905_v14, %v637_v27  ;;  %v8924_v11 = vadd.f32 %v10906_v53, %v1169_v46  ;;  %3789 = vmatpush1.msra.mxu1 %v8656_v2  ;;  %v901_v1 = vadd.f32 %v10907_v36, %v632_v20  ;;  %v10908_v19 = vld [vmem:[#allocation52_spill] sm:$0xff]  ;;  %v1872_v21 = vpop.f32.mrf.mxu0  ;;  %v10910_v2 = vld [vmem:[#allocation115_spill] sm:$0xff]  ;;  %v10914_v36 = vld [vmem:[#allocation118_spill] sm:$0xff] }
 0x1d4   : > { %v902_v29 = vadd.f32 %v10908_v19, %v632_v20  ;;  %v1695_v3 = vadd.f32 %v1609_v9, %v8775_v7  ;;  %v10909_v50 = vld [vmem:[#allocation108_spill] sm:$0xff]  ;;  %3790 = vmatprep.subr.mxu1 %v8755_v45  ;;  %v8936_v46 = vadd.f32 %v1872_v21, %v1693_v31  ;;  %v1613_v14 = vpop.f32.mrf.mxu1  ;;  %v10911_v31 = vld [vmem:[#allocation67_spill] sm:$0xff]  ;;  %v10912_v21 = vld [vmem:[#allocation70_spill] sm:$0xff]  ;;  %4083 = vmatpush1.msra.mxu0 %v8670_v13 }
 0x1d5   : > { %v8931_v4 = vadd.f32 %v10909_v50, %v1171_v51  ;;  %v1178_v27 = vadd.f32 %v8688_v18, %v903_v10  ;;  %v1179_v62 = vadd.f32 %v8711_v42, %v904_v63  ;;  %6403 = vmatmul.mubr.msk.f32.gmra.mxu1 %vm3091_vm9, %v3070_v22  ;;  %6434 = vmatmul.mubr.msk.f32.gmra.mxu0 %vm3091_vm9, %v6418_v5  ;;  %v1876_v9 = vpop.f32.mrf.mxu0  ;;  %v647_v53 = vpop.permute.xlu0 %646  ;;  %v3071_v18 = vld [vmem:[%s10714_s6 + $0x20] sm:$0xff]  ;;  %v6419_v42 = vld [vmem:[%s10714_s6 + $0x98] sm:$0xff]  ;;  %v10913_v10 = vld [vmem:[#allocation112_spill] sm:$0xff] }
 0x1d6   : > { %v1176_v20 = vadd.f32 %v10910_v2, %v901_v1  ;;  %v1177_v7 = vadd.f32 %v8665_v52, %v902_v29  ;;  %v1696_v51 = vadd.f32 %v1613_v14, %v8762_v15  ;;  %3228 = vmatprep.mubr.f32.mxu1 %v10767_v44  ;;  %3544 = vmatprep.mubr.f32.mxu0 %v10767_v44  ;;  %v642_v22 = vpop.permute.xlu1 %641  ;;  %v1615_v5 = vpop.f32.mrf.mxu1  ;;  %v10915_v1 = vld [vmem:[#allocation61_spill] sm:$0xff]  ;;  %v10916_v29 = vld [vmem:[#allocation64_spill] sm:$0xff]  ;;  %v3072_v13 = vld [vmem:[%s10714_s6 + $0x28] sm:$0xff] }
 0x1d7   : > { %v8951_v45 = vadd.f32 %v1876_v9, %v1694_v39  ;;  %v907_v52 = vadd.f32 %v10911_v31, %v647_v53  ;;  %v908_v15 = vadd.f32 %v10912_v21, %v647_v53  ;;  %v8956_v63 = vadd.f32 %v10913_v10, %v1172_v12  ;;  %3791 = vmatpush1.msra.mxu1 %v10914_v36  ;;  %v1878_v2 = vpop.f32.mrf.mxu0  ;;  %v10917_v39 = vld [vmem:[#allocation114_spill] sm:$0xff]  ;;  %v10921_v10 = vld [vmem:[#allocation17_spill] sm:$0xff] }
 0x1d8   : > { %v905_v19 = vadd.f32 %v10915_v1, %v642_v22  ;;  %v906_v50 = vadd.f32 %v10916_v29, %v642_v22  ;;  %v1697_v14 = vadd.f32 %v1615_v5, %v8765_v56  ;;  %v8963_v9 = vadd.f32 %v10917_v39, %v1173_v8  ;;  %v1619_v21 = vpop.f32.mrf.mxu1  ;;  %4084 = vmatprep.subr.mxu0 %v8786_v34  ;;  %v10922_v36 = vld [vmem:[#allocation22_spill] sm:$0xff]  ;;  %v6422_v29 = vld [vmem:[%s10714_s6 + $0xb0] sm:$0xff] }
 0x1d9   : > { %v1182_v53 = vadd.f32 %v8779_v32, %v907_v52  ;;  %v1183_v31 = vadd.f32 %v8807_v57, %v908_v15  ;;  %v8968_v12 = vadd.f32 %v1878_v2, %v1695_v3  ;;  %6404 = vmatmul.mubr.msk.f32.gmra.mxu1 %vm3091_vm9, %v3071_v18  ;;  %6435 = vmatmul.mubr.msk.f32.gmra.mxu0 %vm3091_vm9, %v6419_v42  ;;  %v1882_v5 = vpop.f32.mrf.mxu0  ;;  %v6420_v32 = vld [vmem:[%s10714_s6 + $0xa0] sm:$0xff] }
 0x1da   : > { %v1180_v22 = vadd.f32 %v8731_v33, %v905_v19  ;;  %v1181_v56 = vadd.f32 %v8759_v41, %v906_v50  ;;  %v1698_v8 = vadd.f32 %v1619_v21, %v8820_v24  ;;  %3234 = vmatprep.mubr.f32.mxu1 %v10767_v44  ;;  %3550 = vmatprep.mubr.f32.mxu0 %v10767_v44  ;;  %v1621_v33 = vpop.f32.mrf.mxu1  ;;  %v10918_v41 = vld [vmem:[#allocation116_spill] sm:$0xff]  ;;  %v10923_v39 = vld [vmem:[#allocation30_spill] sm:$0xff] }
 0x1db   : > { %v8983_v57 = vadd.f32 %v1882_v5, %v1696_v51  ;;  %v8987_v3 = vadd.f32 %v10918_v41, %v8899_v23  ;;  %v8991_v24 = vadd.f32 %v8679_v35, %v8902_v58  ;;  %v8994_v18 = vadd.f32 %v8694_v55, %v1176_v20  ;;  %v1884_v52 = vpop.f32.mrf.mxu0  ;;  %4085 = vmatpush1.msra.mxu0 %v8675_v60  ;;  %v3073_v60 = vld [vmem:[%s10714_s6 + $0x30] sm:$0xff]  ;;  %v10919_v20 = vld [vmem:[#allocation119_spill] sm:$0xff]  ;;  %v6423_v5 = vld [vmem:[%s10714_s6 + $0xb8] sm:$0xff] }
 0x1dc   : > { %v1699_v42 = vadd.f32 %v1621_v33, %v8823_v40  ;;  %v8999_v51 = vadd.f32 %v8721_v38, %v1177_v7  ;;  %v9002_v15 = vadd.f32 %v8742_v48, %v1178_v27  ;;  %v9005_v23 = vadd.f32 %v8769_v49, %v1179_v62  ;;  %v1625_v55 = vpop.f32.mrf.mxu1  ;;  %v6421_v49 = vld [vmem:[%s10714_s6 + $0xa8] sm:$0xff]  ;;  %4086 = vmatprep.subr.mxu0 %v8803_v25 }
 0x1dd   : > { %v9008_v35 = vadd.f32 %v1884_v52, %v1697_v14  ;;  %6405 = vmatmul.mubr.msk.f32.gmra.mxu1 %vm3091_vm9, %v3072_v13  ;;  %6436 = vmatmul.mubr.msk.f32.gmra.mxu0 %vm3091_vm9, %v6420_v32  ;;  %v9013_v34 = vadd.f32 %v8790_v6, %v1180_v22  ;;  %v9016_v38 = vadd.f32 %v8817_v28, %v1181_v56  ;;  %v1888_v40 = vpop.f32.mrf.mxu0  ;;  %v10920_v7 = vld [vmem:[#allocation19_spill] sm:$0xff] }
 0x1de   : > { %v1700_v48 = vadd.f32 %v1625_v55, %v8810_v43  ;;  %3240 = vmatprep.mubr.f32.mxu1 %v10767_v44  ;;  %3556 = vmatprep.mubr.f32.mxu0 %v10767_v44  ;;  %v9028_v6 = vadd.f32 %v8836_v17, %v1182_v53  ;;  %v9031_v28 = vadd.f32 %v8858_v61, %v1183_v31  ;;  %v1627_v58 = vpop.f32.mrf.mxu1  ;;  %v10924_v53 = vld [vmem:[#allocation29_spill] sm:$0xff]  ;;  %v10925_v33 = vld [vmem:[#allocation15_spill] sm:$0xff] }
 0x1df   : > { %v9033_v43 = vadd.f32 %v1888_v40, %v1698_v8  ;;  %4380 = vmatprep.subr.mxu1 %v8832_v37  ;;  %v1701_v27 = vadd.f32 %v1627_v58, %v8813_v0  ;;  %v1890_v62 = vpop.f32.mrf.mxu0  ;;  %4087 = vmatpush1.msra.mxu0 %v10919_v20  ;;  %v3995_v17 = vsel %vm1476_vm3, %v10921_v10, %v10920_v7  ;;  %v3074_v37 = vld [vmem:[%s10714_s6 + $0x38] sm:$0xff]  ;;  %v3076_v40 = vld [vmem:[%s10714_s6 + $0x48] sm:$0xff] }
 0x1e0   : > { %v3994_v61 = vsel %vm1476_vm3, %v10922_v36, %v10921_v10  ;;  %v9045_v1 = vadd.f32 %v1890_v62, %v1699_v42  ;;  %v1631_v19 = vpop.f32.mrf.mxu1  ;;  %4088 = vmatprep.subr.mxu0 %v3995_v17  ;;  %v4597_v31 = vsel %vm2014_vm5, %v10924_v53, %v10923_v39  ;;  %v3077_v17 = vld [vmem:[%s10714_s6 + $0x50] sm:$0xff] }
 0x1e1   : > { %6406 = vmatmul.mubr.msk.f32.gmra.mxu1 %vm3091_vm9, %v3073_v60  ;;  %6437 = vmatmul.mubr.msk.f32.gmra.mxu0 %vm3091_vm9, %v6421_v49  ;;  %v1702_v25 = vadd.f32 %v1631_v19, %v8863_v59  ;;  %v1894_v0 = vpop.f32.mrf.mxu0  ;;  %v6424_v60 = vld [vmem:[%s10714_s6 + $0xc0] sm:$0xff] }
 0x1e2   : > { %3246 = vmatprep.mubr.f32.mxu1 %v10767_v44  ;;  %3562 = vmatprep.mubr.f32.mxu0 %v10767_v44  ;;  %v9058_v50 = vadd.f32 %v1894_v0, %v1700_v48  ;;  %v1633_v14 = vpop.f32.mrf.mxu1 }
 0x1e3   : > { %v1703_v2 = vadd.f32 %v1633_v14, %v8870_v16  ;;  %v1896_v59 = vpop.f32.mrf.mxu0  ;;  %4089 = vmatpush1.msra.mxu0 %v3994_v61  ;;  %v3075_v16 = vld [vmem:[%s10714_s6 + $0x40] sm:$0xff]  ;;  %v3078_v14 = vld [vmem:[%s10714_s6 + $0x58] sm:$0xff] }
 0x1e4   : > { %v9064_v21 = vadd.f32 %v1896_v59, %v1701_v27  ;;  %v1637_v22 = vpop.f32.mrf.mxu1  ;;  %4678 = vmatprep.subr.mxu0 %v4597_v31 }
 0x1e5   : > { %6407 = vmatmul.mubr.msk.f32.gmra.mxu1 %vm3091_vm9, %v3074_v37  ;;  %6438 = vmatmul.mubr.msk.f32.gmra.mxu0 %vm3091_vm9, %v6422_v29  ;;  %v1704_v56 = vadd.f32 %v1637_v22, %v8851_v26  ;;  %v1900_v8 = vpop.f32.mrf.mxu0 }
 0x1e6   : > { %3252 = vmatprep.mubr.f32.mxu1 %v10767_v44  ;;  %3568 = vmatprep.mubr.f32.mxu0 %v10767_v44  ;;  %v9077_v13 = vadd.f32 %v1900_v8, %v1702_v25  ;;  %v1639_v32 = vpop.f32.mrf.mxu1 }
 0x1e7   : > { %v1705_v41 = vadd.f32 %v1639_v32, %v10925_v33  ;;  %v1902_v26 = vpop.f32.mrf.mxu0 }
 0x1e8   : > { %v9080_v42 = vadd.f32 %v1902_v26, %v1703_v2  ;;  %v1643_v52 = vpop.f32.mrf.mxu1 }
 0x1e9   : > { %6408 = vmatmul.mubr.msk.f32.gmra.mxu1 %vm3091_vm9, %v3075_v16  ;;  %6439 = vmatmul.mubr.msk.f32.gmra.mxu0 %vm3091_vm9, %v6423_v5  ;;  %v1706_v55 = vadd.f32 %v1643_v52, %v8895_v30  ;;  %v1906_v48 = vpop.f32.mrf.mxu0  ;;  %v3079_v16 = vld [vmem:[%s10714_s6 + $0x60] sm:$0xff] }
 0x1ea   : > { %3258 = vmatprep.mubr.f32.mxu1 %v10767_v44  ;;  %3574 = vmatprep.mubr.f32.mxu0 %v10767_v44  ;;  %v9093_v49 = vadd.f32 %v1906_v48, %v1704_v56  ;;  %v1645_v58 = vpop.f32.mrf.mxu1  ;;  %v3080_v48 = vld [vmem:[%s10714_s6 + $0x68] sm:$0xff] }
 0x1eb   : > { %v1707_v27 = vadd.f32 %v1645_v58, %v8924_v11  ;;  %v1908_v62 = vpop.f32.mrf.mxu0  ;;  %v6425_v11 = vld [vmem:[%s10714_s6 + $0xc8] sm:$0xff] }
 0x1ec   : > { %v9096_v30 = vadd.f32 %v1908_v62, %v1705_v41  ;;  %v1649_v20 = vpop.f32.mrf.mxu1 }
 0x1ed   : > { %6409 = vmatmul.mubr.msk.f32.gmra.mxu1 %vm3091_vm9, %v3076_v40  ;;  %6440 = vmatmul.mubr.msk.f32.gmra.mxu0 %vm3091_vm9, %v6424_v60  ;;  %v1708_v7 = vadd.f32 %v1649_v20, %v8889_v54  ;;  %v1912_v10 = vpop.f32.mrf.mxu0 }
 0x1ee   : > { %3264 = vmatprep.mubr.f32.mxu1 %v10767_v44  ;;  %3580 = vmatprep.mubr.f32.mxu0 %v10767_v44  ;;  %v9109_v36 = vadd.f32 %v1912_v10, %v1706_v55  ;;  %v1651_v61 = vpop.f32.mrf.mxu1  ;;  %v3081_v10 = vld [vmem:[%s10714_s6 + $0x70] sm:$0xff] }
 0x1ef   : > { %v1709_v19 = vadd.f32 %v1651_v61, %v8931_v4  ;;  %v1914_v25 = vpop.f32.mrf.mxu0  ;;  %v6426_v4 = vld [vmem:[%s10714_s6 + $0xd0] sm:$0xff] }
 0x1f0   : > { %v9112_v54 = vadd.f32 %v1914_v25, %v1707_v27  ;;  %v1655_v0 = vpop.f32.mrf.mxu1 }
 0x1f1   : > { %6410 = vmatmul.mubr.msk.f32.gmra.mxu1 %vm3091_vm9, %v3077_v17  ;;  %6441 = vmatmul.mubr.msk.f32.gmra.mxu0 %vm3091_vm9, %v6425_v11  ;;  %v1710_v37 = vadd.f32 %v1655_v0, %v8956_v63  ;;  %v1918_v29 = vpop.f32.mrf.mxu0 }
 0x1f2   : > { %3270 = vmatprep.mubr.f32.mxu1 %v10767_v44  ;;  %3586 = vmatprep.mubr.f32.mxu0 %v10767_v44  ;;  %v9125_v2 = vadd.f32 %v1918_v29, %v1708_v7  ;;  %v1657_v59 = vpop.f32.mrf.mxu1  ;;  %v3082_v29 = vld [vmem:[%s10714_s6 + $0x78] sm:$0xff] }
 0x1f3   : > { %v1711_v39 = vadd.f32 %v1657_v59, %v8963_v9  ;;  %v1920_v31 = vpop.f32.mrf.mxu0  ;;  %v6427_v9 = vld [vmem:[%s10714_s6 + $0xd8] sm:$0xff] }
 0x1f4   : > { %v9128_v63 = vadd.f32 %v1920_v31, %v1709_v19  ;;  %v1661_v22 = vpop.f32.mrf.mxu1 }
 0x1f5   : > { %6411 = vmatmul.mubr.msk.f32.gmra.mxu1 %vm3091_vm9, %v3078_v14  ;;  %6442 = vmatmul.mubr.msk.f32.gmra.mxu0 %vm3091_vm9, %v6426_v4  ;;  %v1712_v56 = vadd.f32 %v1661_v22, %v8987_v3  ;;  %v1924_v8 = vpop.f32.mrf.mxu0 }
 0x1f6   : > { %3276 = vmatprep.mubr.f32.mxu1 %v10767_v44  ;;  %3592 = vmatprep.mubr.f32.mxu0 %v10767_v44  ;;  %v9141_v5 = vadd.f32 %v1924_v8, %v1710_v37  ;;  %v1663_v32 = vpop.f32.mrf.mxu1  ;;  %v6431_v8 = vld [vmem:[%s10714_s6 + $0xf8] sm:$0xff] }
 0x1f7   : > { %v1713_v33 = vadd.f32 %v1663_v32, %v8991_v24  ;;  %v1926_v41 = vpop.f32.mrf.mxu0  ;;  %v6428_v24 = vld [vmem:[%s10714_s6 + $0xe0] sm:$0xff] }
 0x1f8   : > { %v9144_v3 = vadd.f32 %v1926_v41, %v1711_v39  ;;  %v1667_v26 = vpop.f32.mrf.mxu1  ;;  %v10926_v32 = vld [vmem:[#allocation10_spill] sm:$0xff] }
 0x1f9   : > { %6412 = vmatmul.mubr.msk.f32.gmra.mxu1 %vm3091_vm9, %v3079_v16  ;;  %6443 = vmatmul.mubr.msk.f32.gmra.mxu0 %vm3091_vm9, %v6427_v9  ;;  %v1714_v52 = vadd.f32 %v1667_v26, %v8994_v18  ;;  %v1930_v55 = vpop.f32.mrf.mxu0 }
 0x1fa   : > { %3282 = vmatprep.mubr.f32.mxu1 %v10767_v44  ;;  %3598 = vmatprep.mubr.f32.mxu0 %v10767_v44  ;;  %v9157_v40 = vadd.f32 %v1930_v55, %v1712_v56  ;;  %v1669_v60 = vpop.f32.mrf.mxu1 }
 0x1fb   : > { %v1715_v58 = vadd.f32 %v1669_v60, %v8999_v51  ;;  %v1932_v27 = vpop.f32.mrf.mxu0  ;;  %v6429_v51 = vld [vmem:[%s10714_s6 + $0xe8] sm:$0xff] }
 0x1fc   : > { %v9160_v18 = vadd.f32 %v1932_v27, %v1713_v33  ;;  %v1673_v62 = vpop.f32.mrf.mxu1  ;;  %v10927_v33 = vld [vmem:[#allocation12_spill] sm:$0xff]  ;;  %v10930_v27 = vld [vmem:[#allocation18_spill] sm:$0xff] }
 0x1fd   : > { %6413 = vmatmul.mubr.msk.f32.gmra.mxu1 %vm3091_vm9, %v3080_v48  ;;  %6444 = vmatmul.mubr.msk.f32.gmra.mxu0 %vm3091_vm9, %v6428_v24  ;;  %v1716_v20 = vadd.f32 %v1673_v62, %v9002_v15  ;;  %v1936_v7 = vpop.f32.mrf.mxu0  ;;  %v10928_v48 = vld [vmem:[#allocation14_spill] sm:$0xff]  ;;  %v10929_v24 = vld [vmem:[#allocation13_spill] sm:$0xff] }
 0x1fe   : > { %3288 = vmatprep.mubr.f32.mxu1 %v10767_v44  ;;  %3604 = vmatprep.mubr.f32.mxu0 %v10767_v44  ;;  %v9173_v17 = vadd.f32 %v1936_v7, %v1714_v52  ;;  %v1675_v11 = vpop.f32.mrf.mxu1  ;;  %v4297_v60 = vsel %vm1745_vm4, %v10929_v24, %v10928_v48 }
 0x1ff   : > { %v1717_v61 = vadd.f32 %v1675_v11, %v9005_v23  ;;  %v1938_v19 = vpop.f32.mrf.mxu0  ;;  %v6430_v23 = vld [vmem:[%s10714_s6 + $0xf0] sm:$0xff] }
 0x200   : > { %v9176_v15 = vadd.f32 %v1938_v19, %v1715_v58  ;;  %v1679_v25 = vpop.f32.mrf.mxu1 }
 0x201   : > { %6414 = vmatmul.mubr.msk.f32.gmra.mxu1 %vm3091_vm9, %v3081_v10  ;;  %6445 = vmatmul.mubr.msk.f32.gmra.mxu0 %vm3091_vm9, %v6429_v51  ;;  %v1718_v0 = vadd.f32 %v1679_v25, %v9013_v34  ;;  %v1942_v37 = vpop.f32.mrf.mxu0  ;;  %v10931_v51 = vld [vmem:[#allocation16_spill] sm:$0xff] }
 0x202   : > { %3294 = vmatprep.mubr.f32.mxu1 %v10767_v44  ;;  %3610 = vmatprep.mubr.f32.mxu0 %v10767_v44  ;;  %v9189_v14 = vadd.f32 %v1942_v37, %v1716_v20  ;;  %v1681_v4 = vpop.f32.mrf.mxu1  ;;  %v6480_v20 = vld [vmem:[%s10714_s6 + $0x180] sm:$0xff]  ;;  %v4296_v11 = vsel %vm1745_vm4, %v10931_v51, %v10929_v24 }
 0x203   : > { %v1719_v59 = vadd.f32 %v1681_v4, %v9016_v38  ;;  %v1944_v39 = vpop.f32.mrf.mxu0  ;;  %v6448_v38 = vld [vmem:[%s10714_s6 + $0x100] sm:$0xff]  ;;  %v10934_v4 = vld [vmem:[#allocation21_spill] sm:$0xff] }
 0x204   : > { %v9192_v34 = vadd.f32 %v1944_v39, %v1717_v61  ;;  %v1685_v31 = vpop.f32.mrf.mxu1  ;;  %v10932_v61 = vld [vmem:[#allocation32_spill] sm:$0xff] }
 0x205   : > { %6415 = vmatmul.mubr.msk.f32.gmra.mxu1 %vm3091_vm9, %v3082_v29  ;;  %6446 = vmatmul.mubr.msk.f32.gmra.mxu0 %vm3091_vm9, %v6430_v23  ;;  %v1720_v22 = vadd.f32 %v1685_v31, %v9028_v6  ;;  %v1948_v56 = vpop.f32.mrf.mxu0  ;;  %v4298_v6 = vsel %vm1745_vm4, %v10927_v33, %v10926_v32  ;;  %v4596_v19 = vsel %vm2014_vm5, %v10932_v61, %v10924_v53  ;;  %v10936_v31 = vld [vmem:[#allocation35_spill] sm:$0xff]  ;;  %v6482_v61 = vld [vmem:[%s10714_s6 + $0x190] sm:$0xff] }
 0x206   : > { %3616 = vmatprep.mubr.f32.mxu0 %v10767_v44  ;;  %3824 = vmatprep.mubr.f32.mxu1 %v10767_v44  ;;  %v9205_v16 = vadd.f32 %v1948_v56, %v1718_v0  ;;  %v1687_v9 = vpop.f32.mrf.mxu1  ;;  %v10933_v0 = vld [vmem:[#allocation81_spill] sm:$0xff] }
 0x207   : > { %v1721_v41 = vadd.f32 %v1687_v9, %v9031_v28  ;;  %v1950_v26 = vpop.f32.mrf.mxu0  ;;  %v6449_v28 = vld [vmem:[%s10714_s6 + $0x108] sm:$0xff] }
 0x208   : > { %v9211_v52 = vadd.f32 %v1950_v26, %v1719_v59  ;;  %v2133_v55 = vpop.f32.mrf.mxu1  ;;  %v10935_v59 = vld [vmem:[#allocation20_spill] sm:$0xff]  ;;  %v6481_v9 = vld [vmem:[%s10714_s6 + $0x188] sm:$0xff] }
 0x209   : > { %6447 = vmatmul.mubr.msk.f32.gmra.mxu0 %vm3091_vm9, %v6431_v8  ;;  %6464 = vmatmul.mubr.msk.f32.vlgmr.msra.gmra.mxu1 %vm3091_vm9, %v6448_v38  ;;  %v1954_v58 = vpop.f32.mrf.mxu0  ;;  %v2228_v62 = vadd.f32 %v2133_v55, %v10930_v27  ;;  %v4295_v39 = vsel %vm1745_vm4, %v10935_v59, %v10934_v4  ;;  %v6450_v38 = vld [vmem:[%s10714_s6 + $0x110] sm:$0xff] }
 0x20a   : > { %3830 = vmatprep.mubr.f32.mxu1 %v10767_v44  ;;  %4122 = vmatprep.mubr.f32.mxu0 %v10767_v44  ;;  %v9227_v7 = vadd.f32 %v1954_v58, %v1720_v22  ;;  %v2135_v10 = vpop.f32.mrf.mxu1  ;;  %v10937_v22 = vld [vmem:[#allocation33_spill] sm:$0xff]  ;;  %v10940_v58 = vld [vmem:[#allocation26_spill] sm:$0xff]  ;;  %v10941_v27 = vld [vmem:[#allocation24_spill] sm:$0xff] }
 0x20b   : > { %4381 = vmatpush1.msra.mxu1 %v4298_v6  ;;  %v1956_v25 = vpop.f32.mrf.mxu0  ;;  %v2229_v37 = vadd.f32 %v2135_v10, %v10933_v0  ;;  %v4595_v56 = vsel %vm2014_vm5, %v10937_v22, %v10936_v31 }
 0x20c   : > { %4382 = vmatprep.subr.mxu1 %v4297_v60  ;;  %v9236_v29 = vadd.f32 %v1956_v25, %v1721_v41  ;;  %v2139_v23 = vpop.f32.mrf.mxu1  ;;  %v10939_v41 = vld [vmem:[#allocation39_spill] sm:$0xff] }
 0x20d   : > { %6465 = vmatmul.mubr.msk.f32.gmra.mxu1 %vm3091_vm9, %v6449_v28  ;;  %6496 = vmatmul.mubr.msk.f32.vlgmr.msra.gmra.mxu0 %vm3091_vm9, %v6480_v20  ;;  %v2230_v53 = vadd.f32 %v2139_v23, %v8919_v47  ;;  %v2402_v8 = vpop.f32.mrf.mxu0  ;;  %v10938_v47 = vld [vmem:[#allocation23_spill] sm:$0xff]  ;;  %v4594_v26 = vsel %vm2014_vm5, %v10939_v41, %v10937_v22  ;;  %v10942_v28 = vld [vmem:[#allocation44_spill] sm:$0xff]  ;;  %v10943_v20 = vld [vmem:[#allocation42_spill] sm:$0xff] }
 0x20e   : > { %3836 = vmatprep.mubr.f32.mxu1 %v10767_v44  ;;  %4128 = vmatprep.mubr.f32.mxu0 %v10767_v44  ;;  %v9255_v32 = vadd.f32 %v2402_v8, %v2228_v62  ;;  %v2141_v33 = vpop.f32.mrf.mxu1  ;;  %v4294_v6 = vsel %vm1745_vm4, %v10938_v47, %v10935_v59  ;;  %v4293_v62 = vsel %vm1745_vm4, %v10941_v27, %v10940_v58  ;;  %v10946_v22 = vld [vmem:[#allocation53_spill] sm:$0xff]  ;;  %v10948_v8 = vld [vmem:[#allocation38_spill] sm:$0xff] }
 0x20f   : > { %4383 = vmatpush1.msra.mxu1 %v4296_v11  ;;  %4679 = vmatpush1.msra.mxu0 %v4596_v19  ;;  %v2231_v55 = vadd.f32 %v2141_v33, %v8936_v46  ;;  %v2404_v48 = vpop.f32.mrf.mxu0  ;;  %v4593_v10 = vsel %vm2014_vm5, %v10943_v20, %v10942_v28  ;;  %v6451_v11 = vld [vmem:[%s10714_s6 + $0x118] sm:$0xff]  ;;  %v6452_v47 = vld [vmem:[%s10714_s6 + $0x120] sm:$0xff] }
 0x210   : > { %4384 = vmatprep.subr.mxu1 %v4295_v39  ;;  %4680 = vmatprep.subr.mxu0 %v4595_v56  ;;  %v9264_v24 = vadd.f32 %v2404_v48, %v2229_v37  ;;  %v2145_v60 = vpop.f32.mrf.mxu1  ;;  %v10945_v37 = vld [vmem:[#allocation48_spill] sm:$0xff]  ;;  %v10947_v56 = vld [vmem:[#allocation51_spill] sm:$0xff]  ;;  %v10952_v28 = vld [vmem:[#allocation65_spill] sm:$0xff] }
 0x211   : > { %6466 = vmatmul.mubr.msk.f32.gmra.mxu1 %vm3091_vm9, %v6450_v38  ;;  %6497 = vmatmul.mubr.msk.f32.gmra.mxu0 %vm3091_vm9, %v6481_v9  ;;  %v2232_v46 = vadd.f32 %v2145_v60, %v8951_v45  ;;  %v2408_v51 = vpop.f32.mrf.mxu0  ;;  %v10944_v45 = vld [vmem:[#allocation27_spill] sm:$0xff]  ;;  %v4592_v23 = vsel %vm2014_vm5, %v10945_v37, %v10943_v20  ;;  %v10949_v38 = vld [vmem:[#allocation36_spill] sm:$0xff] }
 0x212   : > { %3842 = vmatprep.mubr.f32.mxu1 %v10767_v44  ;;  %4134 = vmatprep.mubr.f32.mxu0 %v10767_v44  ;;  %v9283_v19 = vadd.f32 %v2408_v51, %v2230_v53  ;;  %v2147_v25 = vpop.f32.mrf.mxu1  ;;  %v4292_v0 = vsel %vm1745_vm4, %v10944_v45, %v10941_v27  ;;  %v4591_v53 = vsel %vm2014_vm5, %v10947_v56, %v10946_v22  ;;  %v6484_v51 = vld [vmem:[%s10714_s6 + $0x1a0] sm:$0xff] }
 0x213   : > { %4385 = vmatpush1.msra.mxu1 %v4294_v6  ;;  %4681 = vmatpush1.msra.mxu0 %v4594_v26  ;;  %v2233_v4 = vadd.f32 %v2147_v25, %v8968_v12  ;;  %v2410_v59 = vpop.f32.mrf.mxu0  ;;  %v4895_v9 = vsel %vm2283_vm6, %v10949_v38, %v10948_v8  ;;  %v6483_v6 = vld [vmem:[%s10714_s6 + $0x198] sm:$0xff] }
 0x214   : > { %4386 = vmatprep.subr.mxu1 %v4293_v62  ;;  %4682 = vmatprep.subr.mxu0 %v4593_v10  ;;  %v9292_v39 = vadd.f32 %v2410_v59, %v2231_v55  ;;  %v2151_v31 = vpop.f32.mrf.mxu1  ;;  %v10951_v62 = vld [vmem:[#allocation66_spill] sm:$0xff] }
 0x215   : > { %6467 = vmatmul.mubr.msk.f32.gmra.mxu1 %vm3091_vm9, %v6451_v11  ;;  %6498 = vmatmul.mubr.msk.f32.gmra.mxu0 %vm3091_vm9, %v6482_v61  ;;  %v2234_v12 = vadd.f32 %v2151_v31, %v8983_v57  ;;  %v2414_v33 = vpop.f32.mrf.mxu0  ;;  %v10950_v57 = vld [vmem:[#allocation57_spill] sm:$0xff]  ;;  %v5193_v20 = vsel %vm2552_vm7, %v10952_v28, %v10951_v62 }
 0x216   : > { %3848 = vmatprep.mubr.f32.mxu1 %v10767_v44  ;;  %4140 = vmatprep.mubr.f32.mxu0 %v10767_v44  ;;  %v9311_v41 = vadd.f32 %v2414_v33, %v2232_v46  ;;  %v2153_v26 = vpop.f32.mrf.mxu1  ;;  %v4590_v55 = vsel %vm2014_vm5, %v10950_v57, %v10947_v56 }
 0x217   : > { %4387 = vmatpush1.msra.mxu1 %v4292_v0  ;;  %4683 = vmatpush1.msra.mxu0 %v4592_v23  ;;  %v2235_v48 = vadd.f32 %v2153_v26, %v9008_v35  ;;  %v2416_v60 = vpop.f32.mrf.mxu0  ;;  %v6453_v35 = vld [vmem:[%s10714_s6 + $0x128] sm:$0xff] }
 0x218   : > { %4684 = vmatprep.subr.mxu0 %v4591_v53  ;;  %4976 = vmatprep.subr.mxu1 %v4895_v9  ;;  %v9317_v58 = vadd.f32 %v2416_v60, %v2233_v4  ;;  %v2157_v27 = vpop.f32.mrf.mxu1  ;;  %v6485_v4 = vld [vmem:[%s10714_s6 + $0x1a8] sm:$0xff]  ;;  %v6456_v60 = vld [vmem:[%s10714_s6 + $0x140] sm:$0xff] }
 0x219   : > { %6468 = vmatmul.mubr.msk.f32.gmra.mxu1 %vm3091_vm9, %v6452_v47  ;;  %6499 = vmatmul.mubr.msk.f32.gmra.mxu0 %vm3091_vm9, %v6483_v6  ;;  %v2236_v10 = vadd.f32 %v2157_v27, %v9033_v43  ;;  %v2420_v46 = vpop.f32.mrf.mxu0 }
 0x21a   : > { %3854 = vmatprep.mubr.f32.mxu1 %v10767_v44  ;;  %4146 = vmatprep.mubr.f32.mxu0 %v10767_v44  ;;  %v9333_v11 = vadd.f32 %v2420_v46, %v2234_v12  ;;  %v2159_v61 = vpop.f32.mrf.mxu1  ;;  %v6455_v12 = vld [vmem:[%s10714_s6 + $0x138] sm:$0xff] }
 0x21b   : > { %4685 = vmatpush1.msra.mxu0 %v4590_v55  ;;  %v2237_v25 = vadd.f32 %v2159_v61, %v9045_v1  ;;  %v2422_v43 = vpop.f32.mrf.mxu0  ;;  %v6454_v1 = vld [vmem:[%s10714_s6 + $0x130] sm:$0xff]  ;;  %v6457_v61 = vld [vmem:[%s10714_s6 + $0x148] sm:$0xff] }
 0x21c   : > { %5274 = vmatprep.subr.mxu0 %v5193_v20  ;;  %v9336_v45 = vadd.f32 %v2422_v43, %v2235_v48  ;;  %v2163_v0 = vpop.f32.mrf.mxu1 }
 0x21d   : > { %6469 = vmatmul.mubr.msk.f32.gmra.mxu1 %vm3091_vm9, %v6453_v35  ;;  %6500 = vmatmul.mubr.msk.f32.gmra.mxu0 %vm3091_vm9, %v6484_v51  ;;  %v2238_v37 = vadd.f32 %v2163_v0, %v9058_v50  ;;  %v2426_v23 = vpop.f32.mrf.mxu0 }
 0x21e   : > { %3860 = vmatprep.mubr.f32.mxu1 %v10767_v44  ;;  %4152 = vmatprep.mubr.f32.mxu0 %v10767_v44  ;;  %v9349_v59 = vadd.f32 %v2426_v23, %v2236_v10  ;;  %v2165_v31 = vpop.f32.mrf.mxu1 }
 0x21f   : > { %v2239_v22 = vadd.f32 %v2165_v31, %v9064_v21  ;;  %v2428_v56 = vpop.f32.mrf.mxu0  ;;  %v6486_v21 = vld [vmem:[%s10714_s6 + $0x1b0] sm:$0xff] }
 0x220   : > { %v9352_v50 = vadd.f32 %v2428_v56, %v2237_v25  ;;  %v2169_v53 = vpop.f32.mrf.mxu1  ;;  %v6458_v31 = vld [vmem:[%s10714_s6 + $0x150] sm:$0xff] }
 0x221   : > { %6470 = vmatmul.mubr.msk.f32.gmra.mxu1 %vm3091_vm9, %v6454_v1  ;;  %6501 = vmatmul.mubr.msk.f32.gmra.mxu0 %vm3091_vm9, %v6485_v4  ;;  %v2240_v8 = vadd.f32 %v2169_v53, %v9077_v13  ;;  %v2432_v9 = vpop.f32.mrf.mxu0 }
 0x222   : > { %3866 = vmatprep.mubr.f32.mxu1 %v10767_v44  ;;  %4158 = vmatprep.mubr.f32.mxu0 %v10767_v44  ;;  %v9365_v33 = vadd.f32 %v2432_v9, %v2238_v37  ;;  %v2171_v47 = vpop.f32.mrf.mxu1 }
 0x223   : > { %v2241_v6 = vadd.f32 %v2171_v47, %v9080_v42  ;;  %v2434_v26 = vpop.f32.mrf.mxu0  ;;  %v6487_v42 = vld [vmem:[%s10714_s6 + $0x1b8] sm:$0xff] }
 0x224   : > { %v9368_v13 = vadd.f32 %v2434_v26, %v2239_v22  ;;  %v2175_v57 = vpop.f32.mrf.mxu1  ;;  %v6459_v47 = vld [vmem:[%s10714_s6 + $0x158] sm:$0xff] }
 0x225   : > { %6471 = vmatmul.mubr.msk.f32.gmra.mxu1 %vm3091_vm9, %v6455_v12  ;;  %6502 = vmatmul.mubr.msk.f32.gmra.mxu0 %vm3091_vm9, %v6486_v21  ;;  %v2242_v55 = vadd.f32 %v2175_v57, %v9093_v49  ;;  %v2438_v48 = vpop.f32.mrf.mxu0 }
 0x226   : > { %3872 = vmatprep.mubr.f32.mxu1 %v10767_v44  ;;  %4164 = vmatprep.mubr.f32.mxu0 %v10767_v44  ;;  %v9381_v27 = vadd.f32 %v2438_v48, %v2240_v8  ;;  %v2177_v62 = vpop.f32.mrf.mxu1 }
 0x227   : > { %v2243_v20 = vadd.f32 %v2177_v62, %v9096_v30  ;;  %v2440_v10 = vpop.f32.mrf.mxu0  ;;  %v6488_v30 = vld [vmem:[%s10714_s6 + $0x1c0] sm:$0xff] }
 0x228   : > { %v9384_v49 = vadd.f32 %v2440_v10, %v2241_v6  ;;  %v2181_v46 = vpop.f32.mrf.mxu1  ;;  %v6460_v62 = vld [vmem:[%s10714_s6 + $0x160] sm:$0xff] }
 0x229   : > { %6472 = vmatmul.mubr.msk.f32.gmra.mxu1 %vm3091_vm9, %v6456_v60  ;;  %6503 = vmatmul.mubr.msk.f32.gmra.mxu0 %vm3091_vm9, %v6487_v42  ;;  %v2244_v35 = vadd.f32 %v2181_v46, %v9109_v36  ;;  %v2444_v51 = vpop.f32.mrf.mxu0 }
 0x22a   : > { %3878 = vmatprep.mubr.f32.mxu1 %v10767_v44  ;;  %4170 = vmatprep.mubr.f32.mxu0 %v10767_v44  ;;  %v9397_v25 = vadd.f32 %v2444_v51, %v2242_v55  ;;  %v2183_v43 = vpop.f32.mrf.mxu1 }
 0x22b   : > { %v2245_v0 = vadd.f32 %v2183_v43, %v9112_v54  ;;  %v2446_v37 = vpop.f32.mrf.mxu0  ;;  %v6489_v54 = vld [vmem:[%s10714_s6 + $0x1c8] sm:$0xff] }
 0x22c   : > { %v9400_v36 = vadd.f32 %v2446_v37, %v2243_v20  ;;  %v2187_v23 = vpop.f32.mrf.mxu1  ;;  %v6461_v43 = vld [vmem:[%s10714_s6 + $0x168] sm:$0xff] }
 0x22d   : > { %6473 = vmatmul.mubr.msk.f32.gmra.mxu1 %vm3091_vm9, %v6457_v61  ;;  %6504 = vmatmul.mubr.msk.f32.gmra.mxu0 %vm3091_vm9, %v6488_v30  ;;  %v2246_v1 = vadd.f32 %v2187_v23, %v9125_v2  ;;  %v2450_v4 = vpop.f32.mrf.mxu0 }
 0x22e   : > { %3884 = vmatprep.mubr.f32.mxu1 %v10767_v44  ;;  %4176 = vmatprep.mubr.f32.mxu0 %v10767_v44  ;;  %v9413_v22 = vadd.f32 %v2450_v4, %v2244_v35  ;;  %v2189_v56 = vpop.f32.mrf.mxu1 }
 0x22f   : > { %v2247_v53 = vadd.f32 %v2189_v56, %v9128_v63  ;;  %v2452_v8 = vpop.f32.mrf.mxu0  ;;  %v6490_v63 = vld [vmem:[%s10714_s6 + $0x1d0] sm:$0xff] }
 0x230   : > { %v9416_v2 = vadd.f32 %v2452_v8, %v2245_v0  ;;  %v2193_v9 = vpop.f32.mrf.mxu1  ;;  %v6462_v56 = vld [vmem:[%s10714_s6 + $0x170] sm:$0xff] }
 0x231   : > { %6474 = vmatmul.mubr.msk.f32.gmra.mxu1 %vm3091_vm9, %v6458_v31  ;;  %6505 = vmatmul.mubr.msk.f32.gmra.mxu0 %vm3091_vm9, %v6489_v54  ;;  %v2248_v12 = vadd.f32 %v2193_v9, %v9141_v5  ;;  %v2456_v21 = vpop.f32.mrf.mxu0 }
 0x232   : > { %3890 = vmatprep.mubr.f32.mxu1 %v10767_v44  ;;  %4182 = vmatprep.mubr.f32.mxu0 %v10767_v44  ;;  %v9429_v6 = vadd.f32 %v2456_v21, %v2246_v1  ;;  %v2195_v26 = vpop.f32.mrf.mxu1 }
 0x233   : > { %v2249_v57 = vadd.f32 %v2195_v26, %v9144_v3  ;;  %v2458_v55 = vpop.f32.mrf.mxu0  ;;  %v6491_v3 = vld [vmem:[%s10714_s6 + $0x1d8] sm:$0xff] }
 0x234   : > { %v9432_v5 = vadd.f32 %v2458_v55, %v2247_v53  ;;  %v2199_v48 = vpop.f32.mrf.mxu1  ;;  %v6463_v26 = vld [vmem:[%s10714_s6 + $0x178] sm:$0xff] }
 0x235   : > { %6475 = vmatmul.mubr.msk.f32.gmra.mxu1 %vm3091_vm9, %v6459_v47  ;;  %6506 = vmatmul.mubr.msk.f32.gmra.mxu0 %vm3091_vm9, %v6490_v63  ;;  %v2250_v60 = vadd.f32 %v2199_v48, %v9157_v40  ;;  %v2462_v42 = vpop.f32.mrf.mxu0 }
 0x236   : > { %3896 = vmatprep.mubr.f32.mxu1 %v10767_v44  ;;  %4188 = vmatprep.mubr.f32.mxu0 %v10767_v44  ;;  %v9445_v20 = vadd.f32 %v2462_v42, %v2248_v12  ;;  %v2201_v10 = vpop.f32.mrf.mxu1 }
 0x237   : > { %v2251_v46 = vadd.f32 %v2201_v10, %v9160_v18  ;;  %v2464_v35 = vpop.f32.mrf.mxu0  ;;  %v6492_v18 = vld [vmem:[%s10714_s6 + $0x1e0] sm:$0xff]  ;;  %v6495_v10 = vld [vmem:[%s10714_s6 + $0x1f8] sm:$0xff] }
 0x238   : > { %v9448_v40 = vadd.f32 %v2464_v35, %v2249_v57  ;;  %v2205_v51 = vpop.f32.mrf.mxu1 }
 0x239   : > { %6476 = vmatmul.mubr.msk.f32.gmra.mxu1 %vm3091_vm9, %v6460_v62  ;;  %6507 = vmatmul.mubr.msk.f32.gmra.mxu0 %vm3091_vm9, %v6491_v3  ;;  %v2252_v61 = vadd.f32 %v2205_v51, %v9173_v17  ;;  %v2468_v30 = vpop.f32.mrf.mxu0  ;;  %v10953_v51 = vld [vmem:[#allocation41_spill] sm:$0xff] }
 0x23a   : > { %3902 = vmatprep.mubr.f32.mxu1 %v10767_v44  ;;  %4194 = vmatprep.mubr.f32.mxu0 %v10767_v44  ;;  %v9461_v0 = vadd.f32 %v2468_v30, %v2250_v60  ;;  %v2207_v37 = vpop.f32.mrf.mxu1 }
 0x23b   : > { %v2253_v23 = vadd.f32 %v2207_v37, %v9176_v15  ;;  %v2470_v1 = vpop.f32.mrf.mxu0  ;;  %v6493_v15 = vld [vmem:[%s10714_s6 + $0x1e8] sm:$0xff] }
 0x23c   : > { %v9464_v17 = vadd.f32 %v2470_v1, %v2251_v46  ;;  %v2211_v4 = vpop.f32.mrf.mxu1  ;;  %v10954_v37 = vld [vmem:[#allocation47_spill] sm:$0xff] }
 0x23d   : > { %6477 = vmatmul.mubr.msk.f32.gmra.mxu1 %vm3091_vm9, %v6461_v43  ;;  %6508 = vmatmul.mubr.msk.f32.gmra.mxu0 %vm3091_vm9, %v6492_v18  ;;  %v2254_v31 = vadd.f32 %v2211_v4, %v9189_v14  ;;  %v2474_v54 = vpop.f32.mrf.mxu0 }
 0x23e   : > { %3908 = vmatprep.mubr.f32.mxu1 %v10767_v44  ;;  %4200 = vmatprep.mubr.f32.mxu0 %v10767_v44  ;;  %v9477_v53 = vadd.f32 %v2474_v54, %v2252_v61  ;;  %v2213_v8 = vpop.f32.mrf.mxu1 }
 0x23f   : > { %v2255_v9 = vadd.f32 %v2213_v8, %v9192_v34  ;;  %v2476_v12 = vpop.f32.mrf.mxu0  ;;  %v6494_v34 = vld [vmem:[%s10714_s6 + $0x1f0] sm:$0xff] }
 0x240   : > { %v9480_v14 = vadd.f32 %v2476_v12, %v2253_v23  ;;  %v2217_v21 = vpop.f32.mrf.mxu1  ;;  %v10955_v23 = vld [vmem:[#allocation45_spill] sm:$0xff]  ;;  %v10957_v8 = vld [vmem:[#allocation68_spill] sm:$0xff] }
 0x241   : > { %6478 = vmatmul.mubr.msk.f32.gmra.mxu1 %vm3091_vm9, %v6462_v56  ;;  %6509 = vmatmul.mubr.msk.f32.gmra.mxu0 %vm3091_vm9, %v6493_v15  ;;  %v2256_v47 = vadd.f32 %v2217_v21, %v9205_v16  ;;  %v2480_v63 = vpop.f32.mrf.mxu0  ;;  %v4893_v1 = vsel %vm2283_vm6, %v10955_v23, %v10954_v37  ;;  %v10956_v15 = vld [vmem:[#allocation50_spill] sm:$0xff] }
 0x242   : > { %3914 = vmatprep.mubr.f32.mxu1 %v10767_v44  ;;  %4206 = vmatprep.mubr.f32.mxu0 %v10767_v44  ;;  %v9493_v57 = vadd.f32 %v2480_v63, %v2254_v31  ;;  %v2219_v55 = vpop.f32.mrf.mxu1 }
 0x243   : > { %v2257_v48 = vadd.f32 %v2219_v55, %v9211_v52  ;;  %v2482_v60 = vpop.f32.mrf.mxu0  ;;  %v6512_v52 = vld [vmem:[%s10714_s6 + $0x200] sm:$0xff] }
 0x244   : > { %v9496_v16 = vadd.f32 %v2482_v60, %v2255_v9  ;;  %v2223_v42 = vpop.f32.mrf.mxu1  ;;  %v5192_v9 = vsel %vm2552_vm7, %v10957_v8, %v10952_v28  ;;  %v10961_v60 = vld [vmem:[#allocation69_spill] sm:$0xff] }
 0x245   : > { %6479 = vmatmul.mubr.msk.f32.gmra.mxu1 %vm3091_vm9, %v6463_v26  ;;  %6510 = vmatmul.mubr.msk.f32.gmra.mxu0 %vm3091_vm9, %v6494_v34  ;;  %v2258_v62 = vadd.f32 %v2223_v42, %v9227_v7  ;;  %v2486_v3 = vpop.f32.mrf.mxu0  ;;  %v4894_v7 = vsel %vm2283_vm6, %v10953_v51, %v10949_v38  ;;  %v6544_v38 = vld [vmem:[%s10714_s6 + $0x280] sm:$0xff]  ;;  %v10958_v26 = vld [vmem:[#allocation56_spill] sm:$0xff] }
 0x246   : > { %4212 = vmatprep.mubr.f32.mxu0 %v10767_v44  ;;  %4420 = vmatprep.mubr.f32.mxu1 %v10767_v44  ;;  %v9509_v46 = vadd.f32 %v2486_v3, %v2256_v47  ;;  %v2225_v35 = vpop.f32.mrf.mxu1  ;;  %v10959_v34 = vld [vmem:[#allocation54_spill] sm:$0xff]  ;;  %v6545_v3 = vld [vmem:[%s10714_s6 + $0x288] sm:$0xff] }
 0x247   : > { %v2259_v61 = vadd.f32 %v2225_v35, %v9236_v29  ;;  %v2488_v30 = vpop.f32.mrf.mxu0  ;;  %v6513_v29 = vld [vmem:[%s10714_s6 + $0x208] sm:$0xff]  ;;  %v4891_v55 = vsel %vm2283_vm6, %v10959_v34, %v10958_v26  ;;  %v10963_v51 = vld [vmem:[#allocation74_spill] sm:$0xff] }
 0x248   : > { %v9515_v43 = vadd.f32 %v2488_v30, %v2257_v48  ;;  %v2671_v18 = vpop.f32.mrf.mxu1  ;;  %v10960_v48 = vld [vmem:[#allocation71_spill] sm:$0xff] }
 0x249   : > { %6511 = vmatmul.mubr.msk.f32.gmra.mxu0 %vm3091_vm9, %v6495_v10  ;;  %6528 = vmatmul.mubr.msk.f32.vlgmr.msra.gmra.mxu1 %vm3091_vm9, %v6512_v52  ;;  %v2492_v4 = vpop.f32.mrf.mxu0  ;;  %v2766_v31 = vadd.f32 %v2671_v18, %v9255_v32  ;;  %v4892_v32 = vsel %vm2283_vm6, %v10956_v15, %v10955_v23  ;;  %v5191_v42 = vsel %vm2552_vm7, %v10961_v60, %v10960_v48  ;;  %v10964_v23 = vld [vmem:[#allocation62_spill] sm:$0xff]  ;;  %v6515_v15 = vld [vmem:[%s10714_s6 + $0x218] sm:$0xff] }
 0x24a   : > { %4426 = vmatprep.mubr.f32.mxu1 %v10767_v44  ;;  %4718 = vmatprep.mubr.f32.mxu0 %v10767_v44  ;;  %v9531_v54 = vadd.f32 %v2492_v4, %v2258_v62  ;;  %v2673_v56 = vpop.f32.mrf.mxu1 }
 0x24b   : > { %4977 = vmatpush1.msra.mxu1 %v4894_v7  ;;  %v2494_v12 = vpop.f32.mrf.mxu0  ;;  %v2767_v21 = vadd.f32 %v2673_v56, %v9264_v24  ;;  %v6514_v24 = vld [vmem:[%s10714_s6 + $0x210] sm:$0xff]  ;;  %v5190_v7 = vsel %vm2552_vm7, %v10963_v51, %v10961_v60  ;;  %v10970_v60 = vld [vmem:[#allocation86_spill] sm:$0xff] }
 0x24c   : > { %4978 = vmatprep.subr.mxu1 %v4893_v1  ;;  %v9540_v47 = vadd.f32 %v2494_v12, %v2259_v61  ;;  %v2677_v63 = vpop.f32.mrf.mxu1  ;;  %v10965_v1 = vld [vmem:[#allocation60_spill] sm:$0xff] }
 0x24d   : > { %6529 = vmatmul.mubr.msk.f32.gmra.mxu1 %vm3091_vm9, %v6513_v29  ;;  %6560 = vmatmul.mubr.msk.f32.vlgmr.msra.gmra.mxu0 %vm3091_vm9, %v6544_v38  ;;  %v2768_v28 = vadd.f32 %v2677_v63, %v9283_v19  ;;  %v2940_v62 = vpop.f32.mrf.mxu0  ;;  %v10962_v19 = vld [vmem:[#allocation59_spill] sm:$0xff]  ;;  %v4889_v4 = vsel %vm2283_vm6, %v10965_v1, %v10964_v23  ;;  %v10967_v29 = vld [vmem:[#allocation76_spill] sm:$0xff] }
 0x24e   : > { %4432 = vmatprep.mubr.f32.mxu1 %v10767_v44  ;;  %4724 = vmatprep.mubr.f32.mxu0 %v10767_v44  ;;  %v9559_v10 = vadd.f32 %v2940_v62, %v2766_v31  ;;  %v2679_v52 = vpop.f32.mrf.mxu1  ;;  %v4890_v35 = vsel %vm2283_vm6, %v10962_v19, %v10959_v34  ;;  %v10966_v31 = vld [vmem:[#allocation77_spill] sm:$0xff]  ;;  %v6516_v19 = vld [vmem:[%s10714_s6 + $0x220] sm:$0xff] }
 0x24f   : > { %4979 = vmatpush1.msra.mxu1 %v4892_v32  ;;  %5275 = vmatpush1.msra.mxu0 %v5192_v9  ;;  %v2769_v61 = vadd.f32 %v2679_v52, %v9292_v39  ;;  %v2942_v30 = vpop.f32.mrf.mxu0  ;;  %v5189_v38 = vsel %vm2552_vm7, %v10967_v29, %v10966_v31  ;;  %v6546_v32 = vld [vmem:[%s10714_s6 + $0x290] sm:$0xff]  ;;  %v10972_v62 = vld [vmem:[#allocation73_spill] sm:$0xff] }
 0x250   : > { %4980 = vmatprep.subr.mxu1 %v4891_v55  ;;  %5276 = vmatprep.subr.mxu0 %v5191_v42  ;;  %v9568_v18 = vadd.f32 %v2942_v30, %v2767_v21  ;;  %v2683_v37 = vpop.f32.mrf.mxu1  ;;  %v10969_v21 = vld [vmem:[#allocation80_spill] sm:$0xff]  ;;  %v10971_v42 = vld [vmem:[#allocation83_spill] sm:$0xff] }
 0x251   : > { %6530 = vmatmul.mubr.msk.f32.gmra.mxu1 %vm3091_vm9, %v6514_v24  ;;  %6561 = vmatmul.mubr.msk.f32.gmra.mxu0 %vm3091_vm9, %v6545_v3  ;;  %v2770_v39 = vadd.f32 %v2683_v37, %v9311_v41  ;;  %v2946_v56 = vpop.f32.mrf.mxu0  ;;  %v10968_v41 = vld [vmem:[#allocation63_spill] sm:$0xff]  ;;  %v5188_v63 = vsel %vm2552_vm7, %v10969_v21, %v10967_v29  ;;  %v10973_v24 = vld [vmem:[#allocation72_spill] sm:$0xff]  ;;  %v6548_v29 = vld [vmem:[%s10714_s6 + $0x2a0] sm:$0xff] }
 0x252   : > { %4438 = vmatprep.mubr.f32.mxu1 %v10767_v44  ;;  %4730 = vmatprep.mubr.f32.mxu0 %v10767_v44  ;;  %v9587_v8 = vadd.f32 %v2946_v56, %v2768_v28  ;;  %v2685_v9 = vpop.f32.mrf.mxu1  ;;  %v4888_v12 = vsel %vm2283_vm6, %v10968_v41, %v10965_v1  ;;  %v5187_v28 = vsel %vm2552_vm7, %v10971_v42, %v10970_v60 }
 0x253   : > { %4981 = vmatpush1.msra.mxu1 %v4890_v35  ;;  %5277 = vmatpush1.msra.mxu0 %v5190_v7  ;;  %v2771_v26 = vadd.f32 %v2685_v9, %v9317_v58  ;;  %v2948_v34 = vpop.f32.mrf.mxu0  ;;  %v5491_v3 = vsel %vm2821_vm8, %v10973_v24, %v10972_v62  ;;  %v6547_v35 = vld [vmem:[%s10714_s6 + $0x298] sm:$0xff] }
 0x254   : > { %4982 = vmatprep.subr.mxu1 %v4889_v4  ;;  %5278 = vmatprep.subr.mxu0 %v5189_v38  ;;  %v9596_v55 = vadd.f32 %v2948_v34, %v2769_v61  ;;  %v2689_v48 = vpop.f32.mrf.mxu1 }
 0x255   : > { %6531 = vmatmul.mubr.msk.f32.gmra.mxu1 %vm3091_vm9, %v6515_v15  ;;  %6562 = vmatmul.mubr.msk.f32.gmra.mxu0 %vm3091_vm9, %v6546_v32  ;;  %v2772_v58 = vadd.f32 %v2689_v48, %v9333_v11  ;;  %v2952_v52 = vpop.f32.mrf.mxu0  ;;  %v10974_v11 = vld [vmem:[#allocation94_spill] sm:$0xff] }
 0x256   : > { %4444 = vmatprep.mubr.f32.mxu1 %v10767_v44  ;;  %4736 = vmatprep.mubr.f32.mxu0 %v10767_v44  ;;  %v9615_v51 = vadd.f32 %v2952_v52, %v2770_v39  ;;  %v2691_v7 = vpop.f32.mrf.mxu1  ;;  %v5186_v61 = vsel %vm2552_vm7, %v10974_v11, %v10971_v42  ;;  %v6520_v11 = vld [vmem:[%s10714_s6 + $0x240] sm:$0xff] }
 0x257   : > { %4983 = vmatpush1.msra.mxu1 %v4888_v12  ;;  %5279 = vmatpush1.msra.mxu0 %v5188_v63  ;;  %v2773_v30 = vadd.f32 %v2691_v7, %v9336_v45  ;;  %v2954_v37 = vpop.f32.mrf.mxu0  ;;  %v6517_v45 = vld [vmem:[%s10714_s6 + $0x228] sm:$0xff]  ;;  %v6518_v12 = vld [vmem:[%s10714_s6 + $0x230] sm:$0xff] }
 0x258   : > { %5280 = vmatprep.subr.mxu0 %v5187_v28  ;;  %5572 = vmatprep.subr.mxu1 %v5491_v3  ;;  %v9621_v23 = vadd.f32 %v2954_v37, %v2771_v26  ;;  %v2695_v1 = vpop.f32.mrf.mxu1  ;;  %v6519_v28 = vld [vmem:[%s10714_s6 + $0x238] sm:$0xff] }
 0x259   : > { %6532 = vmatmul.mubr.msk.f32.gmra.mxu1 %vm3091_vm9, %v6516_v19  ;;  %6563 = vmatmul.mubr.msk.f32.gmra.mxu0 %vm3091_vm9, %v6547_v35  ;;  %v2774_v4 = vadd.f32 %v2695_v1, %v9349_v59  ;;  %v2958_v31 = vpop.f32.mrf.mxu0 }
 0x25a   : > { %4450 = vmatprep.mubr.f32.mxu1 %v10767_v44  ;;  %4742 = vmatprep.mubr.f32.mxu0 %v10767_v44  ;;  %v9634_v38 = vadd.f32 %v2958_v31, %v2772_v58  ;;  %v2697_v39 = vpop.f32.mrf.mxu1 }
 0x25b   : > { %5281 = vmatpush1.msra.mxu0 %v5186_v61  ;;  %v2775_v56 = vadd.f32 %v2697_v39, %v9352_v50  ;;  %v2960_v59 = vpop.f32.mrf.mxu0  ;;  %v6549_v50 = vld [vmem:[%s10714_s6 + $0x2a8] sm:$0xff] }
 0x25c   : > { %v9637_v15 = vadd.f32 %v2960_v59, %v2773_v30  ;;  %v2701_v32 = vpop.f32.mrf.mxu1 }
 0x25d   : > { %6533 = vmatmul.mubr.msk.f32.gmra.mxu1 %vm3091_vm9, %v6517_v45  ;;  %6564 = vmatmul.mubr.msk.f32.gmra.mxu0 %vm3091_vm9, %v6548_v29  ;;  %v2776_v9 = vadd.f32 %v2701_v32, %v9365_v33  ;;  %v2964_v41 = vpop.f32.mrf.mxu0  ;;  %v6521_v29 = vld [vmem:[%s10714_s6 + $0x248] sm:$0xff] }
 0x25e   : > { %4456 = vmatprep.mubr.f32.mxu1 %v10767_v44  ;;  %4748 = vmatprep.mubr.f32.mxu0 %v10767_v44  ;;  %v9650_v21 = vadd.f32 %v2964_v41, %v2774_v4  ;;  %v2703_v63 = vpop.f32.mrf.mxu1 }
 0x25f   : > { %v2777_v26 = vadd.f32 %v2703_v63, %v9368_v13  ;;  %v2966_v34 = vpop.f32.mrf.mxu0  ;;  %v6550_v13 = vld [vmem:[%s10714_s6 + $0x2b0] sm:$0xff] }
 0x260   : > { %v9653_v33 = vadd.f32 %v2966_v34, %v2775_v56  ;;  %v2707_v48 = vpop.f32.mrf.mxu1 }
 0x261   : > { %6534 = vmatmul.mubr.msk.f32.gmra.mxu1 %vm3091_vm9, %v6518_v12  ;;  %6565 = vmatmul.mubr.msk.f32.gmra.mxu0 %vm3091_vm9, %v6549_v50  ;;  %v2778_v60 = vadd.f32 %v2707_v48, %v9381_v27  ;;  %v2970_v42 = vpop.f32.mrf.mxu0  ;;  %v6522_v50 = vld [vmem:[%s10714_s6 + $0x250] sm:$0xff] }
 0x262   : > { %4462 = vmatprep.mubr.f32.mxu1 %v10767_v44  ;;  %4754 = vmatprep.mubr.f32.mxu0 %v10767_v44  ;;  %v9666_v62 = vadd.f32 %v2970_v42, %v2776_v9  ;;  %v2709_v3 = vpop.f32.mrf.mxu1 }
 0x263   : > { %v2779_v58 = vadd.f32 %v2709_v3, %v9384_v49  ;;  %v2972_v52 = vpop.f32.mrf.mxu0  ;;  %v6551_v49 = vld [vmem:[%s10714_s6 + $0x2b8] sm:$0xff] }
 0x264   : > { %v9669_v27 = vadd.f32 %v2972_v52, %v2777_v26  ;;  %v2713_v19 = vpop.f32.mrf.mxu1 }
 0x265   : > { %6535 = vmatmul.mubr.msk.f32.gmra.mxu1 %vm3091_vm9, %v6519_v28  ;;  %6566 = vmatmul.mubr.msk.f32.gmra.mxu0 %vm3091_vm9, %v6550_v13  ;;  %v2780_v35 = vadd.f32 %v2713_v19, %v9397_v25  ;;  %v2976_v7 = vpop.f32.mrf.mxu0  ;;  %v6523_v13 = vld [vmem:[%s10714_s6 + $0x258] sm:$0xff] }
 0x266   : > { %4468 = vmatprep.mubr.f32.mxu1 %v10767_v44  ;;  %4760 = vmatprep.mubr.f32.mxu0 %v10767_v44  ;;  %v9682_v61 = vadd.f32 %v2976_v7, %v2778_v60  ;;  %v2715_v30 = vpop.f32.mrf.mxu1 }
 0x267   : > { %v2781_v37 = vadd.f32 %v2715_v30, %v9400_v36  ;;  %v2978_v1 = vpop.f32.mrf.mxu0  ;;  %v6552_v36 = vld [vmem:[%s10714_s6 + $0x2c0] sm:$0xff] }
 0x268   : > { %v9685_v25 = vadd.f32 %v2978_v1, %v2779_v58  ;;  %v2719_v4 = vpop.f32.mrf.mxu1 }
 0x269   : > { %6536 = vmatmul.mubr.msk.f32.gmra.mxu1 %vm3091_vm9, %v6520_v11  ;;  %6567 = vmatmul.mubr.msk.f32.gmra.mxu0 %vm3091_vm9, %v6551_v49  ;;  %v2782_v31 = vadd.f32 %v2719_v4, %v9413_v22  ;;  %v2982_v45 = vpop.f32.mrf.mxu0  ;;  %v6524_v49 = vld [vmem:[%s10714_s6 + $0x260] sm:$0xff] }
 0x26a   : > { %4474 = vmatprep.mubr.f32.mxu1 %v10767_v44  ;;  %4766 = vmatprep.mubr.f32.mxu0 %v10767_v44  ;;  %v9698_v39 = vadd.f32 %v2982_v45, %v2780_v35  ;;  %v2721_v56 = vpop.f32.mrf.mxu1 }
 0x26b   : > { %v2783_v59 = vadd.f32 %v2721_v56, %v9416_v2  ;;  %v2984_v32 = vpop.f32.mrf.mxu0  ;;  %v6553_v2 = vld [vmem:[%s10714_s6 + $0x2c8] sm:$0xff] }
 0x26c   : > { %v9701_v22 = vadd.f32 %v2984_v32, %v2781_v37  ;;  %v2725_v9 = vpop.f32.mrf.mxu1 }
 0x26d   : > { %6537 = vmatmul.mubr.msk.f32.gmra.mxu1 %vm3091_vm9, %v6521_v29  ;;  %6568 = vmatmul.mubr.msk.f32.gmra.mxu0 %vm3091_vm9, %v6552_v36  ;;  %v2784_v41 = vadd.f32 %v2725_v9, %v9429_v6  ;;  %v2988_v12 = vpop.f32.mrf.mxu0  ;;  %v6525_v36 = vld [vmem:[%s10714_s6 + $0x268] sm:$0xff] }
 0x26e   : > { %4480 = vmatprep.mubr.f32.mxu1 %v10767_v44  ;;  %4772 = vmatprep.mubr.f32.mxu0 %v10767_v44  ;;  %v9714_v63 = vadd.f32 %v2988_v12, %v2782_v31  ;;  %v2727_v26 = vpop.f32.mrf.mxu1 }
 0x26f   : > { %v2785_v34 = vadd.f32 %v2727_v26, %v9432_v5  ;;  %v2990_v48 = vpop.f32.mrf.mxu0  ;;  %v6554_v5 = vld [vmem:[%s10714_s6 + $0x2d0] sm:$0xff] }
 0x270   : > { %v9717_v6 = vadd.f32 %v2990_v48, %v2783_v59  ;;  %v2731_v60 = vpop.f32.mrf.mxu1 }
 0x271   : > { %6538 = vmatmul.mubr.msk.f32.gmra.mxu1 %vm3091_vm9, %v6522_v50  ;;  %6569 = vmatmul.mubr.msk.f32.gmra.mxu0 %vm3091_vm9, %v6553_v2  ;;  %v2786_v42 = vadd.f32 %v2731_v60, %v9445_v20  ;;  %v2994_v28 = vpop.f32.mrf.mxu0  ;;  %v6526_v2 = vld [vmem:[%s10714_s6 + $0x270] sm:$0xff] }
 0x272   : > { %4486 = vmatprep.mubr.f32.mxu1 %v10767_v44  ;;  %4778 = vmatprep.mubr.f32.mxu0 %v10767_v44  ;;  %v9730_v3 = vadd.f32 %v2994_v28, %v2784_v41  ;;  %v2733_v58 = vpop.f32.mrf.mxu1 }
 0x273   : > { %v2787_v52 = vadd.f32 %v2733_v58, %v9448_v40  ;;  %v2996_v19 = vpop.f32.mrf.mxu0  ;;  %v6555_v40 = vld [vmem:[%s10714_s6 + $0x2d8] sm:$0xff] }
 0x274   : > { %v9733_v20 = vadd.f32 %v2996_v19, %v2785_v34  ;;  %v2737_v35 = vpop.f32.mrf.mxu1 }
 0x275   : > { %6539 = vmatmul.mubr.msk.f32.gmra.mxu1 %vm3091_vm9, %v6523_v13  ;;  %6570 = vmatmul.mubr.msk.f32.gmra.mxu0 %vm3091_vm9, %v6554_v5  ;;  %v2788_v7 = vadd.f32 %v2737_v35, %v9461_v0  ;;  %v3000_v11 = vpop.f32.mrf.mxu0  ;;  %v6527_v5 = vld [vmem:[%s10714_s6 + $0x278] sm:$0xff] }
 0x276   : > { %4492 = vmatprep.mubr.f32.mxu1 %v10767_v44  ;;  %4784 = vmatprep.mubr.f32.mxu0 %v10767_v44  ;;  %v9746_v30 = vadd.f32 %v3000_v11, %v2786_v42  ;;  %v2739_v37 = vpop.f32.mrf.mxu1 }
 0x277   : > { %v2789_v1 = vadd.f32 %v2739_v37, %v9464_v17  ;;  %v3002_v4 = vpop.f32.mrf.mxu0  ;;  %v6556_v17 = vld [vmem:[%s10714_s6 + $0x2e0] sm:$0xff] }
 0x278   : > { %v9749_v0 = vadd.f32 %v3002_v4, %v2787_v52  ;;  %v2743_v31 = vpop.f32.mrf.mxu1  ;;  %v10975_v4 = vld [vmem:[#allocation75_spill] sm:$0xff] }
 0x279   : > { %6540 = vmatmul.mubr.msk.f32.gmra.mxu1 %vm3091_vm9, %v6524_v49  ;;  %6571 = vmatmul.mubr.msk.f32.gmra.mxu0 %vm3091_vm9, %v6555_v40  ;;  %v2790_v45 = vadd.f32 %v2743_v31, %v9477_v53  ;;  %v3006_v29 = vpop.f32.mrf.mxu0  ;;  %v6559_v40 = vld [vmem:[%s10714_s6 + $0x2f8] sm:$0xff] }
 0x27a   : > { %4498 = vmatprep.mubr.f32.mxu1 %v10767_v44  ;;  %4790 = vmatprep.mubr.f32.mxu0 %v10767_v44  ;;  %v9762_v56 = vadd.f32 %v3006_v29, %v2788_v7  ;;  %v2745_v59 = vpop.f32.mrf.mxu1 }
 0x27b   : > { %v2791_v32 = vadd.f32 %v2745_v59, %v9480_v14  ;;  %v3008_v9 = vpop.f32.mrf.mxu0  ;;  %v6557_v14 = vld [vmem:[%s10714_s6 + $0x2e8] sm:$0xff]  ;;  %v10977_v59 = vld [vmem:[#allocation78_spill] sm:$0xff] }
 0x27c   : > { %v9765_v53 = vadd.f32 %v3008_v9, %v2789_v1  ;;  %v2749_v41 = vpop.f32.mrf.mxu1 }
 0x27d   : > { %6541 = vmatmul.mubr.msk.f32.gmra.mxu1 %vm3091_vm9, %v6525_v36  ;;  %6572 = vmatmul.mubr.msk.f32.gmra.mxu0 %vm3091_vm9, %v6556_v17  ;;  %v2792_v12 = vadd.f32 %v2749_v41, %v9493_v57  ;;  %v3012_v50 = vpop.f32.mrf.mxu0  ;;  %v10976_v17 = vld [vmem:[#allocation79_spill] sm:$0xff] }
 0x27e   : > { %4504 = vmatprep.mubr.f32.mxu1 %v10767_v44  ;;  %4796 = vmatprep.mubr.f32.mxu0 %v10767_v44  ;;  %v9778_v26 = vadd.f32 %v3012_v50, %v2790_v45  ;;  %v2751_v34 = vpop.f32.mrf.mxu1 }
 0x27f   : > { %v2793_v48 = vadd.f32 %v2751_v34, %v9496_v16  ;;  %v3014_v60 = vpop.f32.mrf.mxu0  ;;  %v6558_v16 = vld [vmem:[%s10714_s6 + $0x2f0] sm:$0xff] }
 0x280   : > { %v9781_v57 = vadd.f32 %v3014_v60, %v2791_v32  ;;  %v2755_v42 = vpop.f32.mrf.mxu1  ;;  %v5489_v32 = vsel %vm2821_vm8, %v10977_v59, %v10976_v17 }
 0x281   : > { %6542 = vmatmul.mubr.msk.f32.gmra.mxu1 %vm3091_vm9, %v6526_v2  ;;  %6573 = vmatmul.mubr.msk.f32.gmra.mxu0 %vm3091_vm9, %v6557_v14  ;;  %v2794_v28 = vadd.f32 %v2755_v42, %v9509_v46  ;;  %v3018_v13 = vpop.f32.mrf.mxu0  ;;  %v10978_v2 = vld [vmem:[#allocation82_spill] sm:$0xff]  ;;  %v10979_v42 = vld [vmem:[#allocation93_spill] sm:$0xff] }
 0x282   : > { %4510 = vmatprep.mubr.f32.mxu1 %v10767_v44  ;;  %4802 = vmatprep.mubr.f32.mxu0 %v10767_v44  ;;  %v9794_v58 = vadd.f32 %v3018_v13, %v2792_v12  ;;  %v2757_v52 = vpop.f32.mrf.mxu1 }
 0x283   : > { %v2795_v19 = vadd.f32 %v2757_v52, %v9515_v43  ;;  %v3020_v35 = vpop.f32.mrf.mxu0  ;;  %v6576_v43 = vld [vmem:[%s10714_s6 + $0x300] sm:$0xff]  ;;  %v6609_v52 = vld [vmem:[%s10714_s6 + $0x388] sm:$0xff] }
 0x284   : > { %v9797_v46 = vadd.f32 %v3020_v35, %v2793_v48  ;;  %v2761_v7 = vpop.f32.mrf.mxu1 }
 0x285   : > { %6543 = vmatmul.mubr.msk.f32.gmra.mxu1 %vm3091_vm9, %v6527_v5  ;;  %6574 = vmatmul.mubr.msk.f32.gmra.mxu0 %vm3091_vm9, %v6558_v16  ;;  %v2796_v11 = vadd.f32 %v2761_v7, %v9531_v54  ;;  %v3024_v49 = vpop.f32.mrf.mxu0  ;;  %v5490_v54 = vsel %vm2821_vm8, %v10975_v4, %v10973_v24  ;;  %v6608_v24 = vld [vmem:[%s10714_s6 + $0x380] sm:$0xff]  ;;  %v10981_v7 = vld [vmem:[#allocation101_spill] sm:$0xff] }
 0x286   : > { %4808 = vmatprep.mubr.f32.mxu0 %v10767_v44  ;;  %5016 = vmatprep.mubr.f32.mxu1 %v10767_v44  ;;  %v9810_v37 = vadd.f32 %v3024_v49, %v2794_v28  ;;  %v2763_v1 = vpop.f32.mrf.mxu1  ;;  %v10980_v28 = vld [vmem:[#allocation87_spill] sm:$0xff]  ;;  %v10983_v4 = vld [vmem:[#allocation102_spill] sm:$0xff] }
 0x287   : > { %v2797_v31 = vadd.f32 %v2763_v1, %v9540_v47  ;;  %v3026_v45 = vpop.f32.mrf.mxu0  ;;  %v6577_v47 = vld [vmem:[%s10714_s6 + $0x308] sm:$0xff]  ;;  %v5487_v13 = vsel %vm2821_vm8, %v10980_v28, %v10979_v42  ;;  %v10982_v1 = vld [vmem:[#allocation109_spill] sm:$0xff] }
 0x288   : > { %v9816_v29 = vadd.f32 %v3026_v45, %v2795_v19  ;;  %v3206_v36 = vpop.f32.mrf.mxu1 }
 0x289   : > { %6575 = vmatmul.mubr.msk.f32.gmra.mxu0 %vm3091_vm9, %v6559_v40  ;;  %6592 = vmatmul.mubr.msk.f32.vlgmr.msra.gmra.mxu1 %vm3091_vm9, %v6576_v43  ;;  %v3030_v9 = vpop.f32.mrf.mxu0  ;;  %v3301_v41 = vadd.f32 %v3206_v36, %v9559_v10  ;;  %v5488_v10 = vsel %vm2821_vm8, %v10978_v2, %v10977_v59  ;;  %v6610_v36 = vld [vmem:[%s10714_s6 + $0x390] sm:$0xff] }
 0x28a   : > { %5022 = vmatprep.mubr.f32.mxu1 %v10767_v44  ;;  %5314 = vmatprep.mubr.f32.mxu0 %v10767_v44  ;;  %v9832_v12 = vadd.f32 %v3030_v9, %v2796_v11  ;;  %v3208_v50 = vpop.f32.mrf.mxu1 }
 0x28b   : > { %5573 = vmatpush1.msra.mxu1 %v5490_v54  ;;  %v3032_v14 = vpop.f32.mrf.mxu0  ;;  %v3302_v34 = vadd.f32 %v3208_v50, %v9568_v18  ;;  %v6578_v18 = vld [vmem:[%s10714_s6 + $0x310] sm:$0xff]  ;;  %v5485_v54 = vsel %vm2821_vm8, %v10983_v4, %v10982_v1 }
 0x28c   : > { %5574 = vmatprep.subr.mxu1 %v5489_v32  ;;  %v9838_v48 = vadd.f32 %v3032_v14, %v2797_v31  ;;  %v3212_v60 = vpop.f32.mrf.mxu1  ;;  %v10984_v32 = vld [vmem:[#allocation110_spill] sm:$0xff] }
 0x28d   : > { %6593 = vmatmul.mubr.msk.f32.gmra.mxu1 %vm3091_vm9, %v6577_v47  ;;  %6624 = vmatmul.mubr.msk.f32.vlgmr.msra.gmra.mxu0 %vm3091_vm9, %v6608_v24  ;;  %v3303_v5 = vadd.f32 %v3212_v60, %v9587_v8  ;;  %v3528_v16 = vpop.f32.mrf.mxu0  ;;  %v5486_v8 = vsel %vm2821_vm8, %v10981_v7, %v10980_v28 }
 0x28e   : > { %5028 = vmatprep.mubr.f32.mxu1 %v10767_v44  ;;  %5320 = vmatprep.mubr.f32.mxu0 %v10767_v44  ;;  %v9854_v19 = vadd.f32 %v3528_v16, %v3301_v41  ;;  %v3214_v35 = vpop.f32.mrf.mxu1  ;;  %v6581_v16 = vld [vmem:[%s10714_s6 + $0x328] sm:$0xff] }
 0x28f   : > { %5575 = vmatpush1.msra.mxu1 %v5488_v10  ;;  %v3304_v11 = vadd.f32 %v3214_v35, %v9596_v55  ;;  %v3530_v49 = vpop.f32.mrf.mxu0  ;;  %v6579_v55 = vld [vmem:[%s10714_s6 + $0x318] sm:$0xff] }
 0x290   : > { %5576 = vmatprep.subr.mxu1 %v5487_v13  ;;  %v9860_v40 = vadd.f32 %v3530_v49, %v3302_v34  ;;  %v6611_v10 = vld [vmem:[%s10714_s6 + $0x398] sm:$0xff] }
 0x291   : > { %v3218_v43 = vpop.f32.mrf.mxu1  ;;  %6594 = vmatmul.mubr.msk.f32.gmra.mxu1 %vm3091_vm9, %v6578_v18  ;;  %6625 = vmatmul.mubr.msk.f32.gmra.mxu0 %vm3091_vm9, %v6609_v52  ;;  %v3534_v45 = vpop.f32.mrf.mxu0 }
 0x292   : > { %v3305_v31 = vadd.f32 %v3218_v43, %v9615_v51  ;;  %5034 = vmatprep.mubr.f32.mxu1 %v10767_v44  ;;  %5326 = vmatprep.mubr.f32.mxu0 %v10767_v44  ;;  %v9876_v17 = vadd.f32 %v3534_v45, %v3303_v5  ;;  %v5484_v51 = vsel %vm2821_vm8, %v10984_v32, %v10983_v4  ;;  %v6582_v43 = vld [vmem:[%s10714_s6 + $0x330] sm:$0xff] }
 0x293   : > { %v3220_v59 = vpop.f32.mrf.mxu1  ;;  %5577 = vmatpush1.msra.mxu1 %v5486_v8  ;;  %v3536_v41 = vpop.f32.mrf.mxu0 }
 0x294   : > { %v3306_v9 = vadd.f32 %v3220_v59, %v9621_v23  ;;  %5578 = vmatprep.subr.mxu1 %v5485_v54  ;;  %v9882_v47 = vadd.f32 %v3536_v41, %v3304_v11  ;;  %v6580_v23 = vld [vmem:[%s10714_s6 + $0x320] sm:$0xff]  ;;  %v6583_v59 = vld [vmem:[%s10714_s6 + $0x338] sm:$0xff] }
 0x295   : > { %v3224_v24 = vpop.f32.mrf.mxu1  ;;  %6595 = vmatmul.mubr.msk.f32.gmra.mxu1 %vm3091_vm9, %v6579_v55  ;;  %6626 = vmatmul.mubr.msk.f32.gmra.mxu0 %vm3091_vm9, %v6610_v36  ;;  %v3540_v2 = vpop.f32.mrf.mxu0 }
 0x296   : > { %v3307_v50 = vadd.f32 %v3224_v24, %v9634_v38  ;;  %5040 = vmatprep.mubr.f32.mxu1 %v10767_v44  ;;  %5332 = vmatprep.mubr.f32.mxu0 %v10767_v44  ;;  %v9895_v14 = vadd.f32 %v3540_v2, %v3305_v31 }
 0x297   : > { %v3226_v34 = vpop.f32.mrf.mxu1  ;;  %5579 = vmatpush1.msra.mxu1 %v5484_v51  ;;  %v3542_v38 = vpop.f32.mrf.mxu0 }
 0x298   : > { %v3308_v60 = vadd.f32 %v3226_v34, %v9637_v15  ;;  %v9898_v42 = vadd.f32 %v3542_v38, %v3306_v9  ;;  %v6612_v15 = vld [vmem:[%s10714_s6 + $0x3a0] sm:$0xff] }
 0x299   : > { %v3230_v28 = vpop.f32.mrf.mxu1  ;;  %6596 = vmatmul.mubr.msk.f32.gmra.mxu1 %vm3091_vm9, %v6580_v23  ;;  %6627 = vmatmul.mubr.msk.f32.gmra.mxu0 %vm3091_vm9, %v6611_v10  ;;  %v3546_v5 = vpop.f32.mrf.mxu0  ;;  %v6584_v23 = vld [vmem:[%s10714_s6 + $0x340] sm:$0xff] }
 0x29a   : > { %v3309_v13 = vadd.f32 %v3230_v28, %v9650_v21  ;;  %5046 = vmatprep.mubr.f32.mxu1 %v10767_v44  ;;  %5338 = vmatprep.mubr.f32.mxu0 %v10767_v44  ;;  %v9911_v18 = vadd.f32 %v3546_v5, %v3307_v50 }
 0x29b   : > { %v3232_v52 = vpop.f32.mrf.mxu1  ;;  %v3548_v7 = vpop.f32.mrf.mxu0 }
 0x29c   : > { %v3310_v35 = vadd.f32 %v3232_v52, %v9653_v33  ;;  %v9914_v21 = vadd.f32 %v3548_v7, %v3308_v60  ;;  %v6613_v33 = vld [vmem:[%s10714_s6 + $0x3a8] sm:$0xff] }
 0x29d   : > { %v3236_v8 = vpop.f32.mrf.mxu1  ;;  %6597 = vmatmul.mubr.msk.f32.gmra.mxu1 %vm3091_vm9, %v6581_v16  ;;  %6628 = vmatmul.mubr.msk.f32.gmra.mxu0 %vm3091_vm9, %v6612_v15  ;;  %v3552_v49 = vpop.f32.mrf.mxu0  ;;  %v6585_v16 = vld [vmem:[%s10714_s6 + $0x348] sm:$0xff] }
 0x29e   : > { %v3311_v11 = vadd.f32 %v3236_v8, %v9666_v62  ;;  %5052 = vmatprep.mubr.f32.mxu1 %v10767_v44  ;;  %5344 = vmatprep.mubr.f32.mxu0 %v10767_v44  ;;  %v9927_v1 = vadd.f32 %v3552_v49, %v3309_v13 }
 0x29f   : > { %v3238_v4 = vpop.f32.mrf.mxu1  ;;  %v3554_v31 = vpop.f32.mrf.mxu0 }
 0x2a0   : > { %v3312_v54 = vadd.f32 %v3238_v4, %v9669_v27  ;;  %v9930_v62 = vadd.f32 %v3554_v31, %v3310_v35  ;;  %v6614_v27 = vld [vmem:[%s10714_s6 + $0x3b0] sm:$0xff] }
 0x2a1   : > { %v3242_v45 = vpop.f32.mrf.mxu1  ;;  %6598 = vmatmul.mubr.msk.f32.gmra.mxu1 %vm3091_vm9, %v6582_v43  ;;  %6629 = vmatmul.mubr.msk.f32.gmra.mxu0 %vm3091_vm9, %v6613_v33  ;;  %v3558_v36 = vpop.f32.mrf.mxu0  ;;  %v6586_v43 = vld [vmem:[%s10714_s6 + $0x350] sm:$0xff] }
 0x2a2   : > { %v3313_v55 = vadd.f32 %v3242_v45, %v9682_v61  ;;  %5058 = vmatprep.mubr.f32.mxu1 %v10767_v44  ;;  %5350 = vmatprep.mubr.f32.mxu0 %v10767_v44  ;;  %v9943_v32 = vadd.f32 %v3558_v36, %v3311_v11 }
 0x2a3   : > { %v3244_v51 = vpop.f32.mrf.mxu1  ;;  %v3560_v41 = vpop.f32.mrf.mxu0 }
 0x2a4   : > { %v3314_v9 = vadd.f32 %v3244_v51, %v9685_v25  ;;  %v9946_v61 = vadd.f32 %v3560_v41, %v3312_v54  ;;  %v6615_v25 = vld [vmem:[%s10714_s6 + $0x3b8] sm:$0xff] }
 0x2a5   : > { %v3248_v24 = vpop.f32.mrf.mxu1  ;;  %6599 = vmatmul.mubr.msk.f32.gmra.mxu1 %vm3091_vm9, %v6583_v59  ;;  %6630 = vmatmul.mubr.msk.f32.gmra.mxu0 %vm3091_vm9, %v6614_v27  ;;  %v3564_v2 = vpop.f32.mrf.mxu0  ;;  %v6587_v59 = vld [vmem:[%s10714_s6 + $0x358] sm:$0xff] }
 0x2a6   : > { %v3315_v50 = vadd.f32 %v3248_v24, %v9698_v39  ;;  %5064 = vmatprep.mubr.f32.mxu1 %v10767_v44  ;;  %5356 = vmatprep.mubr.f32.mxu0 %v10767_v44  ;;  %v9959_v10 = vadd.f32 %v3564_v2, %v3313_v55 }
 0x2a7   : > { %v3250_v34 = vpop.f32.mrf.mxu1  ;;  %v3566_v38 = vpop.f32.mrf.mxu0 }
 0x2a8   : > { %v3316_v60 = vadd.f32 %v3250_v34, %v9701_v22  ;;  %v9962_v39 = vadd.f32 %v3566_v38, %v3314_v9  ;;  %v6616_v22 = vld [vmem:[%s10714_s6 + $0x3c0] sm:$0xff] }
 0x2a9   : > { %v3254_v28 = vpop.f32.mrf.mxu1  ;;  %6600 = vmatmul.mubr.msk.f32.gmra.mxu1 %vm3091_vm9, %v6584_v23  ;;  %6631 = vmatmul.mubr.msk.f32.gmra.mxu0 %vm3091_vm9, %v6615_v25  ;;  %v3570_v5 = vpop.f32.mrf.mxu0  ;;  %v6588_v23 = vld [vmem:[%s10714_s6 + $0x360] sm:$0xff] }
 0x2aa   : > { %v3317_v13 = vadd.f32 %v3254_v28, %v9714_v63  ;;  %5070 = vmatprep.mubr.f32.mxu1 %v10767_v44  ;;  %5362 = vmatprep.mubr.f32.mxu0 %v10767_v44  ;;  %v9975_v15 = vadd.f32 %v3570_v5, %v3315_v50 }
 0x2ab   : > { %v3256_v52 = vpop.f32.mrf.mxu1  ;;  %v3572_v7 = vpop.f32.mrf.mxu0 }
 0x2ac   : > { %v3318_v35 = vadd.f32 %v3256_v52, %v9717_v6  ;;  %v9978_v63 = vadd.f32 %v3572_v7, %v3316_v60  ;;  %v6617_v6 = vld [vmem:[%s10714_s6 + $0x3c8] sm:$0xff] }
 0x2ad   : > { %v3260_v8 = vpop.f32.mrf.mxu1  ;;  %6601 = vmatmul.mubr.msk.f32.gmra.mxu1 %vm3091_vm9, %v6585_v16  ;;  %6632 = vmatmul.mubr.msk.f32.gmra.mxu0 %vm3091_vm9, %v6616_v22  ;;  %v3576_v49 = vpop.f32.mrf.mxu0  ;;  %v6589_v16 = vld [vmem:[%s10714_s6 + $0x368] sm:$0xff] }
 0x2ae   : > { %v3319_v11 = vadd.f32 %v3260_v8, %v9730_v3  ;;  %5076 = vmatprep.mubr.f32.mxu1 %v10767_v44  ;;  %5368 = vmatprep.mubr.f32.mxu0 %v10767_v44  ;;  %v9991_v33 = vadd.f32 %v3576_v49, %v3317_v13 }
 0x2af   : > { %v3262_v4 = vpop.f32.mrf.mxu1  ;;  %v3578_v31 = vpop.f32.mrf.mxu0 }
 0x2b0   : > { %v3320_v54 = vadd.f32 %v3262_v4, %v9733_v20  ;;  %v9994_v3 = vadd.f32 %v3578_v31, %v3318_v35  ;;  %v6618_v20 = vld [vmem:[%s10714_s6 + $0x3d0] sm:$0xff] }
 0x2b1   : > { %v3266_v45 = vpop.f32.mrf.mxu1  ;;  %6602 = vmatmul.mubr.msk.f32.gmra.mxu1 %vm3091_vm9, %v6586_v43  ;;  %6633 = vmatmul.mubr.msk.f32.gmra.mxu0 %vm3091_vm9, %v6617_v6  ;;  %v3582_v36 = vpop.f32.mrf.mxu0  ;;  %v6590_v43 = vld [vmem:[%s10714_s6 + $0x370] sm:$0xff] }
 0x2b2   : > { %v3321_v55 = vadd.f32 %v3266_v45, %v9746_v30  ;;  %5082 = vmatprep.mubr.f32.mxu1 %v10767_v44  ;;  %5374 = vmatprep.mubr.f32.mxu0 %v10767_v44  ;;  %v10007_v27 = vadd.f32 %v3582_v36, %v3319_v11 }
 0x2b3   : > { %v3268_v51 = vpop.f32.mrf.mxu1  ;;  %v3584_v41 = vpop.f32.mrf.mxu0 }
 0x2b4   : > { %v3322_v9 = vadd.f32 %v3268_v51, %v9749_v0  ;;  %v10010_v30 = vadd.f32 %v3584_v41, %v3320_v54  ;;  %v6619_v0 = vld [vmem:[%s10714_s6 + $0x3d8] sm:$0xff] }
 0x2b5   : > { %v3272_v24 = vpop.f32.mrf.mxu1  ;;  %6603 = vmatmul.mubr.msk.f32.gmra.mxu1 %vm3091_vm9, %v6587_v59  ;;  %6634 = vmatmul.mubr.msk.f32.gmra.mxu0 %vm3091_vm9, %v6618_v20  ;;  %v3588_v2 = vpop.f32.mrf.mxu0  ;;  %v6591_v59 = vld [vmem:[%s10714_s6 + $0x378] sm:$0xff] }
 0x2b6   : > { %v3323_v50 = vadd.f32 %v3272_v24, %v9762_v56  ;;  %5088 = vmatprep.mubr.f32.mxu1 %v10767_v44  ;;  %5380 = vmatprep.mubr.f32.mxu0 %v10767_v44  ;;  %v10023_v25 = vadd.f32 %v3588_v2, %v3321_v55 }
 0x2b7   : > { %v3274_v34 = vpop.f32.mrf.mxu1  ;;  %v3590_v38 = vpop.f32.mrf.mxu0 }
 0x2b8   : > { %v3324_v60 = vadd.f32 %v3274_v34, %v9765_v53  ;;  %v10026_v56 = vadd.f32 %v3590_v38, %v3322_v9  ;;  %v6620_v53 = vld [vmem:[%s10714_s6 + $0x3e0] sm:$0xff] }
 0x2b9   : > { %v3278_v28 = vpop.f32.mrf.mxu1  ;;  %6604 = vmatmul.mubr.msk.f32.gmra.mxu1 %vm3091_vm9, %v6588_v23  ;;  %6635 = vmatmul.mubr.msk.f32.gmra.mxu0 %vm3091_vm9, %v6619_v0  ;;  %v3594_v5 = vpop.f32.mrf.mxu0  ;;  %v6623_v23 = vld [vmem:[%s10714_s6 + $0x3f8] sm:$0xff] }
 0x2ba   : > { %v3325_v13 = vadd.f32 %v3278_v28, %v9778_v26  ;;  %5094 = vmatprep.mubr.f32.mxu1 %v10767_v44  ;;  %5386 = vmatprep.mubr.f32.mxu0 %v10767_v44  ;;  %v10039_v22 = vadd.f32 %v3594_v5, %v3323_v50 }
 0x2bb   : > { %v3280_v52 = vpop.f32.mrf.mxu1  ;;  %v3596_v7 = vpop.f32.mrf.mxu0 }
 0x2bc   : > { %v3326_v35 = vadd.f32 %v3280_v52, %v9781_v57  ;;  %v10042_v26 = vadd.f32 %v3596_v7, %v3324_v60  ;;  %v6621_v57 = vld [vmem:[%s10714_s6 + $0x3e8] sm:$0xff] }
 0x2bd   : > { %v3284_v8 = vpop.f32.mrf.mxu1  ;;  %6605 = vmatmul.mubr.msk.f32.gmra.mxu1 %vm3091_vm9, %v6589_v16  ;;  %6636 = vmatmul.mubr.msk.f32.gmra.mxu0 %vm3091_vm9, %v6620_v53  ;;  %v3600_v49 = vpop.f32.mrf.mxu0  ;;  %v6641_v16 = vld [vmem:[%s10714_s6 + $0x408] sm:$0xff] }
 0x2be   : > { %v3327_v11 = vadd.f32 %v3284_v8, %v9794_v58  ;;  %5100 = vmatprep.mubr.f32.mxu1 %v10767_v44  ;;  %5392 = vmatprep.mubr.f32.mxu0 %v10767_v44  ;;  %v10055_v6 = vadd.f32 %v3600_v49, %v3325_v13  ;;  %v6642_v49 = vld [vmem:[%s10714_s6 + $0x410] sm:$0xff] }
 0x2bf   : > { %v3286_v4 = vpop.f32.mrf.mxu1  ;;  %v3602_v31 = vpop.f32.mrf.mxu0 }
 0x2c0   : > { %v3328_v54 = vadd.f32 %v3286_v4, %v9797_v46  ;;  %v10058_v58 = vadd.f32 %v3602_v31, %v3326_v35  ;;  %v6622_v46 = vld [vmem:[%s10714_s6 + $0x3f0] sm:$0xff] }
 0x2c1   : > { %v3290_v45 = vpop.f32.mrf.mxu1  ;;  %6606 = vmatmul.mubr.msk.f32.gmra.mxu1 %vm3091_vm9, %v6590_v43  ;;  %6637 = vmatmul.mubr.msk.f32.gmra.mxu0 %vm3091_vm9, %v6621_v57  ;;  %v3606_v36 = vpop.f32.mrf.mxu0 }
 0x2c2   : > { %v3329_v55 = vadd.f32 %v3290_v45, %v9810_v37  ;;  %5106 = vmatprep.mubr.f32.mxu1 %v10767_v44  ;;  %5398 = vmatprep.mubr.f32.mxu0 %v10767_v44  ;;  %v10071_v20 = vadd.f32 %v3606_v36, %v3327_v11 }
 0x2c3   : > { %v3292_v51 = vpop.f32.mrf.mxu1  ;;  %v3608_v41 = vpop.f32.mrf.mxu0 }
 0x2c4   : > { %v3330_v9 = vadd.f32 %v3292_v51, %v9816_v29  ;;  %v10074_v37 = vadd.f32 %v3608_v41, %v3328_v54  ;;  %v6640_v29 = vld [vmem:[%s10714_s6 + $0x400] sm:$0xff] }
 0x2c5   : > { %v3296_v24 = vpop.f32.mrf.mxu1  ;;  %6607 = vmatmul.mubr.msk.f32.gmra.mxu1 %vm3091_vm9, %v6591_v59  ;;  %6638 = vmatmul.mubr.msk.f32.gmra.mxu0 %vm3091_vm9, %v6622_v46  ;;  %v3612_v2 = vpop.f32.mrf.mxu0 }
 0x2c6   : > { %v3331_v50 = vadd.f32 %v3296_v24, %v9832_v12  ;;  %5404 = vmatprep.mubr.f32.mxu0 %v10767_v44  ;;  %5612 = vmatprep.mubr.f32.mxu1 %v10767_v44  ;;  %v10087_v0 = vadd.f32 %v3612_v2, %v3329_v55  ;;  %v6643_v55 = vld [vmem:[%s10714_s6 + $0x418] sm:$0xff]  ;;  %v6644_v24 = vld [vmem:[%s10714_s6 + $0x420] sm:$0xff] }
 0x2c7   : > { %v3298_v34 = vpop.f32.mrf.mxu1  ;;  %v3614_v38 = vpop.f32.mrf.mxu0 }
 0x2c8   : > { %v3332_v60 = vadd.f32 %v3298_v34, %v9838_v48  ;;  %v10090_v12 = vadd.f32 %v3614_v38, %v3330_v9  ;;  %v6645_v38 = vld [vmem:[%s10714_s6 + $0x428] sm:$0xff] }
 0x2c9   : > { %v3826_v28 = vpop.f32.mrf.mxu1  ;;  %6639 = vmatmul.mubr.msk.f32.gmra.mxu0 %vm3091_vm9, %v6623_v23  ;;  %6656 = vmatmul.mubr.msk.f32.vlgmr.msra.gmra.mxu1 %vm3091_vm9, %v6640_v29  ;;  %v3618_v13 = vpop.f32.mrf.mxu0 }
 0x2ca   : > { %v3921_v5 = vadd.f32 %v3826_v28, %v9854_v19  ;;  %5618 = vmatprep.mubr.f32.mxu1 %v10767_v44  ;;  %v10099_v53 = vadd.f32 %v3618_v13, %v3331_v50 }
 0x2cb   : > { %v3828_v48 = vpop.f32.mrf.mxu1  ;;  %v3620_v52 = vpop.f32.mrf.mxu0 }
 0x2cc   : > { %v3922_v35 = vadd.f32 %v3828_v48, %v9860_v40  ;;  %v10102_v7 = vadd.f32 %v3620_v52, %v3332_v60 }
 0x2cd   : > { %v3832_v8 = vpop.f32.mrf.mxu1  ;;  %6657 = vmatmul.mubr.msk.f32.gmra.mxu1 %vm3091_vm9, %v6641_v16  ;;  %v4124_v19 = vpop.f32.mrf.mxu0 }
 0x2ce   : > { %v3923_v11 = vadd.f32 %v3832_v8, %v9876_v17  ;;  %5624 = vmatprep.mubr.f32.mxu1 %v10767_v44  ;;  %v10110_v43 = vadd.f32 %v4124_v19, %v3921_v5 }
 0x2cf   : > { %v3834_v57 = vpop.f32.mrf.mxu1  ;;  %v4126_v40 = vpop.f32.mrf.mxu0 }
 0x2d0   : > { %v3924_v4 = vadd.f32 %v3834_v57, %v9882_v47  ;;  %v10113_v54 = vadd.f32 %v4126_v40, %v3922_v35  ;;  %v6646_v35 = vld [vmem:[%s10714_s6 + $0x430] sm:$0xff]  ;;  %v6647_v40 = vld [vmem:[%s10714_s6 + $0x438] sm:$0xff] }
 0x2d1   : > { %v3838_v31 = vpop.f32.mrf.mxu1  ;;  %6658 = vmatmul.mubr.msk.f32.gmra.mxu1 %vm3091_vm9, %v6642_v49  ;;  %v4130_v45 = vpop.f32.mrf.mxu0 }
 0x2d2   : > { %v3925_v17 = vadd.f32 %v3838_v31, %v9895_v14  ;;  %5630 = vmatprep.mubr.f32.mxu1 %v10767_v44  ;;  %v10121_v36 = vadd.f32 %v4130_v45, %v3923_v11 }
 0x2d3   : > { %v3840_v59 = vpop.f32.mrf.mxu1  ;;  %v4132_v46 = vpop.f32.mrf.mxu0 }
 0x2d4   : > { %v3926_v47 = vadd.f32 %v3840_v59, %v9898_v42  ;;  %v10124_v51 = vadd.f32 %v4132_v46, %v3924_v4  ;;  %v6648_v46 = vld [vmem:[%s10714_s6 + $0x440] sm:$0xff] }
 0x2d5   : > { %v3844_v9 = vpop.f32.mrf.mxu1  ;;  %6659 = vmatmul.mubr.msk.f32.gmra.mxu1 %vm3091_vm9, %v6643_v55  ;;  %v4136_v41 = vpop.f32.mrf.mxu0 }
 0x2d6   : > { %v3927_v14 = vadd.f32 %v3844_v9, %v9911_v18  ;;  %5636 = vmatprep.mubr.f32.mxu1 %v10767_v44  ;;  %v10132_v50 = vadd.f32 %v4136_v41, %v3925_v17 }
 0x2d7   : > { %v3846_v2 = vpop.f32.mrf.mxu1  ;;  %v4138_v23 = vpop.f32.mrf.mxu0 }
 0x2d8   : > { %v3928_v42 = vadd.f32 %v3846_v2, %v9914_v21  ;;  %v10135_v29 = vadd.f32 %v4138_v23, %v3926_v47  ;;  %v6649_v23 = vld [vmem:[%s10714_s6 + $0x448] sm:$0xff] }
 0x2d9   : > { %v3850_v34 = vpop.f32.mrf.mxu1  ;;  %6660 = vmatmul.mubr.msk.f32.gmra.mxu1 %vm3091_vm9, %v6644_v24  ;;  %v4142_v60 = vpop.f32.mrf.mxu0 }
 0x2da   : > { %v3929_v18 = vadd.f32 %v3850_v34, %v9927_v1  ;;  %5642 = vmatprep.mubr.f32.mxu1 %v10767_v44  ;;  %v10143_v28 = vadd.f32 %v4142_v60, %v3927_v14 }
 0x2db   : > { %v3852_v13 = vpop.f32.mrf.mxu1  ;;  %v4144_v5 = vpop.f32.mrf.mxu0 }
 0x2dc   : > { %v3930_v21 = vadd.f32 %v3852_v13, %v9930_v62  ;;  %v10146_v16 = vadd.f32 %v4144_v5, %v3928_v42  ;;  %v6650_v5 = vld [vmem:[%s10714_s6 + $0x450] sm:$0xff] }
 0x2dd   : > { %v3856_v48 = vpop.f32.mrf.mxu1  ;;  %6661 = vmatmul.mubr.msk.f32.gmra.mxu1 %vm3091_vm9, %v6645_v38  ;;  %v4148_v52 = vpop.f32.mrf.mxu0 }
 0x2de   : > { %v3931_v1 = vadd.f32 %v3856_v48, %v9943_v32  ;;  %5648 = vmatprep.mubr.f32.mxu1 %v10767_v44  ;;  %v10154_v8 = vadd.f32 %v4148_v52, %v3929_v18 }
 0x2df   : > { %v3858_v11 = vpop.f32.mrf.mxu1  ;;  %v4150_v19 = vpop.f32.mrf.mxu0 }
 0x2e0   : > { %v3932_v62 = vadd.f32 %v3858_v11, %v9946_v61  ;;  %v10157_v49 = vadd.f32 %v4150_v19, %v3930_v21  ;;  %v6651_v19 = vld [vmem:[%s10714_s6 + $0x458] sm:$0xff] }
 0x2e1   : > { %v3862_v57 = vpop.f32.mrf.mxu1  ;;  %6662 = vmatmul.mubr.msk.f32.gmra.mxu1 %vm3091_vm9, %v6646_v35  ;;  %v4154_v4 = vpop.f32.mrf.mxu0 }
 0x2e2   : > { %v3933_v32 = vadd.f32 %v3862_v57, %v9959_v10  ;;  %5654 = vmatprep.mubr.f32.mxu1 %v10767_v44  ;;  %v10165_v31 = vadd.f32 %v4154_v4, %v3931_v1 }
 0x2e3   : > { %v3864_v17 = vpop.f32.mrf.mxu1  ;;  %v4156_v45 = vpop.f32.mrf.mxu0 }
 0x2e4   : > { %v3934_v61 = vadd.f32 %v3864_v17, %v9962_v39  ;;  %v10168_v55 = vadd.f32 %v4156_v45, %v3932_v62  ;;  %v6652_v45 = vld [vmem:[%s10714_s6 + $0x460] sm:$0xff] }
 0x2e5   : > { %v3868_v59 = vpop.f32.mrf.mxu1  ;;  %6663 = vmatmul.mubr.msk.f32.gmra.mxu1 %vm3091_vm9, %v6647_v40  ;;  %v4160_v47 = vpop.f32.mrf.mxu0 }
 0x2e6   : > { %v3935_v10 = vadd.f32 %v3868_v59, %v9975_v15  ;;  %5660 = vmatprep.mubr.f32.mxu1 %v10767_v44  ;;  %v10176_v9 = vadd.f32 %v4160_v47, %v3933_v32 }
 0x2e7   : > { %v3870_v14 = vpop.f32.mrf.mxu1  ;;  %v4162_v41 = vpop.f32.mrf.mxu0 }
 0x2e8   : > { %v3936_v39 = vadd.f32 %v3870_v14, %v9978_v63  ;;  %v10179_v24 = vadd.f32 %v4162_v41, %v3934_v61  ;;  %v6653_v41 = vld [vmem:[%s10714_s6 + $0x468] sm:$0xff] }
 0x2e9   : > { %v3874_v2 = vpop.f32.mrf.mxu1  ;;  %6664 = vmatmul.mubr.msk.f32.gmra.mxu1 %vm3091_vm9, %v6648_v46  ;;  %v4166_v42 = vpop.f32.mrf.mxu0 }
 0x2ea   : > { %v3937_v15 = vadd.f32 %v3874_v2, %v9991_v33  ;;  %5666 = vmatprep.mubr.f32.mxu1 %v10767_v44  ;;  %v10187_v34 = vadd.f32 %v4166_v42, %v3935_v10 }
 0x2eb   : > { %v3876_v18 = vpop.f32.mrf.mxu1  ;;  %v4168_v60 = vpop.f32.mrf.mxu0 }
 0x2ec   : > { %v3938_v63 = vadd.f32 %v3876_v18, %v9994_v3  ;;  %v10190_v38 = vadd.f32 %v4168_v60, %v3936_v39  ;;  %v6654_v60 = vld [vmem:[%s10714_s6 + $0x470] sm:$0xff] }
 0x2ed   : > { %v3880_v13 = vpop.f32.mrf.mxu1  ;;  %6665 = vmatmul.mubr.msk.f32.gmra.mxu1 %vm3091_vm9, %v6649_v23  ;;  %v4172_v21 = vpop.f32.mrf.mxu0 }
 0x2ee   : > { %v3939_v33 = vadd.f32 %v3880_v13, %v10007_v27  ;;  %5672 = vmatprep.mubr.f32.mxu1 %v10767_v44  ;;  %v10198_v48 = vadd.f32 %v4172_v21, %v3937_v15 }
 0x2ef   : > { %v3882_v1 = vpop.f32.mrf.mxu1  ;;  %v4174_v52 = vpop.f32.mrf.mxu0 }
 0x2f0   : > { %v3940_v3 = vadd.f32 %v3882_v1, %v10010_v30  ;;  %v10201_v35 = vadd.f32 %v4174_v52, %v3938_v63  ;;  %v6655_v52 = vld [vmem:[%s10714_s6 + $0x478] sm:$0xff] }
 0x2f1   : > { %v3886_v11 = vpop.f32.mrf.mxu1  ;;  %6666 = vmatmul.mubr.msk.f32.gmra.mxu1 %vm3091_vm9, %v6650_v5  ;;  %v4178_v62 = vpop.f32.mrf.mxu0 }
 0x2f2   : > { %v3941_v27 = vadd.f32 %v3886_v11, %v10023_v25  ;;  %5678 = vmatprep.mubr.f32.mxu1 %v10767_v44  ;;  %v10209_v57 = vadd.f32 %v4178_v62, %v3939_v33 }
 0x2f3   : > { %v3888_v32 = vpop.f32.mrf.mxu1  ;;  %v4180_v4 = vpop.f32.mrf.mxu0 }
 0x2f4   : > { %v3942_v30 = vadd.f32 %v3888_v32, %v10026_v56  ;;  %v10212_v40 = vadd.f32 %v4180_v4, %v3940_v3 }
 0x2f5   : > { %v3892_v17 = vpop.f32.mrf.mxu1  ;;  %6667 = vmatmul.mubr.msk.f32.gmra.mxu1 %vm3091_vm9, %v6651_v19  ;;  %v4184_v61 = vpop.f32.mrf.mxu0 }
 0x2f6   : > { %v3943_v25 = vadd.f32 %v3892_v17, %v10039_v22  ;;  %5684 = vmatprep.mubr.f32.mxu1 %v10767_v44  ;;  %v10220_v59 = vadd.f32 %v4184_v61, %v3941_v27 }
 0x2f7   : > { %v3894_v10 = vpop.f32.mrf.mxu1  ;;  %v4186_v47 = vpop.f32.mrf.mxu0 }
 0x2f8   : > { %v3944_v56 = vadd.f32 %v3894_v10, %v10042_v26  ;;  %v10223_v46 = vadd.f32 %v4186_v47, %v3942_v30 }
 0x2f9   : > { %v3898_v14 = vpop.f32.mrf.mxu1  ;;  %6668 = vmatmul.mubr.msk.f32.gmra.mxu1 %vm3091_vm9, %v6652_v45  ;;  %v4190_v39 = vpop.f32.mrf.mxu0 }
 0x2fa   : > { %v3945_v22 = vadd.f32 %v3898_v14, %v10055_v6  ;;  %5690 = vmatprep.mubr.f32.mxu1 %v10767_v44  ;;  %v10231_v2 = vadd.f32 %v4190_v39, %v3943_v25 }
 0x2fb   : > { %v3900_v15 = vpop.f32.mrf.mxu1  ;;  %v4192_v42 = vpop.f32.mrf.mxu0 }
 0x2fc   : > { %v3946_v26 = vadd.f32 %v3900_v15, %v10058_v58  ;;  %v10234_v23 = vadd.f32 %v4192_v42, %v3944_v56 }
 0x2fd   : > { %v3904_v18 = vpop.f32.mrf.mxu1  ;;  %6669 = vmatmul.mubr.msk.f32.gmra.mxu1 %vm3091_vm9, %v6653_v41  ;;  %v4196_v63 = vpop.f32.mrf.mxu0 }
 0x2fe   : > { %v3947_v6 = vadd.f32 %v3904_v18, %v10071_v20  ;;  %5696 = vmatprep.mubr.f32.mxu1 %v10767_v44  ;;  %v10242_v13 = vadd.f32 %v4196_v63, %v3945_v22 }
 0x2ff   : > { %v3906_v33 = vpop.f32.mrf.mxu1  ;;  %v4198_v21 = vpop.f32.mrf.mxu0 }
 0x300   : > { %v3948_v58 = vadd.f32 %v3906_v33, %v10074_v37  ;;  %v10245_v5 = vadd.f32 %v4198_v21, %v3946_v26 }
 0x301   : > { %v3910_v1 = vpop.f32.mrf.mxu1  ;;  %6670 = vmatmul.mubr.msk.f32.gmra.mxu1 %vm3091_vm9, %v6654_v60  ;;  %v4202_v3 = vpop.f32.mrf.mxu0 }
 0x302   : > { %v3949_v20 = vadd.f32 %v3910_v1, %v10087_v0  ;;  %5702 = vmatprep.mubr.f32.mxu1 %v10767_v44  ;;  %v10253_v11 = vadd.f32 %v4202_v3, %v3947_v6 }
 0x303   : > { %v3912_v27 = vpop.f32.mrf.mxu1  ;;  %v4204_v62 = vpop.f32.mrf.mxu0 }
 0x304   : > { %v3950_v37 = vadd.f32 %v3912_v27, %v10090_v12  ;;  %v10256_v19 = vadd.f32 %v4204_v62, %v3948_v58 }
 0x305   : > { %v3916_v32 = vpop.f32.mrf.mxu1  ;;  %6671 = vmatmul.mubr.msk.f32.gmra.mxu1 %vm3091_vm9, %v6655_v52  ;;  %v4208_v30 = vpop.f32.mrf.mxu0 }
 0x306   : > { %v3951_v0 = vadd.f32 %v3916_v32, %v10099_v53  ;;  %v10260_v4 = vadd.f32 %v4208_v30, %v3949_v20 }
 0x307   : > { %v3918_v44 = vpop.f32.mrf.mxu1  ;;  %v4210_v25 = vpop.f32.mrf.mxu0 }
 0x308   : > { %v3952_v17 = vadd.f32 %v3918_v44, %v10102_v7  ;;  %v10263_v61 = vadd.f32 %v4210_v25, %v3950_v37 }
 0x309   : > { %v4422_v45 = vpop.f32.mrf.mxu1  ;;  %v4214_v10 = vpop.f32.mrf.mxu0 }
 0x30a   : > { %v4517_v12 = vadd.f32 %v4422_v45, %v10110_v43  ;;  %v10266_v56 = vadd.f32 %v4214_v10, %v3951_v0 }
 0x30b   : > { %v4424_v47 = vpop.f32.mrf.mxu1  ;;  %v4216_v14 = vpop.f32.mrf.mxu0 }
 0x30c   : > { %v4518_v22 = vadd.f32 %v4424_v47, %v10113_v54  ;;  %v10269_v53 = vadd.f32 %v4216_v14, %v3952_v17 }
 0x30d   : > { %v4428_v39 = vpop.f32.mrf.mxu1  ;;  %v4720_v15 = vpop.f32.mrf.mxu0 }
 0x30e   : > { %v4519_v41 = vadd.f32 %v4428_v39, %v10121_v36  ;;  %v10272_v7 = vadd.f32 %v4720_v15, %v4517_v12 }
 0x30f   : > { %v4430_v26 = vpop.f32.mrf.mxu1  ;;  %v4722_v18 = vpop.f32.mrf.mxu0 }
 0x310   : > { %v4520_v42 = vadd.f32 %v4430_v26, %v10124_v51  ;;  %v10275_v6 = vadd.f32 %v4722_v18, %v4518_v22 }
 0x311   : > { %v4434_v43 = vpop.f32.mrf.mxu1  ;;  %v4726_v60 = vpop.f32.mrf.mxu0 }
 0x312   : > { %v4521_v63 = vadd.f32 %v4434_v43, %v10132_v50  ;;  %v10278_v33 = vadd.f32 %v4726_v60, %v4519_v41 }
 0x313   : > { %v4436_v54 = vpop.f32.mrf.mxu1  ;;  %v4728_v21 = vpop.f32.mrf.mxu0 }
 0x314   : > { %v4522_v58 = vadd.f32 %v4436_v54, %v10135_v29  ;;  %v10281_v36 = vadd.f32 %v4728_v21, %v4520_v42 }
 0x315   : > { %v4440_v1 = vpop.f32.mrf.mxu1  ;;  %v4732_v3 = vpop.f32.mrf.mxu0 }
 0x316   : > { %v4523_v20 = vadd.f32 %v4440_v1, %v10143_v28  ;;  %v10284_v51 = vadd.f32 %v4732_v3, %v4521_v63 }
 0x317   : > { %v4442_v52 = vpop.f32.mrf.mxu1  ;;  %v4734_v37 = vpop.f32.mrf.mxu0 }
 0x318   : > { %v4524_v27 = vadd.f32 %v4442_v52, %v10146_v16  ;;  %v10287_v50 = vadd.f32 %v4734_v37, %v4522_v58 }
 0x319   : > { %v4446_v62 = vpop.f32.mrf.mxu1  ;;  %v4738_v0 = vpop.f32.mrf.mxu0 }
 0x31a   : > { %v4525_v32 = vadd.f32 %v4446_v62, %v10154_v8  ;;  %v10290_v29 = vadd.f32 %v4738_v0, %v4523_v20 }
 0x31b   : > { %v4448_v30 = vpop.f32.mrf.mxu1  ;;  %v4740_v17 = vpop.f32.mrf.mxu0 }
 0x31c   : > { %v4526_v44 = vadd.f32 %v4448_v30, %v10157_v49  ;;  %v10293_v28 = vadd.f32 %v4740_v17, %v4524_v27 }
 0x31d   : > { %v4452_v25 = vpop.f32.mrf.mxu1  ;;  %v4744_v10 = vpop.f32.mrf.mxu0 }
 0x31e   : > { %v4527_v45 = vadd.f32 %v4452_v25, %v10165_v31  ;;  %v10296_v16 = vadd.f32 %v4744_v10, %v4525_v32 }
 0x31f   : > { %v4454_v12 = vpop.f32.mrf.mxu1  ;;  %v4746_v14 = vpop.f32.mrf.mxu0 }
 0x320   : > { %v4528_v47 = vadd.f32 %v4454_v12, %v10168_v55  ;;  %v10299_v8 = vadd.f32 %v4746_v14, %v4526_v44 }
 0x321   : > { %v4458_v22 = vpop.f32.mrf.mxu1  ;;  %v4750_v41 = vpop.f32.mrf.mxu0 }
 0x322   : > { %v4529_v39 = vadd.f32 %v4458_v22, %v10176_v9  ;;  %v10302_v49 = vadd.f32 %v4750_v41, %v4527_v45 }
 0x323   : > { %v4460_v15 = vpop.f32.mrf.mxu1  ;;  %v4752_v42 = vpop.f32.mrf.mxu0 }
 0x324   : > { %v4530_v26 = vadd.f32 %v4460_v15, %v10179_v24  ;;  %v10305_v31 = vadd.f32 %v4752_v42, %v4528_v47 }
 0x325   : > { %v4464_v18 = vpop.f32.mrf.mxu1  ;;  %v4756_v63 = vpop.f32.mrf.mxu0 }
 0x326   : > { %v4531_v43 = vadd.f32 %v4464_v18, %v10187_v34  ;;  %v10308_v55 = vadd.f32 %v4756_v63, %v4529_v39 }
 0x327   : > { %v4466_v60 = vpop.f32.mrf.mxu1  ;;  %v4758_v58 = vpop.f32.mrf.mxu0 }
 0x328   : > { %v4532_v54 = vadd.f32 %v4466_v60, %v10190_v38  ;;  %v10311_v9 = vadd.f32 %v4758_v58, %v4530_v26 }
 0x329   : > { %v4470_v21 = vpop.f32.mrf.mxu1  ;;  %v4762_v20 = vpop.f32.mrf.mxu0 }
 0x32a   : > { %v4533_v1 = vadd.f32 %v4470_v21, %v10198_v48  ;;  %v10314_v24 = vadd.f32 %v4762_v20, %v4531_v43 }
 0x32b   : > { %v4472_v3 = vpop.f32.mrf.mxu1  ;;  %v4764_v27 = vpop.f32.mrf.mxu0 }
 0x32c   : > { %v4534_v52 = vadd.f32 %v4472_v3, %v10201_v35  ;;  %v10317_v34 = vadd.f32 %v4764_v27, %v4532_v54 }
 0x32d   : > { %v4476_v37 = vpop.f32.mrf.mxu1  ;;  %v4768_v32 = vpop.f32.mrf.mxu0 }
 0x32e   : > { %v4535_v62 = vadd.f32 %v4476_v37, %v10209_v57  ;;  %v10320_v38 = vadd.f32 %v4768_v32, %v4533_v1 }
 0x32f   : > { %v4478_v0 = vpop.f32.mrf.mxu1  ;;  %v4770_v44 = vpop.f32.mrf.mxu0 }
 0x330   : > { %v4536_v30 = vadd.f32 %v4478_v0, %v10212_v40  ;;  %v10323_v48 = vadd.f32 %v4770_v44, %v4534_v52 }
 0x331   : > { %v4482_v17 = vpop.f32.mrf.mxu1  ;;  %v4774_v45 = vpop.f32.mrf.mxu0 }
 0x332   : > { %v4537_v25 = vadd.f32 %v4482_v17, %v10220_v59  ;;  %v10326_v35 = vadd.f32 %v4774_v45, %v4535_v62 }
 0x333   : > { %v4484_v10 = vpop.f32.mrf.mxu1  ;;  %v4776_v47 = vpop.f32.mrf.mxu0 }
 0x334   : > { %v4538_v12 = vadd.f32 %v4484_v10, %v10223_v46  ;;  %v10329_v57 = vadd.f32 %v4776_v47, %v4536_v30 }
 0x335   : > { %v4488_v14 = vpop.f32.mrf.mxu1  ;;  %v4780_v39 = vpop.f32.mrf.mxu0 }
 0x336   : > { %v4539_v22 = vadd.f32 %v4488_v14, %v10231_v2  ;;  %v10332_v40 = vadd.f32 %v4780_v39, %v4537_v25 }
 0x337   : > { %v4490_v41 = vpop.f32.mrf.mxu1  ;;  %v4782_v26 = vpop.f32.mrf.mxu0 }
 0x338   : > { %v4540_v15 = vadd.f32 %v4490_v41, %v10234_v23  ;;  %v10335_v59 = vadd.f32 %v4782_v26, %v4538_v12 }
 0x339   : > { %v4494_v42 = vpop.f32.mrf.mxu1  ;;  %v4786_v46 = vpop.f32.mrf.mxu0 }
 0x33a   : > { %v10338_v18 = vadd.f32 %v4494_v42, %v10242_v13  ;;  %v10340_v43 = vadd.f32 %v4786_v46, %v4539_v22 }
 0x33b   : > { %v4496_v63 = vpop.f32.mrf.mxu1  ;;  %v4788_v2 = vpop.f32.mrf.mxu0 }
 0x33c   : > { %v10343_v60 = vadd.f32 %v4496_v63, %v10245_v5  ;;  %v10345_v54 = vadd.f32 %v4788_v2, %v4540_v15 }
 0x33d   : > { %v4500_v58 = vpop.f32.mrf.mxu1  ;;  %v10350_v21 = vpop.f32.mrf.mxu0 }
 0x33e   : > { %v10348_v23 = vadd.f32 %v4500_v58, %v10253_v11 }
 0x33f   : > { %v4502_v1 = vpop.f32.mrf.mxu1  ;;  %v10355_v20 = vpop.f32.mrf.mxu0 }
 0x340   : > { %v10353_v13 = vadd.f32 %v4502_v1, %v10256_v19 }
 0x341   : > { %v4506_v3 = vpop.f32.mrf.mxu1  ;;  %v10360_v5 = vpop.f32.mrf.mxu0 }
 0x342   : > { %v10358_v52 = vadd.f32 %v4506_v3, %v10260_v4 }
 0x343   : > { %v4508_v27 = vpop.f32.mrf.mxu1  ;;  %v10365_v11 = vpop.f32.mrf.mxu0 }
 0x344   : > { %10985 = vst [vmem:[#allocation84_spill] sm:$0xff] %v10358_v52  ;;  %v10363_v37 = vadd.f32 %v4508_v27, %v10263_v61 }
 0x345   : > { %v4512_v62 = vpop.f32.mrf.mxu1  ;;  %v10370_v19 = vpop.f32.mrf.mxu0 }
 0x346   : > { %10986 = vst [vmem:[#allocation89_spill] sm:$0xff] %v10363_v37  ;;  %v10368_v32 = vadd.f32 %v4512_v62, %v10266_v56  ;;  %10988 = vst [vmem:[#allocation11_spill] sm:$0xff] %v10370_v19 }
 0x347   : > { %v4514_v0 = vpop.f32.mrf.mxu1  ;;  %v10375_v4 = vpop.f32.mrf.mxu0 }
 0x348   : > { %10987 = vst [vmem:[#allocation91_spill] sm:$0xff] %v10368_v32  ;;  %v10373_v30 = vadd.f32 %v4514_v0, %v10269_v53  ;;  %10990 = vst [vmem:[#allocation88_spill] sm:$0xff] %v10375_v4 }
 0x349   : > { %v5018_v44 = vpop.f32.mrf.mxu1  ;;  %v10377_v17 = vpop.f32.mrf.mxu0 }
 0x34a   : > { %10989 = vst [vmem:[#allocation85_spill] sm:$0xff] %v10373_v30  ;;  %10991 = vst [vmem:[#allocation31_spill] sm:$0xff] %v10377_v17  ;;  %v10380_v61 = vadd.f32 %v5018_v44, %v10272_v7 }
 0x34b   : > { %v5020_v25 = vpop.f32.mrf.mxu1  ;;  %v10382_v45 = vpop.f32.mrf.mxu0 }
 0x34c   : > { %10992 = vst [vmem:[#allocation34_spill] sm:$0xff] %v10382_v45  ;;  %v10385_v56 = vadd.f32 %v5020_v25, %v10275_v6 }
 0x34d   : > { %v5024_v10 = vpop.f32.mrf.mxu1  ;;  %v10390_v53 = vpop.f32.mrf.mxu0 }
 0x34e   : > { %v10388_v12 = vadd.f32 %v5024_v10, %v10278_v33 }
 0x34f   : > { %v5026_v47 = vpop.f32.mrf.mxu1  ;;  %v10395_v22 = vpop.f32.mrf.mxu0 }
 0x350   : > { %v10393_v14 = vadd.f32 %v5026_v47, %v10281_v36 }
 0x351   : > { %v5030_v7 = vpop.f32.mrf.mxu1  ;;  %v10400_v41 = vpop.f32.mrf.mxu0 }
 0x352   : > { %v10398_v39 = vadd.f32 %v5030_v7, %v10284_v51 }
 0x353   : > { %v5032_v6 = vpop.f32.mrf.mxu1  ;;  %v10405_v33 = vpop.f32.mrf.mxu0 }
 0x354   : > { %v10403_v15 = vadd.f32 %v5032_v6, %v10287_v50  ;;  %v5414_v19 = vadd.f32 %v10405_v33, %v10393_v14 }
 0x355   : > { %v5036_v26 = vpop.f32.mrf.mxu1  ;;  %v10410_v46 = vpop.f32.mrf.mxu0 }
 0x356   : > { %v10408_v42 = vadd.f32 %v5036_v26, %v10290_v29 }
 0x357   : > { %v5038_v36 = vpop.f32.mrf.mxu1  ;;  %v10418_v1 = vpop.f32.mrf.mxu0 }
 0x358   : > { %v10413_v63 = vadd.f32 %v5038_v36, %v10293_v28 }
 0x359   : > { %v5042_v51 = vpop.f32.mrf.mxu1  ;;  %v10426_v62 = vpop.f32.mrf.mxu0 }
 0x35a   : > { %v10416_v2 = vadd.f32 %v5042_v51, %v10296_v16 }
 0x35b   : > { %v5044_v58 = vpop.f32.mrf.mxu1  ;;  %v10434_v25 = vpop.f32.mrf.mxu0 }
 0x35c   : > { %v10421_v50 = vadd.f32 %v5044_v58, %v10299_v8 }
 0x35d   : > { %v5048_v3 = vpop.f32.mrf.mxu1  ;;  %v10442_v7 = vpop.f32.mrf.mxu0 }
 0x35e   : > { %v10424_v29 = vadd.f32 %v5048_v3, %v10302_v49 }
 0x35f   : > { %v5050_v27 = vpop.f32.mrf.mxu1  ;;  %v10450_v36 = vpop.f32.mrf.mxu0 }
 0x360   : > { %v10429_v28 = vadd.f32 %v5050_v27, %v10305_v31 }
 0x361   : > { %v5054_v0 = vpop.f32.mrf.mxu1  ;;  %v10458_v3 = vpop.f32.mrf.mxu0 }
 0x362   : > { %v10432_v16 = vadd.f32 %v5054_v0, %v10308_v55 }
 0x363   : > { %v5056_v44 = vpop.f32.mrf.mxu1 }
 0x364   : > { %v10437_v8 = vadd.f32 %v5056_v44, %v10311_v9  ;;  %v10466_v44 = vpop.f32.mrf.mxu0 }
 0x365   : > { %v5060_v10 = vpop.f32.mrf.mxu1 }
 0x366   : > { %v10440_v49 = vadd.f32 %v5060_v10, %v10314_v24 }
 0x367   : > { %v5062_v47 = vpop.f32.mrf.mxu1 }
 0x368   : > { %v10445_v31 = vadd.f32 %v5062_v47, %v10317_v34 }
 0x369   : > { %v5066_v6 = vpop.f32.mrf.mxu1 }
 0x36a   : > { %v10448_v55 = vadd.f32 %v5066_v6, %v10320_v38  ;;  %v10474_v6 = vpop.f32.mrf.mxu0 }
 0x36b   : > { %v5068_v26 = vpop.f32.mrf.mxu1 }
 0x36c   : > { %v10453_v9 = vadd.f32 %v5068_v26, %v10323_v48 }
 0x36d   : > { %v5072_v51 = vpop.f32.mrf.mxu1 }
 0x36e   : > { %v10456_v24 = vadd.f32 %v5072_v51, %v10326_v35  ;;  %v10483_v51 = vpop.f32.mrf.mxu0 }
 0x36f   : > { %v5074_v58 = vpop.f32.mrf.mxu1 }
 0x370   : > { %v10461_v34 = vadd.f32 %v5074_v58, %v10329_v57 }
 0x371   : > { %v5078_v27 = vpop.f32.mrf.mxu1 }
 0x372   : > { %v10464_v38 = vadd.f32 %v5078_v27, %v10332_v40  ;;  %v10489_v27 = vpop.f32.mrf.mxu0 }
 0x373   : > { %v5080_v0 = vpop.f32.mrf.mxu1 }
 0x374   : > { %v10469_v48 = vadd.f32 %v5080_v0, %v10335_v59 }
 0x375   : > { %v5084_v10 = vpop.f32.mrf.mxu1 }
 0x376   : > { %v10472_v35 = vadd.f32 %v5084_v10, %v10340_v43  ;;  %v10495_v10 = vpop.f32.mrf.mxu0 }
 0x377   : > { %v5086_v47 = vpop.f32.mrf.mxu1 }
 0x378   : > { %10993 = vst [vmem:[#allocation96_spill] sm:$0xff] %v10472_v35  ;;  %v10477_v57 = vadd.f32 %v5086_v47, %v10345_v54  ;;  %v10501_v45 = vpop.f32.mrf.mxu0 }
 0x379   : > { %v10479_v26 = vpop.f32.mrf.mxu1 }
 0x37a   : > { %10994 = vst [vmem:[#allocation98_spill] sm:$0xff] %v10477_v57  ;;  %v10503_v32 = vpop.f32.mrf.mxu0  ;;  %v5411_v57 = vadd.f32 %v10390_v53, %v10380_v61  ;;  %v5415_v61 = vadd.f32 %v10410_v46, %v10398_v39  ;;  %v5416_v53 = vadd.f32 %v10418_v1, %v10403_v15  ;;  %v5419_v15 = vadd.f32 %v10442_v7, %v10416_v2 }
 0x37b   : > { %v10481_v40 = vpop.f32.mrf.mxu1 }
 0x37d   : > { %v10485_v58 = vpop.f32.mrf.mxu1 }
 0x37e   : > { %10995 = vst [vmem:[#allocation25_spill] sm:$0xff] %v10485_v58 }
 0x37f   : > { %v10487_v59 = vpop.f32.mrf.mxu1 }
 0x380   : > { %10996 = vst [vmem:[#allocation28_spill] sm:$0xff] %v10487_v59  ;;  %v10511_v59 = vpop.f32.mrf.mxu0 }
 0x381   : > { %v10491_v43 = vpop.f32.mrf.mxu1 }
 0x382   : > { %10997 = vst [vmem:[#allocation90_spill] sm:$0xff] %v10491_v43  ;;  %v5412_v43 = vadd.f32 %v10395_v22, %v10385_v56 }
 0x383   : > { %v10493_v0 = vpop.f32.mrf.mxu1 }
 0x384   : > { %10998 = vst [vmem:[#allocation99_spill] sm:$0xff] %v10493_v0  ;;  %v5413_v0 = vadd.f32 %v10400_v41, %v10388_v12  ;;  %v10519_v12 = vpop.f32.mrf.mxu0 }
 0x385   : > { %v10497_v54 = vpop.f32.mrf.mxu1 }
 0x386   : > { %10999 = vst [vmem:[#allocation103_spill] sm:$0xff] %v10497_v54 }
 0x387   : > { %v10499_v47 = vpop.f32.mrf.mxu1 }
 0x388   : > { %11000 = vst [vmem:[#allocation92_spill] sm:$0xff] %v10499_v47 }
 0x389   : > { %v5614_v30 = vpop.f32.mrf.mxu1 }
 0x38a   : > { %v5709_v37 = vadd.f32 %v5614_v30, %v5411_v57 }
 0x38b   : > { %v5616_v17 = vpop.f32.mrf.mxu1 }
 0x38c   : > { %v5710_v47 = vadd.f32 %v5616_v17, %v5412_v43  ;;  %v6672_v56 = vmul.f32 -1.442695, %v5709_v37  ;;  %v5417_v17 = vadd.f32 %v10426_v62, %v10408_v42  ;;  %v10525_v37 = vpop.f32.mrf.mxu0  ;;  %v5420_v42 = vadd.f32 %v10450_v36, %v10421_v50 }
 0x38d   : > { %v5620_v4 = vpop.f32.mrf.mxu1  ;;  %v5418_v50 = vadd.f32 %v10434_v25, %v10413_v63 }
 0x38e   : > { %v5711_v52 = vadd.f32 %v5620_v4, %v5413_v0  ;;  %v6673_v30 = vmul.f32 -1.442695, %v5710_v47  ;;  %6786 = vpow2.f32 %v6672_v56  ;;  %v10531_v0 = vpop.f32.mrf.mxu0 }
 0x38f   : > { %v5622_v54 = vpop.f32.mrf.mxu1 }
 0x390   : > { %v5712_v22 = vadd.f32 %v5622_v54, %v5414_v19  ;;  %v6674_v57 = vmul.f32 -1.442695, %v5711_v52  ;;  %6788 = vpow2.f32 %v6673_v30  ;;  %v5422_v54 = vadd.f32 %v10466_v44, %v10429_v28 }
 0x391   : > { %v5626_v58 = vpop.f32.mrf.mxu1 }
 0x392   : > { %v5713_v41 = vadd.f32 %v5626_v58, %v5415_v61  ;;  %v6675_v33 = vmul.f32 -1.442695, %v5712_v22  ;;  %6790 = vpow2.f32 %v6674_v57  ;;  %v5421_v58 = vadd.f32 %v10458_v3, %v10424_v29  ;;  %v10539_v29 = vpop.f32.mrf.mxu0 }
 0x393   : > { %v5628_v35 = vpop.f32.mrf.mxu1  ;;  %v5424_v57 = vadd.f32 %v10483_v51, %v10437_v8 }
 0x394   : > { %v5714_v14 = vadd.f32 %v5628_v35, %v5416_v53  ;;  %v6676_v19 = vmul.f32 -1.442695, %v5713_v41  ;;  %6792 = vpow2.f32 %v6675_v33  ;;  %v5423_v53 = vadd.f32 %v10474_v6, %v10432_v16  ;;  %v10543_v63 = vpop.f32.mrf.mxu0 }
 0x395   : > { %v5632_v4 = vpop.f32.mrf.mxu1 }
 0x396   : > { %v5715_v43 = vadd.f32 %v5632_v4, %v5417_v17  ;;  %v6677_v46 = vmul.f32 -1.442695, %v5714_v14  ;;  %6794 = vpow2.f32 %v6676_v19 }
 0x397   : > { %v5634_v39 = vpop.f32.mrf.mxu1 }
 0x398   : > { %v6678_v62 = vmul.f32 -1.442695, %v5715_v43  ;;  %6796 = vpow2.f32 %v6677_v46  ;;  %v5716_v22 = vadd.f32 %v5634_v39, %v5418_v50  ;;  %v5425_v46 = vadd.f32 %v10489_v27, %v10440_v49 }
 0x399   : > { %v5638_v1 = vpop.f32.mrf.mxu1 }
 0x39a   : > { %v5717_v52 = vadd.f32 %v5638_v1, %v5419_v15  ;;  %6798 = vpow2.f32 %v6678_v62  ;;  %v6679_v16 = vmul.f32 -1.442695, %v5716_v22  ;;  %v10547_v1 = vpop.f32.mrf.mxu0 }
 0x39b   : > { %v5640_v35 = vpop.f32.mrf.mxu1  ;;  %v6787_v44 = vpop.eup %6786 }
 0x39c   : > { %v5718_v2 = vadd.f32 %v5640_v35, %v5420_v42  ;;  %v6680_v47 = vmul.f32 -1.442695, %v5717_v52  ;;  %v5813_v39 = vadd.f32 1.0, %v6787_v44  ;;  %v5426_v35 = vadd.f32 %v10495_v10, %v10445_v31 }
 0x39d   : > { %v5644_v7 = vpop.f32.mrf.mxu1  ;;  %v6789_v14 = vpop.eup %6788 }
 0x39e   : > { %v5719_v61 = vadd.f32 %v5644_v7, %v5421_v58  ;;  %v6681_v3 = vmul.f32 -1.442695, %v5718_v2  ;;  %6800 = vpow2.f32 %v6680_v47  ;;  %v5814_v8 = vadd.f32 1.0, %v6789_v14  ;;  %v10553_v47 = vpop.f32.mrf.mxu0 }
 0x39f   : > { %v5646_v36 = vpop.f32.mrf.mxu1  ;;  %v6791_v4 = vpop.eup %6790  ;;  %v5427_v7 = vadd.f32 %v10501_v45, %v10448_v55  ;;  %v5429_v45 = vadd.f32 %v10511_v59, %v10456_v24  ;;  %v5431_v24 = vadd.f32 %v10525_v37, %v10464_v38  ;;  %v5432_v38 = vadd.f32 %v10531_v0, %v10469_v48 }
 0x3a0   : > { %v5720_v56 = vadd.f32 %v5646_v36, %v5422_v54  ;;  %v6682_v41 = vmul.f32 -1.442695, %v5719_v61  ;;  %6802 = vpow2.f32 %v6681_v3  ;;  %v5815_v42 = vadd.f32 1.0, %v6791_v4 }
 0x3a1   : > { %v5650_v30 = vpop.f32.mrf.mxu1  ;;  %v6793_v19 = vpop.eup %6792  ;;  %v5428_v36 = vadd.f32 %v10503_v32, %v10453_v9  ;;  %v5430_v32 = vadd.f32 %v10519_v12, %v10461_v34  ;;  %v4839_v34 = vadd.f32 %v10350_v21, %v10338_v18 }
 0x3a2   : > { %v5721_v17 = vadd.f32 %v5650_v30, %v5423_v53  ;;  %v6683_v25 = vmul.f32 -1.442695, %v5720_v56  ;;  %6804 = vpow2.f32 %v6682_v41  ;;  %v5816_v49 = vadd.f32 1.0, %v6793_v19  ;;  %v10559_v41 = vpop.f32.mrf.mxu0 }
 0x3a3   : > { %v5652_v28 = vpop.f32.mrf.mxu1  ;;  %v6795_v51 = vpop.eup %6794 }
 0x3a4   : > { %v6684_v33 = vmul.f32 -1.442695, %v5721_v17  ;;  %v5722_v43 = vadd.f32 %v5652_v28, %v5424_v57  ;;  %6806 = vpow2.f32 %v6683_v25  ;;  %v5817_v61 = vadd.f32 1.0, %v6795_v51  ;;  %v5396_v4 = vpop.f32.mrf.mxu0 }
 0x3a5   : > { %v5656_v6 = vpop.f32.mrf.mxu1  ;;  %6808 = vpow2.f32 %v6679_v16  ;;  %v6797_v62 = vpop.eup %6796  ;;  %v5137_v51 = vadd.f32 %v10479_v26, %v4839_v34 }
 0x3a6   : > { %6810 = vpow2.f32 %v6684_v33  ;;  %v6685_v58 = vmul.f32 -1.442695, %v5722_v43  ;;  %v5723_v2 = vadd.f32 %v5656_v6, %v5425_v46  ;;  %v5818_v31 = vadd.f32 1.0, %v6797_v62  ;;  %v5400_v62 = vpop.f32.mrf.mxu0 }
 0x3a7   : > { %v5658_v15 = vpop.f32.mrf.mxu1  ;;  %6812 = vrcp.f32 %v5813_v39  ;;  %v6799_v54 = vpop.eup %6798 }
 0x3a8   : > { %6814 = vrcp.f32 %v5814_v8  ;;  %v5724_v50 = vadd.f32 %v5658_v15, %v5426_v35  ;;  %v6686_v3 = vmul.f32 -1.442695, %v5723_v2  ;;  %v5819_v55 = vadd.f32 1.0, %v6799_v54  ;;  %v11002_v54 = vld [vmem:[#allocation25_spill] sm:$0xff] }
 0x3a9   : > { %v5662_v52 = vpop.f32.mrf.mxu1  ;;  %6816 = vrcp.f32 %v5815_v42  ;;  %v4840_v8 = vadd.f32 %v10355_v20, %v10343_v60  ;;  %v5435_v60 = vadd.f32 %v10547_v1, %v5137_v51 }
 0x3aa   : > { %v5725_v10 = vadd.f32 %v5662_v52, %v5427_v7  ;;  %6818 = vpow2.f32 %v6685_v58  ;;  %v6687_v17 = vmul.f32 -1.442695, %v5724_v50  ;;  %v4841_v52 = vadd.f32 %v10360_v5, %v10348_v23 }
 0x3ab   : > { %v5664_v27 = vpop.f32.mrf.mxu1  ;;  %v6801_v56 = vpop.eup %6800  ;;  %6820 = vrcp.f32 %v5816_v49  ;;  %v5138_v58 = vadd.f32 %v10481_v40, %v4840_v8  ;;  %v4842_v7 = vadd.f32 %v10365_v11, %v10353_v13  ;;  %v11001_v49 = vld [vmem:[#allocation96_spill] sm:$0xff] }
 0x3ac   : > { %v5726_v22 = vadd.f32 %v5664_v27, %v5428_v36  ;;  %6822 = vrcp.f32 %v5817_v61  ;;  %v6688_v9 = vmul.f32 -1.442695, %v5725_v10  ;;  %v5821_v25 = vadd.f32 1.0, %v6801_v56  ;;  %v11004_v10 = vld [vmem:[#allocation11_spill] sm:$0xff]  ;;  %v11005_v56 = vld [vmem:[#allocation28_spill] sm:$0xff] }
 0x3ad   : > { %v5668_v53 = vpop.f32.mrf.mxu1  ;;  %v6803_v28 = vpop.eup %6802  ;;  %6824 = vrcp.f32 %v5818_v31  ;;  %v5433_v23 = vadd.f32 %v10539_v29, %v11001_v49  ;;  %v5139_v61 = vadd.f32 %v11002_v54, %v4841_v52  ;;  %v5436_v40 = vadd.f32 %v10553_v47, %v5138_v58  ;;  %v11003_v31 = vld [vmem:[#allocation84_spill] sm:$0xff]  ;;  %v11014_v52 = vld [vmem:[#allocation34_spill] sm:$0xff] }
 0x3ae   : > { %v5727_v44 = vadd.f32 %v5668_v53, %v5429_v45  ;;  %6826 = vpow2.f32 %v6686_v3  ;;  %v6689_v59 = vmul.f32 -1.442695, %v5726_v22  ;;  %v5822_v33 = vadd.f32 1.0, %v6803_v28  ;;  %v5402_v3 = vpop.f32.mrf.mxu0  ;;  %v11007_v28 = vld [vmem:[#allocation88_spill] sm:$0xff] }
 0x3af   : > { %v5670_v30 = vpop.f32.mrf.mxu1  ;;  %v6805_v14 = vpop.eup %6804  ;;  %6828 = vrcp.f32 %v5819_v55  ;;  %v4843_v53 = vadd.f32 %v11004_v10, %v11003_v31  ;;  %v5140_v45 = vadd.f32 %v11005_v56, %v4842_v7  ;;  %v5437_v55 = vadd.f32 %v10559_v41, %v5139_v61 }
 0x3b0   : > { %v5728_v16 = vadd.f32 %v5670_v30, %v5430_v32  ;;  %6830 = vpow2.f32 %v6687_v17  ;;  %v6690_v12 = vmul.f32 -1.442695, %v5727_v44  ;;  %v5823_v37 = vadd.f32 1.0, %v6805_v14  ;;  %v11006_v17 = vld [vmem:[#allocation89_spill] sm:$0xff]  ;;  %v11009_v14 = vld [vmem:[#allocation90_spill] sm:$0xff] }
 0x3b1   : > { %v5674_v57 = vpop.f32.mrf.mxu1  ;;  %v6807_v43 = vpop.eup %6806  ;;  %6832 = vpow2.f32 %v6688_v9  ;;  %v4844_v32 = vadd.f32 %v11007_v28, %v11006_v17  ;;  %v11008_v9 = vld [vmem:[#allocation98_spill] sm:$0xff] }
 0x3b2   : > { %v5729_v39 = vadd.f32 %v5674_v57, %v5431_v24  ;;  %v10567_v19 = vpop.eup %6808  ;;  %6834 = vrcp.f32 %v5821_v25  ;;  %v6691_v42 = vmul.f32 -1.442695, %v5728_v16  ;;  %v5824_v35 = vadd.f32 1.0, %v6807_v43  ;;  %v11011_v43 = vld [vmem:[#allocation31_spill] sm:$0xff] }
 0x3b3   : > { %v5676_v6 = vpop.f32.mrf.mxu1  ;;  %v6811_v46 = vpop.eup %6810  ;;  %6836 = vpow2.f32 %v6689_v59  ;;  %v5434_v44 = vadd.f32 %v10543_v63, %v11008_v9  ;;  %v5141_v24 = vadd.f32 %v11009_v14, %v4843_v53  ;;  %v5438_v59 = vadd.f32 %v5396_v4, %v5140_v45  ;;  %v11012_v63 = vld [vmem:[#allocation99_spill] sm:$0xff] }
 0x3b4   : > { %v10574_v21 = vpop.eup %6812  ;;  %6838 = vrcp.f32 %v5822_v33  ;;  %v5730_v48 = vadd.f32 %v5676_v6, %v5432_v38  ;;  %v6692_v20 = vmul.f32 -1.442695, %v5729_v39  ;;  %v5825_v5 = vadd.f32 1.0, %v6811_v46  ;;  %v11010_v33 = vld [vmem:[#allocation91_spill] sm:$0xff] }
 0x3b5   : > { %v5680_v15 = vpop.f32.mrf.mxu1  ;;  %v10578_v0 = vpop.eup %6814  ;;  %6840 = vpow2.f32 %v6690_v12  ;;  %v4845_v34 = vadd.f32 %v11011_v43, %v11010_v33  ;;  %v5439_v46 = vadd.f32 %v5400_v62, %v5141_v24  ;;  %v5820_v56 = vadd.f32 1.0, %v10567_v19  ;;  %v5894_v19 = vld [vmem:[%s10617_s15 + $0x8] sm:$0xff]  ;;  %v5895_v24 = vld [vmem:[%s10617_s15 + $0x10] sm:$0xff] }
 0x3b6   : > { %v10582_v2 = vpop.eup %6816  ;;  %6842 = vrcp.f32 %v5823_v37  ;;  %v6693_v13 = vmul.f32 -1.442695, %v5730_v48  ;;  %v5731_v11 = vadd.f32 %v5680_v15, %v5433_v23  ;;  %v5406_v12 = vpop.f32.mrf.mxu0  ;;  %v5142_v37 = vadd.f32 %v11012_v63, %v4844_v32 }
 0x3b7   : > { %v5682_v18 = vpop.f32.mrf.mxu1  ;;  %v6819_v27 = vpop.eup %6818  ;;  %6844 = vpow2.f32 %v6691_v42  ;;  %v11013_v42 = vld [vmem:[#allocation85_spill] sm:$0xff] }
 0x3b8   : > { %v10590_v36 = vpop.eup %6820  ;;  %6846 = vrcp.f32 %v5824_v35  ;;  %v5826_v57 = vadd.f32 1.0, %v6819_v27  ;;  %v6694_v39 = vmul.f32 -1.442695, %v5731_v11  ;;  %v5732_v15 = vadd.f32 %v5682_v18, %v5434_v44  ;;  %v5408_v23 = vpop.f32.mrf.mxu0  ;;  %v11016_v27 = vld [vmem:[#allocation92_spill] sm:$0xff] }
 0x3b9   : > { %v5686_v26 = vpop.f32.mrf.mxu1  ;;  %v10594_v29 = vpop.eup %6822  ;;  %6848 = vpow2.f32 %v6692_v20  ;;  %v4846_v35 = vadd.f32 %v11014_v52, %v11013_v42 }
 0x3ba   : > { %v5733_v1 = vadd.f32 %v5686_v26, %v5435_v60  ;;  %v10598_v30 = vpop.eup %6824  ;;  %6850 = vrcp.f32 %v5825_v5  ;;  %v11015_v60 = vld [vmem:[#allocation103_spill] sm:$0xff]  ;;  %v5440_v26 = vadd.f32 %v5402_v3, %v5142_v37  ;;  %v6695_v62 = vmul.f32 -1.442695, %v5732_v15  ;;  %v5897_v37 = vld [vmem:[%s10617_s15 + $0x20] sm:$0xff] }
 0x3bb   : > { %v5688_v50 = vpop.f32.mrf.mxu1  ;;  %v6827_v25 = vpop.eup %6826  ;;  %v5143_v20 = vadd.f32 %v11015_v60, %v4845_v34  ;;  %v5144_v54 = vadd.f32 %v11016_v27, %v4846_v35  ;;  %v5898_v35 = vld [vmem:[%s10617_s15 + $0x28] sm:$0xff]  ;;  %v5900_v27 = vld [vmem:[%s10617_s15 + $0x38] sm:$0xff] }
 0x3bc   : > { %v5734_v47 = vadd.f32 %v5688_v50, %v5436_v40  ;;  %6852 = vtanh.f32 %v5733_v1  ;;  %v10605_v6 = vpop.eup %6828  ;;  %v5827_v48 = vadd.f32 1.0, %v6827_v25 }
 0x3bd   : > { %v5692_v22 = vpop.f32.mrf.mxu1  ;;  %6854 = vpow2.f32 %v6693_v13  ;;  %v6831_v38 = vpop.eup %6830  ;;  %v5441_v61 = vadd.f32 %v5406_v12, %v5143_v20  ;;  %v5442_v53 = vadd.f32 %v5408_v23, %v5144_v54  ;;  %v5896_v12 = vld [vmem:[%s10617_s15 + $0x18] sm:$0xff] }
 0x3be   : > { %v5735_v16 = vadd.f32 %v5692_v22, %v5437_v55  ;;  %6856 = vtanh.f32 %v5734_v47  ;;  %v6833_v4 = vpop.eup %6832  ;;  %v5828_v31 = vadd.f32 1.0, %v6831_v38  ;;  %v5893_v22 = vld [vmem:[%s10617_s15] sm:$0xff] }
 0x3bf   : > { %v5694_v41 = vpop.f32.mrf.mxu1  ;;  %6858 = vrcp.f32 %v5826_v57  ;;  %v6835_v58 = vpop.eup %6834  ;;  %v5829_v32 = vadd.f32 1.0, %v6833_v4 }
 0x3c0   : > { %v5736_v8 = vadd.f32 %v5694_v41, %v5438_v59  ;;  %6860 = vtanh.f32 %v5735_v16  ;;  %v6837_v49 = vpop.eup %6836  ;;  %v5901_v44 = vmul.f32 %v6835_v58, %v5893_v22 }
 0x3c1   : > { %v5698_v51 = vpop.f32.mrf.mxu1  ;;  %6862 = vpow2.f32 %v6694_v39  ;;  %v6839_v5 = vpop.eup %6838  ;;  %v5830_v14 = vadd.f32 1.0, %v6837_v49 }
 0x3c2   : > { %v5737_v7 = vadd.f32 %v5698_v51, %v5439_v46  ;;  %6864 = vtanh.f32 %v5736_v8  ;;  %v6841_v50 = vpop.eup %6840  ;;  %v5902_v41 = vmul.f32 %v6839_v5, %v5894_v19 }
 0x3c3   : > { %v5700_v18 = vpop.f32.mrf.mxu1  ;;  %6866 = vrcp.f32 %v5827_v48  ;;  %v6843_v10 = vpop.eup %6842  ;;  %v5831_v34 = vadd.f32 1.0, %v6841_v50 }
 0x3c4   : > { %v5738_v40 = vadd.f32 %v5700_v18, %v5440_v26  ;;  %6868 = vtanh.f32 %v5737_v7  ;;  %v6845_v11 = vpop.eup %6844  ;;  %v5903_v15 = vmul.f32 %v6843_v10, %v5895_v24  ;;  %v5899_v7 = vld [vmem:[%s10617_s15 + $0x30] sm:$0xff] }
 0x3c5   : > { %v5704_v1 = vpop.f32.mrf.mxu1  ;;  %6870 = vpow2.f32 %v6695_v62  ;;  %v6847_v45 = vpop.eup %6846 }
 0x3c6   : > { %v5739_v3 = vadd.f32 %v5704_v1, %v5441_v61  ;;  %6872 = vtanh.f32 %v5738_v40  ;;  %v6849_v47 = vpop.eup %6848  ;;  %v5904_v51 = vmul.f32 %v6847_v45, %v5896_v12 }
 0x3c7   : > { %v5706_v13 = vpop.f32.mrf.mxu1  ;;  %6874 = vrcp.f32 %v5828_v31  ;;  %v6851_v17 = vpop.eup %6850  ;;  %v5833_v52 = vadd.f32 1.0, %v6849_v47 }
 0x3c8   : > { %v5740_v55 = vadd.f32 %v5706_v13, %v5442_v53  ;;  %6876 = vtanh.f32 %v5739_v3  ;;  %v5905_v58 = vmul.f32 %v6851_v17, %v5897_v37 }
 0x3c9   : > { %v6853_v28 = vpop.eup %6852  ;;  %6878 = vrcp.f32 %v5820_v56 }
 0x3ca   : > { %v6855_v9 = vpop.eup %6854  ;;  %v5909_v57 = vmul.f32 %v6853_v28, %v10574_v21  ;;  %6880 = vtanh.f32 %v5740_v55 }
 0x3cb   : > { %v6857_v25 = vpop.eup %6856  ;;  %6882 = vrcp.f32 %v5829_v32  ;;  %v5834_v26 = vadd.f32 1.0, %v6855_v9 }
 0x3cc   : > { %v6859_v59 = vpop.eup %6858  ;;  %v5917_v16 = vadd.f32 %v5909_v57, %v5901_v44  ;;  %v5910_v33 = vmul.f32 %v6857_v25, %v10578_v0  ;;  %v5832_v0 = vadd.f32 1.0, %v6845_v11 }
 0x3cd   : > { %v6861_v43 = vpop.eup %6860  ;;  %v5906_v49 = vmul.f32 %v6859_v59, %v5898_v35 }
 0x3ce   : > { %v6863_v39 = vpop.eup %6862  ;;  %6884 = vtanh.f32 %v5917_v16  ;;  %5949 = vst [vmem:[%s10626_s21 + $0x40] sm:$0xff] %v5917_v16  ;;  %v5918_v21 = vadd.f32 %v5910_v33, %v5902_v41  ;;  %v5911_v38 = vmul.f32 %v6861_v43, %v10582_v2 }
 0x3cf   : > { %v6865_v63 = vpop.eup %6864  ;;  %6886 = vrcp.f32 %v5830_v14  ;;  %v5835_v5 = vadd.f32 1.0, %v6863_v39 }
 0x3d0   : > { %v6867_v46 = vpop.eup %6866  ;;  %6888 = vtanh.f32 %v5918_v21  ;;  %5950 = vst [vmem:[%s10626_s21 + $0x48] sm:$0xff] %v5918_v21  ;;  %v5919_v8 = vadd.f32 %v5911_v38, %v5903_v15  ;;  %v5912_v4 = vmul.f32 %v6865_v63, %v10590_v36 }
 0x3d1   : > { %v6869_v42 = vpop.eup %6868  ;;  %6890 = vrcp.f32 %v5831_v34  ;;  %v5907_v61 = vmul.f32 %v6867_v46, %v5899_v7 }
 0x3d2   : > { %v6871_v48 = vpop.eup %6870  ;;  %6892 = vtanh.f32 %v5919_v8  ;;  %5951 = vst [vmem:[%s10626_s21 + $0x50] sm:$0xff] %v5919_v8  ;;  %v5920_v2 = vadd.f32 %v5912_v4, %v5904_v51  ;;  %v5913_v60 = vmul.f32 %v6869_v42, %v10594_v29 }
 0x3d3   : > { %v6873_v20 = vpop.eup %6872  ;;  %6894 = vrcp.f32 %v5832_v0  ;;  %v5836_v50 = vadd.f32 1.0, %v6871_v48 }
 0x3d4   : > { %v6875_v18 = vpop.eup %6874  ;;  %6896 = vtanh.f32 %v5920_v2  ;;  %5952 = vst [vmem:[%s10626_s21 + $0x58] sm:$0xff] %v5920_v2  ;;  %v5921_v36 = vadd.f32 %v5913_v60, %v5905_v58  ;;  %v5914_v23 = vmul.f32 %v6873_v20, %v10598_v30 }
 0x3d5   : > { %v6877_v62 = vpop.eup %6876  ;;  %6898 = vrcp.f32 %v5833_v52  ;;  %v5908_v30 = vmul.f32 %v6875_v18, %v5900_v27 }
 0x3d6   : > { %v6879_v54 = vpop.eup %6878  ;;  %6900 = vtanh.f32 %v5921_v36  ;;  %5953 = vst [vmem:[%s10626_s21 + $0x60] sm:$0xff] %v5921_v36  ;;  %v5922_v29 = vadd.f32 %v5914_v23, %v5906_v49  ;;  %v5915_v40 = vmul.f32 %v6877_v62, %v10605_v6 }
 0x3d7   : > { %v6881_v1 = vpop.eup %6880  ;;  %6902 = vrcp.f32 %v5834_v26 }
 0x3d8   : > { %6904 = vtanh.f32 %v5922_v29  ;;  %5954 = vst [vmem:[%s10626_s21 + $0x68] sm:$0xff] %v5922_v29  ;;  %v5923_v31 = vadd.f32 %v5915_v40, %v5907_v61  ;;  %v5916_v10 = vmul.f32 %v6881_v1, %v6879_v54  ;;  %v6883_v53 = vpop.eup %6882 }
 0x3d9   : > { %6906 = vrcp.f32 %v5835_v5 }
 0x3da   : > { %6908 = vtanh.f32 %v5923_v31  ;;  %5955 = vst [vmem:[%s10626_s21 + $0x70] sm:$0xff] %v5923_v31  ;;  %v5924_v3 = vadd.f32 %v5916_v10, %v5908_v30 }
 0x3db   : > { %v6885_v13 = vpop.eup %6884  ;;  %6910 = vrcp.f32 %v5836_v50 }
 0x3dc   : > { %v6887_v6 = vpop.eup %6886  ;;  %v5933_v11 = vmul.f32 %v6885_v13, %v6883_v53  ;;  %6912 = vtanh.f32 %v5924_v3  ;;  %5956 = vst [vmem:[%s10626_s21 + $0x78] sm:$0xff] %v5924_v3 }
 0x3dd   : > { %v6889_v56 = vpop.eup %6888 }
 0x3de   : > { %v6891_v45 = vpop.eup %6890  ;;  %5941 = vst [vmem:[%s10626_s21] sm:$0xff] %v5933_v11  ;;  %v5934_v55 = vmul.f32 %v6889_v56, %v6887_v6 }
 0x3df   : > { %v6893_v47 = vpop.eup %6892 }
 0x3e0   : > { %v6895_v22 = vpop.eup %6894  ;;  %5942 = vst [vmem:[%s10626_s21 + $0x8] sm:$0xff] %v5934_v55  ;;  %v5935_v17 = vmul.f32 %v6893_v47, %v6891_v45 }
 0x3e1   : > { %v6897_v28 = vpop.eup %6896 }
 0x3e2   : > { %v6899_v32 = vpop.eup %6898  ;;  %5943 = vst [vmem:[%s10626_s21 + $0x10] sm:$0xff] %v5935_v17  ;;  %v5936_v19 = vmul.f32 %v6897_v28, %v6895_v22 }
 0x3e3   : > { %v6901_v9 = vpop.eup %6900 }
 0x3e4   : > { %v6903_v44 = vpop.eup %6902  ;;  %5944 = vst [vmem:[%s10626_s21 + $0x18] sm:$0xff] %v5936_v19  ;;  %v5937_v57 = vmul.f32 %v6901_v9, %v6899_v32 }
 0x3e5   : > { %v6905_v25 = vpop.eup %6904 }
 0x3e6   : > { %v6907_v14 = vpop.eup %6906  ;;  %5945 = vst [vmem:[%s10626_s21 + $0x20] sm:$0xff] %v5937_v57  ;;  %v5938_v24 = vmul.f32 %v6905_v25, %v6903_v44 }
 0x3e7   : > { %v6909_v59 = vpop.eup %6908 }
 0x3e8   : > { %v6911_v16 = vpop.eup %6910  ;;  %5946 = vst [vmem:[%s10626_s21 + $0x28] sm:$0xff] %v5938_v24  ;;  %v5939_v41 = vmul.f32 %v6909_v59, %v6907_v14 }
 0x3e9   : > { %v6913_v33 = vpop.eup %6912 }
 0x3ea   : > { %5947 = vst [vmem:[%s10626_s21 + $0x30] sm:$0xff] %v5939_v41  ;;  %v5940_v43 = vmul.f32 %v6913_v33, %v6911_v16 }
 0x3ec   : > { %5948 = vst [vmem:[%s10626_s21 + $0x38] sm:$0xff] %v5940_v43 }
 0x3ed   : > { %6934 = shalt.err (!%p6931_p12)
}
 0x3ee   : > { %s6935_s15 = scalar_lea.hbm %s10656_s2, 2048  ;;  %s6939_s12 = scalar_lea.hbm %s10716_s8, 6144 }
 0x3ef   : > { %p6936_p13 = scmp.ne.s32.totalorder %s10656_s2, %s6935_s15  ;;  %p6940_p2 = scmp.lt.s32.totalorder %s10656_s2, %s10716_s8 }
 0x3f0   : > { %p6941_p3 = scmp.lt.s32.totalorder %s6939_s12, %s6935_s15 }
 0x3f1   : > { %p6937_p0 = pnand %p6936_p13, %p7123_p8 }
 0x3f2   : > { %p6942_p4 = por %p6941_p3, %p6940_p2 }
 0x3f3   : > { %p6938_p1 = pneg %p6937_p0 }
 0x3f5   : > { %p6943_p5 = pnand %p6942_p4, %p6938_p1 }
 0x3f7   : > { %6946 = shalt.err (!%p6943_p5)
}
 0x3f8   : > { %s7010_s14 = smov 256   ;;  %s7011_s3 = smov 768  }
 0x3f9   : > { %s7012_s23 = smov 16  }
 0x3fa   : > { %6716 = dma.vmem_to_hbm [thread:$0]  (%p7123_p8), %s10658_s17, 2048, %s10656_s2, %s5958_s11, %s7010_s14, %s7011_s3, %s7012_s23  }
 0x3fb PF: > { %p6722_p6 = scmp.ge.s32.totalorder %s6997_s10, 2  ;;  %s5986_s28 = sand.u32 1, %s6977_s27  }
 0x3fc   : > { %s5987_s15 = scalar_lea.sflag [#allocation8], %s5986_s28 }
 0x3fd   : > { %p6719_p7 = pnand %p6722_p6, %p7132_p11 }
 0x3ff   : > { %p6720_p9 = pneg %p6719_p7 }
 0x401   : > { %6972 = dma.done.wait (%p6720_p9), %s5987_s15, 2048  }
 0x402   : > { %6974 = vsyncadd (%p6720_p9), %s5987_s15, 4294965248  ;;  %p18_p8 = scmp.ge.s32.totalorder %s7093_s13, 5   ;;  %s11017_s27 = smov %s6989_s30 }
 0x403   : > { %s11018_s28 = smov %s6985_s29  ;;  %s11019_s29 = smov %s7130_s25 }
 0x404   : > { %s11020_s30 = smov %s6993_s9  ;;  %s11021_s9 = smov %s7104_s18 }
 0x405   : > { %s11022_s10 = smov %s7093_s13  ;;  %20 = sbr.rel (!%p18_p8) target bundleno = 7 (0x7), region = 214 }
 0x40a   :  { %5992 = vsyncpa [#allocation8], 1 }
 0x40b   :  { %5994 = vsyncpa [#allocation8 + $0x1], 1 }

</bundles_post_ra>
